<compile_context>
chip_gen: v6e
topology: v6e:2x2x1
jax: 0.10.0
libtpu: 0.0.40
codegen_flags: <defaults>
</compile_context>

<pallas_src>
import functools

import jax
import jax.numpy as jnp
from jax.experimental import pallas as pl
from jax.experimental.pallas import tpu as pltpu


def _round_up(x, m):
    return (x + m - 1) // m * m


def _skipgram_fused_kernel(emb_ref, w_ref, out_ref, m_ref, l_ref, *,
                           v_true, v_pad, tv, nv):
    """Single pass over the vocab; logits cached in the resident output block.

    emb_ref: (tb, E)      gathered embeddings for this batch tile (resident per i)
    w_ref  : (tv, E)      streamed weight tile in natural (V, E) layout
    out_ref: (tb, V_pad)  f32; raw logits during the sweep, log-probs at the end
    m_ref  : (tb, 1) f32  running row max (online LSE)
    l_ref  : (tb, 1) f32  running scaled exp-sum
    """
    k = pl.program_id(1)

    # MXU matmul, f32 accumulation; contract last axes so W keeps (V, E) layout.
    logits = jax.lax.dot_general(
        emb_ref[...], w_ref[...],
        dimension_numbers=(((1,), (1,)), ((), ())),
        preferred_element_type=jnp.float32)                      # (tb, tv)

    if v_pad > v_true:
        # Padded vocab columns exist; mask them out of the LSE (cheap VALU work
        # next to the matmul). Output values at padded columns stay garbage and
        # are sliced off in the wrapper.
        col = jax.lax.broadcasted_iota(jnp.int32, (1, tv), 1) + k * tv
        lm = jnp.where(col < v_true, logits, jnp.float32(-1e30))
    else:
        lm = logits

    if nv == 1:
        # Whole vocab resident in one tile: plain full-row log_softmax.
        row_max = jnp.max(lm, axis=-1, keepdims=True)
        lse = row_max + jnp.log(jnp.sum(jnp.exp(lm - row_max), axis=-1,
                                        keepdims=True))
        out_ref[...] = logits - lse
        return

    @pl.when(k == 0)
    def _init():
        m_ref[...] = jnp.full_like(m_ref, -1e30)
        l_ref[...] = jnp.zeros_like(l_ref)

    # Cache raw logits in the resident output block (lane offset is a multiple
    # of 128 -> aligned, unmasked stores).
    off = pl.multiple_of(k * tv, 128)
    out_ref[:, pl.ds(off, tv)] = logits

    # Online LSE update. exp(-1e30 - m_new) underflows to 0 for padded columns,
    # so no extra select is needed on the exp path.
    m_old = m_ref[...]
    m_new = jnp.maximum(m_old, jnp.max(lm, axis=-1, keepdims=True))
    l_ref[...] = jnp.exp(m_old - m_new) * l_ref[...] + jnp.sum(
        jnp.exp(lm - m_new), axis=-1, keepdims=True)
    m_ref[...] = m_new

    @pl.when(k == nv - 1)
    def _finalize():
        lse = m_ref[...] + jnp.log(l_ref[...])                   # (tb, 1)
        out_ref[...] = out_ref[...] - lse


def _skipgram_twopass_kernel(emb_ref, w_ref, out_ref, m_ref, l_ref, *,
                             v_true, v_pad, tv):
    """Fallback for very large V: phase 0 online-LSE sweep, phase 1 recompute."""
    phase = pl.program_id(1)
    k = pl.program_id(2)

    logits = jax.lax.dot_general(
        emb_ref[...], w_ref[...],
        dimension_numbers=(((1,), (1,)), ((), ())),
        preferred_element_type=jnp.float32)                      # (tb, tv)

    if v_pad > v_true:
        col = jax.lax.broadcasted_iota(jnp.int32, (1, tv), 1) + k * tv
        lm = jnp.where(col < v_true, logits, jnp.float32(-1e30))
    else:
        lm = logits

    @pl.when((phase == 0) & (k == 0))
    def _init():
        m_ref[...] = jnp.full_like(m_ref, -1e30)
        l_ref[...] = jnp.zeros_like(l_ref)

    @pl.when(phase == 0)
    def _accumulate_lse():
        m_old = m_ref[...]
        m_new = jnp.maximum(m_old, jnp.max(lm, axis=-1, keepdims=True))
        l_ref[...] = jnp.exp(m_old - m_new) * l_ref[...] + jnp.sum(
            jnp.exp(lm - m_new), axis=-1, keepdims=True)
        m_ref[...] = m_new

    @pl.when(phase == 1)
    def _write_output():
        lse = m_ref[...] + jnp.log(l_ref[...])
        out_ref[...] = (logits - lse).astype(out_ref.dtype)


def skipgram_forward(indices, emb_table, linear_weight, *,
                     tb_max=256, tv_max=2048,
                     compute_dtype=jnp.bfloat16,
                     force_two_pass=False):
    """Pallas implementation of SkipGram.forward.

    indices:       (B,)   integer token ids
    emb_table:     (V, E) float  -- nn.Embedding.weight
    linear_weight: (V, E) float  -- nn.Linear(E, V, bias=False).weight
    returns:       (B, V) float32 log-probabilities (log_softmax over vocab)
    """
    B = int(indices.shape[0])
    V, E = emb_table.shape
    assert linear_weight.shape == (V, E)

    itemsize = jnp.dtype(compute_dtype).itemsize

    # ---- tiling ----
    tb = min(tb_max, _round_up(B, 8))
    B_pad = _round_up(B, tb)
    nb = B_pad // tb

    V128 = _round_up(V, 128)
    whole_w_bytes = V128 * E * itemsize
    if whole_w_bytes <= 8 * 1024 * 1024 and not force_two_pass:
        tv = V128                                     # whole vocab in one tile
    else:
        nv0 = max(1, pl.cdiv(V128, tv_max))
        tv = _round_up(pl.cdiv(V128, nv0), 128)        # balanced, minimal padding
    nv = pl.cdiv(V128, tv)
    V_pad = nv * tv

    # VMEM need for the fused single-pass kernel: double-buffered emb/W tiles +
    # the resident (tb, V_pad) output/logits block (x2 buffers) + LSE scratch.
    tile_bytes = 2 * tb * E * itemsize + 2 * tv * E * itemsize
    fused_bytes = tile_bytes + 2 * tb * V_pad * 4 + 4 * tb * 4
    use_fused = (not force_two_pass) and fused_bytes <= 40 * 1024 * 1024

    # ---- plain-JAX glue ----
    idx = indices.astype(jnp.int32)
    if B_pad != B:
        idx = jnp.pad(idx, (0, B_pad - B))
    embeds = jnp.take(emb_table, idx, axis=0).astype(compute_dtype)  # (B_pad, E)

    # Weight stays in its natural (V, E) layout; only the vocab axis is padded
    # to a tile multiple. (In a real model, hoist this cast/pad to param setup.)
    w = linear_weight.astype(compute_dtype)
    if V_pad != V:
        w = jnp.pad(w, ((0, V_pad - V), (0, 0)))

    if use_fused:
        vmem_limit = int(min(max(2 * fused_bytes, 32 * 1024 * 1024),
                             48 * 1024 * 1024))
        kernel = functools.partial(_skipgram_fused_kernel,
                                   v_true=V, v_pad=V_pad, tv=tv, nv=nv)
        out = pl.pallas_call(
            kernel,
            out_shape=jax.ShapeDtypeStruct((B_pad, V_pad), jnp.float32),
            grid_spec=pltpu.PrefetchScalarGridSpec(
                num_scalar_prefetch=0,
                grid=(nb, nv),                               # (batch, vocab)
                in_specs=[
                    pl.BlockSpec((tb, E), lambda i, k: (i, 0)),   # resident per i
                    pl.BlockSpec((tv, E), lambda i, k: (k, 0)),   # streamed W tile
                ],
                # Output block resident across the vocab axis; fully written
                # before its batch index changes.
                out_specs=pl.BlockSpec((tb, V_pad), lambda i, k: (i, 0)),
                scratch_shapes=[pltpu.VMEM((tb, 1), jnp.float32),   # running max m
                                pltpu.VMEM((tb, 1), jnp.float32)],  # running sum l
            ),
            compiler_params=pltpu.CompilerParams(
                dimension_semantics=("parallel", "arbitrary"),
                vmem_limit_bytes=vmem_limit,
            ),
        )(embeds, w)
    else:
        twopass_bytes = tile_bytes + 4 * tb * tv * 4 + 4 * tb * 4
        vmem_limit = int(min(max(2 * twopass_bytes, 32 * 1024 * 1024),
                             48 * 1024 * 1024))
        kernel = functools.partial(_skipgram_twopass_kernel,
                                   v_true=V, v_pad=V_pad, tv=tv)
        out = pl.pallas_call(
            kernel,
            out_shape=jax.ShapeDtypeStruct((B_pad, V_pad), jnp.float32),
            grid_spec=pltpu.PrefetchScalarGridSpec(
                num_scalar_prefetch=0,
                grid=(nb, 2, nv),                            # (batch, phase, vocab)
                in_specs=[
                    pl.BlockSpec((tb, E), lambda i, p, k: (i, 0)),
                    pl.BlockSpec((tv, E), lambda i, p, k: (k, 0)),
                ],
                # Phase 0 parks on block (i, 0) without writing; phase 1 fills
                # (i, k). Invariant: every block is written before its index
                # changes -- do not reorder grid axes without preserving this.
                out_specs=pl.BlockSpec((tb, tv), lambda i, p, k: (i, p * k)),
                scratch_shapes=[pltpu.VMEM((tb, 1), jnp.float32),
                                pltpu.VMEM((tb, 1), jnp.float32)],
            ),
            compiler_params=pltpu.CompilerParams(
                dimension_semantics=("parallel", "arbitrary", "arbitrary"),
                vmem_limit_bytes=vmem_limit,
            ),
        )(embeds, w)

    return out[:B, :V]


if __name__ == "__main__":
    # Shapes implied by the module (vocabulary_size=5000, embedding_size=300),
    # small batch. Exercises vocab padding, the whole-W fast path, and the
    # tiled two-pass fallback.
    vocabulary_size = 5000
    embedding_size = 300
    batch = 16

    key = jax.random.PRNGKey(0)
    k_emb, k_lin, k_idx = jax.random.split(key, 3)

    emb_table = jax.random.normal(
        k_emb, (vocabulary_size, embedding_size), jnp.float32)
    linear_weight = jax.random.normal(
        k_lin, (vocabulary_size, embedding_size), jnp.float32) * 0.05
    indices = jax.random.randint(
        k_idx, (batch,), 0, vocabulary_size, dtype=jnp.int32)

    # Reference in plain JAX (highest-precision matmul).
    ref_logits = jnp.dot(jnp.take(emb_table, indices, axis=0), linear_weight.T,
                         precision=jax.lax.Precision.HIGHEST)
    ref = jax.nn.log_softmax(ref_logits, axis=1)

    # 1) Default: bf16 stream, fused single-pass (whole-W fast path here).
    out_bf16 = jax.block_until_ready(
        skipgram_forward(indices, emb_table, linear_weight))
    assert out_bf16.shape == (batch, vocabulary_size)
    assert not jnp.any(jnp.isnan(out_bf16)), "NaN in bf16 kernel output"
    assert jnp.allclose(out_bf16, ref, atol=5e-2, rtol=5e-2), "bf16 mismatch"

    # 2) f32 stream through the same fused kernel: tight numerical check.
    out_f32 = jax.block_until_ready(
        skipgram_forward(indices, emb_table, linear_weight,
                         compute_dtype=jnp.float32))
    assert not jnp.any(jnp.isnan(out_f32)), "NaN in f32 kernel output"
    assert jnp.allclose(out_f32, ref, atol=1e-3, rtol=1e-3), "f32 mismatch"

    # 3) Exercise the large-vocab fallback (two-pass, vocab-tiled) path.
    out_tp = jax.block_until_ready(
        skipgram_forward(indices, emb_table, linear_weight,
                         force_two_pass=True))
    assert not jnp.any(jnp.isnan(out_tp)), "NaN in two-pass kernel output"
    assert jnp.allclose(out_tp, ref, atol=5e-2, rtol=5e-2), "two-pass mismatch"

    print("KERNEL_OK")
</pallas_src>

<mosaic_0001>
module attributes {stable_mosaic.version = 11 : i64} {
  func.func @_skipgram_fused_kernel(%arg0: i32, %arg1: i32, %arg2: memref<16x300xbf16, #tpu.memory_space<vmem>>, %arg3: memref<5120x300xbf16, #tpu.memory_space<vmem>>, %arg4: memref<16x5120xf32, #tpu.memory_space<vmem>>, %arg5: memref<16x1xf32, #tpu.memory_space<vmem>>, %arg6: memref<16x1xf32, #tpu.memory_space<vmem>>) attributes {dimension_semantics = [#tpu.dimension_semantics<parallel>, #tpu.dimension_semantics<arbitrary>], iteration_bounds = array<i64: 1, 1>, scalar_prefetch = 0 : i64, scratch_operands = 2 : i64, tpu.core_type = #tpu.core_type<tc>, window_params = [{transform_indices = @transform_0, window_bounds = array<i64: 16, 300>}, {transform_indices = @transform_1, window_bounds = array<i64: 5120, 300>}, {transform_indices = @transform_2, window_bounds = array<i64: 16, 5120>}]} {
    %c0 = arith.constant 0 : index
    %c0_0 = arith.constant 0 : index
    %0 = vector.load %arg2[%c0, %c0_0] : memref<16x300xbf16, #tpu.memory_space<vmem>>, vector<16x300xbf16>
    %c0_1 = arith.constant 0 : index
    %c0_2 = arith.constant 0 : index
    %1 = vector.load %arg3[%c0_1, %c0_2] : memref<5120x300xbf16, #tpu.memory_space<vmem>>, vector<5120x300xbf16>
    %cst = arith.constant dense<0.000000e+00> : vector<16x5120xf32>
    %2 = tpu.matmul %0, %1, %cst {dimension_numbers = #tpu.dot_dimension_numbers<[1], [1], [0], [0], [0, 0, 1, 0], [], []>} : vector<16x300xbf16>, vector<5120x300xbf16>, vector<16x5120xf32> -> vector<16x5120xf32>
    %3 = tpu.iota {dimensions = array<i32: 1>} : vector<1x5120xi32>
    %c5120_i32 = arith.constant 5120 : i32
    %4 = arith.muli %arg1, %c5120_i32 : i32
    %5 = vector.broadcast %4 : i32 to vector<1x5120xi32>
    %6 = arith.addi %3, %5 : vector<1x5120xi32>
    %c5000_i32 = arith.constant 5000 : i32
    %7 = vector.broadcast %c5000_i32 : i32 to vector<1x5120xi32>
    %8 = arith.cmpi slt, %6, %7 : vector<1x5120xi32>
    %cst_3 = arith.constant -1.000000e+30 : f32
    %9 = vector.shape_cast %8 : vector<1x5120xi1> to vector<1x5120xi1>
    %10 = vector.broadcast %9 : vector<1x5120xi1> to vector<16x5120xi1>
    %11 = vector.broadcast %cst_3 : f32 to vector<16x5120xf32>
    %12 = arith.select %10, %2, %11 : vector<16x5120xi1>, vector<16x5120xf32>
    %cst_4 = arith.constant dense<0xFF800000> : vector<16xf32>
    %13 = vector.multi_reduction <maximumf>, %12, %cst_4 [1] : vector<16x5120xf32> to vector<16xf32>
    %14 = vector.shape_cast %13 : vector<16xf32> to vector<16x1xf32>
    %15 = vector.broadcast %14 : vector<16x1xf32> to vector<16x5120xf32>
    %16 = arith.subf %12, %15 : vector<16x5120xf32>
    %17 = math.exp %16 : vector<16x5120xf32>
    %cst_5 = arith.constant dense<0.000000e+00> : vector<16xf32>
    %18 = vector.multi_reduction <add>, %17, %cst_5 [1] : vector<16x5120xf32> to vector<16xf32>
    %19 = vector.shape_cast %18 : vector<16xf32> to vector<16x1xf32>
    %20 = math.log %19 : vector<16x1xf32>
    %21 = arith.addf %14, %20 : vector<16x1xf32>
    %22 = vector.broadcast %21 : vector<16x1xf32> to vector<16x5120xf32>
    %23 = arith.subf %2, %22 : vector<16x5120xf32>
    %c0_6 = arith.constant 0 : index
    %c0_7 = arith.constant 0 : index
    %24 = vector.load %arg4[%c0_6, %c0_7] : memref<16x5120xf32, #tpu.memory_space<vmem>>, vector<16x5120xf32>
    tpu.vector_store %arg4[%c0_6, %c0_7], %23 {strides = array<i32>} : memref<16x5120xf32, #tpu.memory_space<vmem>>, vector<16x5120xf32>,
    return
  }
  func.func @transform_0(%arg0: i32, %arg1: i32) -> (i32, i32) {
    %c0_i32 = arith.constant 0 : i32
    %c0_i32_0 = arith.constant 0 : i32
    return %arg0, %c0_i32 : i32, i32
  }
  func.func @transform_1(%arg0: i32, %arg1: i32) -> (i32, i32) {
    %c0_i32 = arith.constant 0 : i32
    %c0_i32_0 = arith.constant 0 : i32
    return %arg1, %c0_i32 : i32, i32
  }
  func.func @transform_2(%arg0: i32, %arg1: i32) -> (i32, i32) {
    %c0_i32 = arith.constant 0 : i32
    %c0_i32_0 = arith.constant 0 : i32
    return %arg0, %c0_i32 : i32, i32
  }
}

</mosaic_0001>

<bundles_post_ra>
// kernel: tpu_custom_call.1
= control target key start
LH: loop header
LB: loop body
LE: loop exit
PB: predicated region body
PF: predicated region fallthrough
CT: control target
= control target key end

     0   :  { %vm6112_vm0 = vcmask 359424   ;;  %s16927_s0 = inlined_call_operand.vmem [shape: bf16[16,300], index: 0, kind: input, shape index: {}]   ;;  %s16928_s1 = inlined_call_operand.vmem [shape: bf16[5120,300], index: 1, kind: input, shape index: {}]   ;;  %s16929_s2 = inlined_call_operand.hbm [shape: f32[16,5120], index: 2, kind: output, shape index: {}]  }
   0x1   :  { %v11171_v0 = vld [vmem:[%s16928_s1 + $0xac] ss:$12 sps:$4 sm:$0xff]   ;;  %v11173_v1 = vld [vmem:[%s16928_s1 + $0x170] ss:$12 sps:$4 sm:$0xff]   ;;  %v11174_v2 = vld [vmem:[%s16928_s1 + $0xa8] ss:$12 sps:$4 sm:$0xff]  }
   0x2   :  { %7076 = vmatprep.subr.bf16.mxu0 %v11171_v0  ;;  %11008 = vmatprep.subr.msk.bf16.mxu1 %vm6112_vm0, %v11173_v1  ;;  %v11175_v3 = vld [vmem:[%s16928_s1 + $0xb0] ss:$12 sps:$4 sm:$0xff]   ;;  %v11176_v4 = vld [vmem:[%s16928_s1 + $0x94] ss:$12 sps:$4 sm:$0xff]   ;;  %v11178_v6 = vld [vmem:[%s16928_s1 + $0x158] ss:$12 sps:$4 sm:$0xff]  }
   0x3   :  { %7077 = vmatpush1.bf16.xpose.msra.mxu0 %v11174_v2  ;;  %v6138_v5 = vsel %vm6112_vm0, %v11175_v3, 0  ;;  %v11180_v7 = vld [vmem:[%s16928_s1 + $0x98] ss:$12 sps:$4 sm:$0xff]   ;;  %v11179_v8 = vld [vmem:[%s16928_s1 + $0x90] ss:$12 sps:$4 sm:$0xff]  }
   0x4   :  { %10649 = vmatpush3.bf16.xpose.msra.mxu1 %v6138_v5  ;;  %7078 = vmatprep.subr.bf16.mxu0 %v11176_v4  ;;  %v11181_v9 = vld [vmem:[%s16928_s1 + $0x7c] ss:$12 sps:$4 sm:$0xff]   ;;  %v6135_v10 = vsel %vm6112_vm0, %v11180_v7, 0  ;;  %v11183_v11 = vld [vmem:[%s16928_s1 + $0x140] ss:$12 sps:$4 sm:$0xff]  }
   0x5   :  { %11009 = vmatprep.subr.msk.bf16.mxu1 %vm6112_vm0, %v11178_v6  ;;  %v11185_v12 = vld [vmem:[%s16928_s1 + $0x80] ss:$12 sps:$4 sm:$0xff]   ;;  %v11184_v13 = vld [vmem:[%s16928_s1 + $0x78] ss:$12 sps:$4 sm:$0xff]   ;;  %v11188_v15 = vld [vmem:[%s16928_s1 + $0x128] ss:$12 sps:$4 sm:$0xff]  }
   0x6   :  { %v11186_v14 = vld [vmem:[%s16928_s1 + $0x64] ss:$12 sps:$4 sm:$0xff]   ;;  %v6132_v16 = vsel %vm6112_vm0, %v11185_v12, 0  ;;  %v11190_v17 = vld [vmem:[%s16928_s1 + $0x68] ss:$12 sps:$4 sm:$0xff]  }
   0x7   :  { %v11189_v18 = vld [vmem:[%s16928_s1 + $0x60] ss:$12 sps:$4 sm:$0xff]   ;;  %v6129_v19 = vsel %vm6112_vm0, %v11190_v17, 0  ;;  %v11193_v21 = vld [vmem:[%s16928_s1 + $0x110] ss:$12 sps:$4 sm:$0xff]  }
   0x8   :  { %v11191_v20 = vld [vmem:[%s16928_s1 + $0x4c] ss:$12 sps:$4 sm:$0xff]   ;;  %v12737_v22 = vld [vmem:[%s16927_s0 + $0x8] ss:$12 sps:$4 sm:$0xff]   ;;  %v11195_v23 = vld [vmem:[%s16928_s1 + $0x50] ss:$12 sps:$4 sm:$0xff]  }
   0x9   :  { %10664 = vmatprep.mubr.msk.bf16.mxu1 %vm6112_vm0, %v12737_v22  ;;  %v11194_v24 = vld [vmem:[%s16928_s1 + $0x48] ss:$12 sps:$4 sm:$0xff]   ;;  %v6126_v26 = vsel %vm6112_vm0, %v11195_v23, 0  ;;  %v11198_v27 = vld [vmem:[%s16928_s1 + $0xf8] ss:$12 sps:$4 sm:$0xff]  }
   0xa   :  { %v11196_v25 = vld [vmem:[%s16928_s1 + $0x34] ss:$12 sps:$4 sm:$0xff]   ;;  %v11200_v28 = vld [vmem:[%s16928_s1 + $0x38] ss:$12 sps:$4 sm:$0xff]   ;;  %v11199_v29 = vld [vmem:[%s16928_s1 + $0x30] ss:$12 sps:$4 sm:$0xff]  }
   0xb   :  { %7079 = vmatpush1.bf16.xpose.msra.mxu0 %v11179_v8  ;;  %v11201_v30 = vld [vmem:[%s16928_s1 + $0x1c] ss:$12 sps:$4 sm:$0xff]   ;;  %v6123_v31 = vsel %vm6112_vm0, %v11200_v28, 0  ;;  %v11203_v32 = vld [vmem:[%s16928_s1 + $0xe0] ss:$12 sps:$4 sm:$0xff]  }
   0xc   :  { %7080 = vmatprep.subr.bf16.mxu0 %v11181_v9  ;;  %10651 = vmatpush3.bf16.xpose.msra.mxu1 %v6135_v10  ;;  %v11205_v33 = vld [vmem:[%s16928_s1 + $0x20] ss:$12 sps:$4 sm:$0xff]   ;;  %v11204_v34 = vld [vmem:[%s16928_s1 + $0x18] ss:$12 sps:$4 sm:$0xff]   ;;  %v11208_v38 = vld [vmem:[%s16928_s1 + $0xc8] ss:$12 sps:$4 sm:$0xff]  }
   0xd   :  { %11010 = vmatprep.subr.msk.bf16.mxu1 %vm6112_vm0, %v11183_v11  ;;  %v11206_v35 = vld [vmem:[%s16928_s1 + $0x4] ss:$12 sps:$4 sm:$0xff]   ;;  %v6120_v37 = vsel %vm6112_vm0, %v11205_v33, 0  ;;  %v11210_v39 = vld [vmem:[%s16928_s1 + $0x8] ss:$12 sps:$4 sm:$0xff]  }
   0xe   :  { %v12782_v36 = vld [vmem:[%s16927_s0 + $0x4] ss:$12 sps:$4 sm:$0xff]   ;;  %v11209_v40 = vld [vmem:[%s16928_s1] ss:$12 sps:$4 sm:$0xff]   ;;  %v6117_v42 = vsel %vm6112_vm0, %v11210_v39, 0 }
   0xf   :  { %7108 = vmatprep.mubr.bf16.mxu0 %v12782_v36  ;;  %v11212_v41 = vld [vmem:[%s16928_s1 + $0x16c] ss:$12 sps:$4 sm:$0xff]   ;;  %v11217_v44 = vld [vmem:[%s16928_s1 + $0x168] ss:$12 sps:$4 sm:$0xff]   ;;  %v11223_v48 = vld [vmem:[%s16928_s1 + $0x150] ss:$12 sps:$4 sm:$0xff]  }
  0x10   :  { %v11216_v43 = vld [vmem:[%s16928_s1 + $0x22c] ss:$12 sps:$4 sm:$0xff]   ;;  %v11218_v45 = vld [vmem:[%s16928_s1 + $0x154] ss:$12 sps:$4 sm:$0xff]   ;;  %v11224_v49 = vld [vmem:[%s16928_s1 + $0x13c] ss:$12 sps:$4 sm:$0xff]  }
  0x11   :  { %v11214_v46 = vld [vmem:[%s16928_s1 + $0x228] ss:$12 sps:$4 sm:$0xff]   ;;  %v11220_v50 = vld [vmem:[%s16928_s1 + $0x210] ss:$12 sps:$4 sm:$0xff]   ;;  %v11229_v52 = vld [vmem:[%s16928_s1 + $0x138] ss:$12 sps:$4 sm:$0xff]  }
  0x12   :  { %v11222_v47 = vld [vmem:[%s16928_s1 + $0x214] ss:$12 sps:$4 sm:$0xff]   ;;  %v11228_v51 = vld [vmem:[%s16928_s1 + $0x1fc] ss:$12 sps:$4 sm:$0xff]   ;;  %v11230_v53 = vld [vmem:[%s16928_s1 + $0x124] ss:$12 sps:$4 sm:$0xff]  }
  0x13   :  { %7081 = vmatpush1.bf16.xpose.msra.mxu0 %v11184_v13  ;;  %v11226_v54 = vld [vmem:[%s16928_s1 + $0x1f8] ss:$12 sps:$4 sm:$0xff]   ;;  %v11232_v56 = vld [vmem:[%s16928_s1 + $0x1e0] ss:$12 sps:$4 sm:$0xff]   ;;  %v11241_v60 = vld [vmem:[%s16928_s1 + $0x108] ss:$12 sps:$4 sm:$0xff]  }
  0x14   :  { %7082 = vmatprep.subr.bf16.mxu0 %v11186_v14  ;;  %10653 = vmatpush3.bf16.xpose.msra.mxu1 %v6132_v16  ;;  %v11234_v55 = vld [vmem:[%s16928_s1 + $0x1e4] ss:$12 sps:$4 sm:$0xff]   ;;  %v11235_v57 = vld [vmem:[%s16928_s1 + $0x120] ss:$12 sps:$4 sm:$0xff]   ;;  %v11238_v62 = vld [vmem:[%s16928_s1 + $0x1c8] ss:$12 sps:$4 sm:$0xff]  }
  0x15   :  { %11011 = vmatprep.subr.msk.bf16.mxu1 %vm6112_vm0, %v11188_v15  ;;  %v11236_v58 = vld [vmem:[%s16928_s1 + $0x10c] ss:$12 sps:$4 sm:$0xff]   ;;  %v11242_v61 = vld [vmem:[%s16928_s1 + $0xf4] ss:$12 sps:$4 sm:$0xff]   ;;  %v11247_v0 = vld [vmem:[%s16928_s1 + $0xf0] ss:$12 sps:$4 sm:$0xff]  }
  0x16   :  { %v11240_v59 = vld [vmem:[%s16928_s1 + $0x1cc] ss:$12 sps:$4 sm:$0xff]   ;;  %v11246_v63 = vld [vmem:[%s16928_s1 + $0x1b4] ss:$12 sps:$4 sm:$0xff]   ;;  %v11248_v1 = vld [vmem:[%s16928_s1 + $0xdc] ss:$12 sps:$4 sm:$0xff]  }
  0x17   :  { %v11244_v2 = vld [vmem:[%s16928_s1 + $0x1b0] ss:$12 sps:$4 sm:$0xff]   ;;  %v11253_v4 = vld [vmem:[%s16928_s1 + $0xd8] ss:$12 sps:$4 sm:$0xff]   ;;  %v11259_v8 = vld [vmem:[%s16928_s1 + $0xc0] ss:$12 sps:$4 sm:$0xff]  }
  0x18   :  { %v11252_v3 = vld [vmem:[%s16928_s1 + $0x19c] ss:$12 sps:$4 sm:$0xff]   ;;  %v11254_v5 = vld [vmem:[%s16928_s1 + $0xc4] ss:$12 sps:$4 sm:$0xff]   ;;  %v11256_v10 = vld [vmem:[%s16928_s1 + $0x180] ss:$12 sps:$4 sm:$0xff]  }
  0x19   :  { %v11250_v6 = vld [vmem:[%s16928_s1 + $0x198] ss:$12 sps:$4 sm:$0xff]   ;;  %v11266_v9 = vld [vmem:[%s16928_s1 + $0x2f0] ss:$12 sps:$4 sm:$0xff]   ;;  %v12908_v13 = vld [vmem:[%s16927_s0] ss:$12 sps:$4 sm:$0xff]  }
  0x1a   :  { %v11258_v7 = vld [vmem:[%s16928_s1 + $0x184] ss:$12 sps:$4 sm:$0xff]   ;;  %v11265_v11 = vld [vmem:[%s16928_s1 + $0x2ec] ss:$12 sps:$4 sm:$0xff]   ;;  %v11263_v15 = vld [vmem:[%s16928_s1 + $0x2e8] ss:$12 sps:$4 sm:$0xff]  }
  0x1b   :  { %7083 = vmatpush1.bf16.xpose.msra.mxu0 %v11189_v18  ;;  %v11267_v12 = vld [vmem:[%s16928_s1 + $0x230] ss:$12 sps:$4 sm:$0xff]   ;;  %v11271_v14 = vld [vmem:[%s16928_s1 + $0x2d8] ss:$12 sps:$4 sm:$0xff]   ;;  %v11270_v17 = vld [vmem:[%s16928_s1 + $0x2d4] ss:$12 sps:$4 sm:$0xff]  }
  0x1c   :  { %7084 = vmatprep.subr.bf16.mxu0 %v11191_v20  ;;  %10655 = vmatpush3.bf16.xpose.msra.mxu1 %v6129_v19  ;;  %v6186_v16 = vsel %vm6112_vm0, %v11267_v12, 0  ;;  %v11272_v18 = vld [vmem:[%s16928_s1 + $0x218] ss:$12 sps:$4 sm:$0xff]   ;;  %v11276_v19 = vld [vmem:[%s16928_s1 + $0x2c0] ss:$12 sps:$4 sm:$0xff]  }
  0x1d   :  { %11012 = vmatprep.subr.msk.bf16.mxu1 %vm6112_vm0, %v11193_v21  ;;  %v11268_v20 = vld [vmem:[%s16928_s1 + $0x2d0] ss:$12 sps:$4 sm:$0xff]   ;;  %v6183_v21 = vsel %vm6112_vm0, %v11272_v18, 0  ;;  %v11282_v28 = vld [vmem:[%s16928_s1 + $0x1e8] ss:$12 sps:$4 sm:$0xff]  }
  0x1e   :  { %v11275_v23 = vld [vmem:[%s16928_s1 + $0x2bc] ss:$12 sps:$4 sm:$0xff]   ;;  %v11292_v39 = vld [vmem:[%s16928_s1 + $0x1b8] ss:$12 sps:$4 sm:$0xff]   ;;  %v11330_v12 = vld [vmem:[%s16928_s1 + $0x334] ss:$12 sps:$4 sm:$0xff]  }
  0x1f   :  { %v11287_v33 = vld [vmem:[%s16928_s1 + $0x1d0] ss:$12 sps:$4 sm:$0xff]  }
  0x23   :  { %7085 = vmatpush1.bf16.xpose.msra.mxu0 %v11194_v24  ;;  %v11281_v24 = vld [vmem:[%s16928_s1 + $0x2a8] ss:$12 sps:$4 sm:$0xff]  }
  0x24   :  { %7086 = vmatprep.subr.bf16.mxu0 %v11196_v25  ;;  %10657 = vmatpush3.bf16.xpose.msra.mxu1 %v6126_v26  ;;  %v11273_v25 = vld [vmem:[%s16928_s1 + $0x2b8] ss:$12 sps:$4 sm:$0xff]  }
  0x25   :  { %11013 = vmatprep.subr.msk.bf16.mxu1 %vm6112_vm0, %v11198_v27  ;;  %v11280_v27 = vld [vmem:[%s16928_s1 + $0x2a4] ss:$12 sps:$4 sm:$0xff]  }
  0x2b   :  { %7087 = vmatpush1.bf16.xpose.msra.mxu0 %v11199_v29  ;;  %v11286_v29 = vld [vmem:[%s16928_s1 + $0x290] ss:$12 sps:$4 sm:$0xff]  }
  0x2c   :  { %7088 = vmatprep.subr.bf16.mxu0 %v11201_v30  ;;  %10659 = vmatpush3.bf16.xpose.msra.mxu1 %v6123_v31  ;;  %v11278_v30 = vld [vmem:[%s16928_s1 + $0x2a0] ss:$12 sps:$4 sm:$0xff]   ;;  %v6177_v31 = vsel %vm6112_vm0, %v11282_v28, 0 }
  0x2d   :  { %11014 = vmatprep.subr.msk.bf16.mxu1 %vm6112_vm0, %v11203_v32  ;;  %v11285_v32 = vld [vmem:[%s16928_s1 + $0x28c] ss:$12 sps:$4 sm:$0xff]  }
  0x33   :  { %7089 = vmatpush1.bf16.xpose.msra.mxu0 %v11204_v34  ;;  %v11291_v34 = vld [vmem:[%s16928_s1 + $0x278] ss:$12 sps:$4 sm:$0xff]  }
  0x34   :  { %7090 = vmatprep.subr.bf16.mxu0 %v11206_v35  ;;  %10661 = vmatpush3.bf16.xpose.msra.mxu1 %v6120_v37  ;;  %v11283_v35 = vld [vmem:[%s16928_s1 + $0x288] ss:$12 sps:$4 sm:$0xff]   ;;  %v6174_v37 = vsel %vm6112_vm0, %v11287_v33, 0 }
  0x35   :  { %11015 = vmatprep.subr.msk.bf16.mxu1 %vm6112_vm0, %v11208_v38  ;;  %v11290_v38 = vld [vmem:[%s16928_s1 + $0x274] ss:$12 sps:$4 sm:$0xff]  }
  0x36   :  { %v11354_v33 = vld [vmem:[%s16928_s1 + $0x514] ss:$12 sps:$4 sm:$0xff]  }
  0x3b   :  { %7091 = vmatpush1.bf16.xpose.msra.mxu0 %v11209_v40  ;;  %v11296_v40 = vld [vmem:[%s16928_s1 + $0x260] ss:$12 sps:$4 sm:$0xff]  }
  0x3c   :  { %7092 = vmatprep.subr.bf16.mxu0 %v11212_v41  ;;  %10663 = vmatpush3.bf16.xpose.msra.mxu1 %v6117_v42  ;;  %v11288_v41 = vld [vmem:[%s16928_s1 + $0x270] ss:$12 sps:$4 sm:$0xff]   ;;  %v6171_v42 = vsel %vm6112_vm0, %v11292_v39, 0 }
  0x3d   :  { %7162 = vmatprep.subr.bf16.mxu1 %v11216_v43  ;;  %v11295_v43 = vld [vmem:[%s16928_s1 + $0x25c] ss:$12 sps:$4 sm:$0xff]  }
  0x3e   :  { %v11360_v39 = vld [vmem:[%s16928_s1 + $0x4fc] ss:$12 sps:$4 sm:$0xff]  }
  0x43   :  { %7093 = vmatpush2.bf16.xpose.msra.mxu0 %v11217_v44  ;;  %10665 = vmatmul.mubr.msk.bf16.vlgmr.msra.gmra.mxu1 %vm6112_vm0, %v12737_v22  ;;  %v11297_v44 = vld [vmem:[%s16928_s1 + $0x1a0] ss:$12 sps:$4 sm:$0xff]  }
  0x44   :  { %7094 = vmatprep.subr.bf16.mxu0 %v11218_v45  ;;  %7163 = vmatpush1.bf16.xpose.msra.mxu1 %v11214_v46  ;;  %v11301_v45 = vld [vmem:[%s16928_s1 + $0x248] ss:$12 sps:$4 sm:$0xff]   ;;  %v11293_v46 = vld [vmem:[%s16928_s1 + $0x258] ss:$12 sps:$4 sm:$0xff]  }
  0x45   :  { %7194 = vmatprep.mubr.bf16.mxu1 %v12782_v36  ;;  %7164 = vmatprep.subr.bf16.mxu1 %v11222_v47  ;;  %v6168_v47 = vsel %vm6112_vm0, %v11297_v44, 0  ;;  %v11361_v44 = vld [vmem:[%s16928_s1 + $0x420] ss:$12 sps:$4 sm:$0xff]  }
  0x4b   :  { %7095 = vmatpush2.bf16.xpose.msra.mxu0 %v11223_v48  ;;  %v11300_v48 = vld [vmem:[%s16928_s1 + $0x244] ss:$12 sps:$4 sm:$0xff]  }
  0x4c   :  { %7096 = vmatprep.subr.bf16.mxu0 %v11224_v49  ;;  %7165 = vmatpush1.bf16.xpose.msra.mxu1 %v11220_v50  ;;  %v11302_v49 = vld [vmem:[%s16928_s1 + $0x188] ss:$12 sps:$4 sm:$0xff]   ;;  %v11305_v50 = vld [vmem:[%s16928_s1 + $0x3ac] ss:$12 sps:$4 sm:$0xff]  }
  0x4d   :  { %7166 = vmatprep.subr.bf16.mxu1 %v11228_v51  ;;  %v11298_v51 = vld [vmem:[%s16928_s1 + $0x240] ss:$12 sps:$4 sm:$0xff]  }
  0x53   :  { %7097 = vmatpush2.bf16.xpose.msra.mxu0 %v11229_v52  ;;  %v6165_v52 = vsel %vm6112_vm0, %v11302_v49, 0  ;;  %v11375_v49 = vld [vmem:[%s16928_s1 + $0x3f4] ss:$12 sps:$4 sm:$0xff]  }
  0x54   :  { %7098 = vmatprep.subr.bf16.mxu0 %v11230_v53  ;;  %7167 = vmatpush1.bf16.xpose.msra.mxu1 %v11226_v54  ;;  %v11306_v53 = vld [vmem:[%s16928_s1 + $0x470] ss:$12 sps:$4 sm:$0xff]  }
  0x55   :  { %7168 = vmatprep.subr.bf16.mxu1 %v11234_v55  ;;  %v11307_v54 = vld [vmem:[%s16928_s1 + $0x3b0] ss:$12 sps:$4 sm:$0xff]   ;;  %v11303_v55 = vld [vmem:[%s16928_s1 + $0x3a8] ss:$12 sps:$4 sm:$0xff]  }
  0x5b   :  { %7099 = vmatpush2.bf16.xpose.msra.mxu0 %v11235_v57  ;;  %v13035_v57 = vld [vmem:[%s16927_s0 + $0x8] ss:$12 sps:$4 sm:$0xff]  }
  0x5c   :  { %7100 = vmatprep.subr.bf16.mxu0 %v11236_v58  ;;  %7169 = vmatpush1.bf16.xpose.msra.mxu1 %v11232_v56  ;;  %v11310_v56 = vld [vmem:[%s16928_s1 + $0x394] ss:$12 sps:$4 sm:$0xff]   ;;  %v6234_v58 = vsel %vm6112_vm0, %v11307_v54, 0  ;;  %v11376_v54 = vld [vmem:[%s16928_s1 + $0x4b0] ss:$12 sps:$4 sm:$0xff]  }
  0x5d   :  { %7170 = vmatprep.subr.bf16.mxu1 %v11240_v59  ;;  %v11311_v59 = vld [vmem:[%s16928_s1 + $0x458] ss:$12 sps:$4 sm:$0xff]  }
  0x63   :  { %7101 = vmatpush2.bf16.xpose.msra.mxu0 %v11241_v60  ;;  %v11312_v60 = vld [vmem:[%s16928_s1 + $0x398] ss:$12 sps:$4 sm:$0xff]  }
  0x64   :  { %7102 = vmatprep.subr.bf16.mxu0 %v11242_v61  ;;  %7171 = vmatpush1.bf16.xpose.msra.mxu1 %v11238_v62  ;;  %v11308_v61 = vld [vmem:[%s16928_s1 + $0x390] ss:$12 sps:$4 sm:$0xff]   ;;  %v6231_v62 = vsel %vm6112_vm0, %v11312_v60, 0 }
  0x65   :  { %7172 = vmatprep.subr.bf16.mxu1 %v11246_v63  ;;  %v11316_v63 = vld [vmem:[%s16928_s1 + $0x440] ss:$12 sps:$4 sm:$0xff]   ;;  %v11390_v60 = vld [vmem:[%s16928_s1 + $0x484] ss:$12 sps:$4 sm:$0xff]  }
  0x6b   :  { %7103 = vmatpush2.bf16.xpose.msra.mxu0 %v11247_v0  ;;  %v11313_v0 = vld [vmem:[%s16928_s1 + $0x378] ss:$12 sps:$4 sm:$0xff]  }
  0x6c   :  { %7104 = vmatprep.subr.bf16.mxu0 %v11248_v1  ;;  %7173 = vmatpush1.bf16.xpose.msra.mxu1 %v11244_v2  ;;  %v11317_v1 = vld [vmem:[%s16928_s1 + $0x380] ss:$12 sps:$4 sm:$0xff]   ;;  %v11320_v2 = vld [vmem:[%s16928_s1 + $0x364] ss:$12 sps:$4 sm:$0xff]  }
  0x6d   :  { %7174 = vmatprep.subr.bf16.mxu1 %v11252_v3  ;;  %v6228_v3 = vsel %vm6112_vm0, %v11317_v1, 0 }
  0x73   :  { %7105 = vmatpush2.bf16.xpose.msra.mxu0 %v11253_v4  ;;  %v11321_v4 = vld [vmem:[%s16928_s1 + $0x428] ss:$12 sps:$4 sm:$0xff]  }
  0x74   :  { %7106 = vmatprep.subr.bf16.mxu0 %v11254_v5  ;;  %7175 = vmatpush1.bf16.xpose.msra.mxu1 %v11250_v6  ;;  %v11318_v5 = vld [vmem:[%s16928_s1 + $0x360] ss:$12 sps:$4 sm:$0xff]   ;;  %v11322_v6 = vld [vmem:[%s16928_s1 + $0x368] ss:$12 sps:$4 sm:$0xff]  }
  0x75   :  { %7176 = vmatprep.subr.bf16.mxu1 %v11258_v7  ;;  %v11325_v7 = vld [vmem:[%s16928_s1 + $0x34c] ss:$12 sps:$4 sm:$0xff]  }
  0x7b   :  { %7107 = vmatpush2.bf16.xpose.msra.mxu0 %v11259_v8  ;;  %v6225_v8 = vsel %vm6112_vm0, %v11322_v6, 0 }
  0x7c   :  { %11016 = vmatprep.subr.msk.bf16.mxu0 %vm6112_vm0, %v11266_v9  ;;  %7177 = vmatpush1.bf16.xpose.msra.mxu1 %v11256_v10  ;;  %v11326_v9 = vld [vmem:[%s16928_s1 + $0x410] ss:$12 sps:$4 sm:$0xff]   ;;  %v11323_v10 = vld [vmem:[%s16928_s1 + $0x348] ss:$12 sps:$4 sm:$0xff]  }
  0x7d   :  { %7178 = vmatprep.subr.bf16.mxu1 %v11265_v11  ;;  %v11327_v11 = vld [vmem:[%s16928_s1 + $0x350] ss:$12 sps:$4 sm:$0xff]  }
  0x82   :  { %7109 = vmatmul.mubr.bf16.vlgmr.msra.gmra.mxu0 %v12908_v13 }
  0x83   :  { %10667 = vmatpush3.bf16.xpose.msra.mxu0 %v6186_v16  ;;  %10682 = vmatprep.mubr.msk.bf16.mxu0 %vm6112_vm0, %v12737_v22  ;;  %v11277_v22 = vld [vmem:[%s16928_s1 + $0x200] ss:$12 sps:$4 sm:$0xff]   ;;  %v11332_v16 = vld [vmem:[%s16928_s1 + $0x338] ss:$12 sps:$4 sm:$0xff]  }
  0x84   :  { %11017 = vmatprep.subr.msk.bf16.mxu0 %vm6112_vm0, %v11271_v14  ;;  %7179 = vmatpush2.bf16.xpose.msra.mxu1 %v11263_v15  ;;  %v6180_v26 = vsel %vm6112_vm0, %v11277_v22, 0  ;;  %v11331_v14 = vld [vmem:[%s16928_s1 + $0x3f8] ss:$12 sps:$4 sm:$0xff]   ;;  %v11328_v15 = vld [vmem:[%s16928_s1 + $0x330] ss:$12 sps:$4 sm:$0xff]   ;;  %v6219_v18 = vsel %vm6112_vm0, %v11332_v16, 0 }
  0x85   :  { %7180 = vmatprep.subr.bf16.mxu1 %v11270_v17  ;;  %v11335_v17 = vld [vmem:[%s16928_s1 + $0x31c] ss:$12 sps:$4 sm:$0xff]  }
  0x8b   :  { %10669 = vmatpush3.bf16.xpose.msra.mxu0 %v6183_v21  ;;  %v11337_v21 = vld [vmem:[%s16928_s1 + $0x320] ss:$12 sps:$4 sm:$0xff]  }
  0x8c   :  { %11018 = vmatprep.subr.msk.bf16.mxu0 %vm6112_vm0, %v11276_v19  ;;  %7181 = vmatpush2.bf16.xpose.msra.mxu1 %v11268_v20  ;;  %v11336_v19 = vld [vmem:[%s16928_s1 + $0x3e0] ss:$12 sps:$4 sm:$0xff]   ;;  %v11333_v20 = vld [vmem:[%s16928_s1 + $0x318] ss:$12 sps:$4 sm:$0xff]   ;;  %v6216_v22 = vsel %vm6112_vm0, %v11337_v21, 0 }
  0x8d   :  { %7182 = vmatprep.subr.bf16.mxu1 %v11275_v23  ;;  %v11340_v23 = vld [vmem:[%s16928_s1 + $0x304] ss:$12 sps:$4 sm:$0xff]   ;;  %v11403_v21 = vld [vmem:[%s16928_s1 + $0x5bc] ss:$12 sps:$4 sm:$0xff]  }
  0x93   :  { %10671 = vmatpush3.bf16.xpose.msra.mxu0 %v6180_v26  ;;  %v11342_v26 = vld [vmem:[%s16928_s1 + $0x308] ss:$12 sps:$4 sm:$0xff]  }
  0x94   :  { %11019 = vmatprep.subr.msk.bf16.mxu0 %vm6112_vm0, %v11281_v24  ;;  %7183 = vmatpush2.bf16.xpose.msra.mxu1 %v11273_v25  ;;  %v11341_v24 = vld [vmem:[%s16928_s1 + $0x3c8] ss:$12 sps:$4 sm:$0xff]   ;;  %v11338_v25 = vld [vmem:[%s16928_s1 + $0x300] ss:$12 sps:$4 sm:$0xff]   ;;  %v6213_v28 = vsel %vm6112_vm0, %v11342_v26, 0 }
  0x95   :  { %7184 = vmatprep.subr.bf16.mxu1 %v11280_v27  ;;  %v11345_v27 = vld [vmem:[%s16928_s1 + $0x46c] ss:$12 sps:$4 sm:$0xff]   ;;  %v11408_v26 = vld [vmem:[%s16928_s1 + $0x5a4] ss:$12 sps:$4 sm:$0xff]  }
  0x9b   :  { %10673 = vmatpush3.bf16.xpose.msra.mxu0 %v6177_v31  ;;  %v11351_v31 = vld [vmem:[%s16928_s1 + $0x454] ss:$12 sps:$4 sm:$0xff]  }
  0x9c   :  { %11020 = vmatprep.subr.msk.bf16.mxu0 %vm6112_vm0, %v11286_v29  ;;  %7185 = vmatpush2.bf16.xpose.msra.mxu1 %v11278_v30  ;;  %v11348_v29 = vld [vmem:[%s16928_s1 + $0x52c] ss:$12 sps:$4 sm:$0xff]   ;;  %v11343_v30 = vld [vmem:[%s16928_s1 + $0x468] ss:$12 sps:$4 sm:$0xff]  }
  0x9d   :  { %7186 = vmatprep.subr.bf16.mxu1 %v11285_v32  ;;  %v11346_v32 = vld [vmem:[%s16928_s1 + $0x528] ss:$12 sps:$4 sm:$0xff]  }
  0xa3   :  { %10675 = vmatpush3.bf16.xpose.msra.mxu0 %v6174_v37  ;;  %v11357_v37 = vld [vmem:[%s16928_s1 + $0x43c] ss:$12 sps:$4 sm:$0xff]  }
  0xa4   :  { %11021 = vmatprep.subr.msk.bf16.mxu0 %vm6112_vm0, %v11291_v34  ;;  %7187 = vmatpush2.bf16.xpose.msra.mxu1 %v11283_v35  ;;  %v11349_v34 = vld [vmem:[%s16928_s1 + $0x450] ss:$12 sps:$4 sm:$0xff]  }
  0xa5   :  { %7188 = vmatprep.subr.bf16.mxu1 %v11290_v38  ;;  %v13165_v35 = vld [vmem:[%s16927_s0 + $0x4] ss:$12 sps:$4 sm:$0xff]  }
  0xa6   :  { %v11352_v38 = vld [vmem:[%s16928_s1 + $0x510] ss:$12 sps:$4 sm:$0xff]  }
  0xab   :  { %10677 = vmatpush3.bf16.xpose.msra.mxu0 %v6171_v42  ;;  %v11358_v42 = vld [vmem:[%s16928_s1 + $0x4f8] ss:$12 sps:$4 sm:$0xff]  }
  0xac   :  { %11022 = vmatprep.subr.msk.bf16.mxu0 %vm6112_vm0, %v11296_v40  ;;  %7189 = vmatpush2.bf16.xpose.msra.mxu1 %v11288_v41  ;;  %v11355_v40 = vld [vmem:[%s16928_s1 + $0x438] ss:$12 sps:$4 sm:$0xff]  }
  0xad   :  { %7190 = vmatprep.subr.bf16.mxu1 %v11295_v43  ;;  %v11363_v41 = vld [vmem:[%s16928_s1 + $0x424] ss:$12 sps:$4 sm:$0xff]  }
  0xae   :  { %v11366_v43 = vld [vmem:[%s16928_s1 + $0x4e4] ss:$12 sps:$4 sm:$0xff]  }
  0xb3   :  { %10679 = vmatpush3.bf16.xpose.msra.mxu0 %v6168_v47  ;;  %v11372_v47 = vld [vmem:[%s16928_s1 + $0x4cc] ss:$12 sps:$4 sm:$0xff]  }
  0xb4   :  { %11023 = vmatprep.subr.msk.bf16.mxu0 %vm6112_vm0, %v11301_v45  ;;  %7191 = vmatpush2.bf16.xpose.msra.mxu1 %v11293_v46  ;;  %v11369_v45 = vld [vmem:[%s16928_s1 + $0x40c] ss:$12 sps:$4 sm:$0xff]  }
  0xb5   :  { %7192 = vmatprep.subr.bf16.mxu1 %v11300_v48  ;;  %v11364_v46 = vld [vmem:[%s16928_s1 + $0x4e0] ss:$12 sps:$4 sm:$0xff]   ;;  %v11367_v48 = vld [vmem:[%s16928_s1 + $0x408] ss:$12 sps:$4 sm:$0xff]  }
  0xbb   :  { %10681 = vmatpush3.bf16.xpose.msra.mxu0 %v6165_v52  ;;  %v11373_v52 = vld [vmem:[%s16928_s1 + $0x3f0] ss:$12 sps:$4 sm:$0xff]  }
  0xbc   :  { %7248 = vmatprep.subr.bf16.mxu0 %v11305_v50  ;;  %7193 = vmatpush2.bf16.xpose.msra.mxu1 %v11298_v51  ;;  %v11370_v50 = vld [vmem:[%s16928_s1 + $0x4c8] ss:$12 sps:$4 sm:$0xff]  }
  0xbd   :  { %11024 = vmatprep.subr.msk.bf16.mxu1 %vm6112_vm0, %v11306_v53  ;;  %v11378_v51 = vld [vmem:[%s16928_s1 + $0x4b4] ss:$12 sps:$4 sm:$0xff]   ;;  %v11381_v53 = vld [vmem:[%s16928_s1 + $0x3dc] ss:$12 sps:$4 sm:$0xff]  }
  0xc2   :  { %10683 = vmatmul.mubr.msk.bf16.vlgmr.msra.gmra.mxu0 %vm6112_vm0, %v13035_v57 }
  0xc3   :  { %7249 = vmatpush1.bf16.xpose.msra.mxu0 %v11303_v55  ;;  %7280 = vmatprep.mubr.bf16.mxu0 %v12782_v36  ;;  %v11315_v36 = vld [vmem:[%s16928_s1 + $0x37c] ss:$12 sps:$4 sm:$0xff]  }
  0xc4   :  { %7195 = vmatmul.mubr.bf16.vlgmr.msra.gmra.mxu1 %v12908_v13  ;;  %7250 = vmatprep.subr.bf16.mxu0 %v11310_v56  ;;  %v6222_v13 = vsel %vm6112_vm0, %v11327_v11, 0  ;;  %v11384_v55 = vld [vmem:[%s16928_s1 + $0x49c] ss:$12 sps:$4 sm:$0xff]   ;;  %v11379_v56 = vld [vmem:[%s16928_s1 + $0x3d8] ss:$12 sps:$4 sm:$0xff]  }
  0xc5   :  { %10685 = vmatpush3.bf16.xpose.msra.mxu1 %v6234_v58  ;;  %10700 = vmatprep.mubr.msk.bf16.mxu1 %vm6112_vm0, %v13035_v57  ;;  %v11387_v58 = vld [vmem:[%s16928_s1 + $0x3c4] ss:$12 sps:$4 sm:$0xff]  }
  0xc6   :  { %11025 = vmatprep.subr.msk.bf16.mxu1 %vm6112_vm0, %v11311_v59  ;;  %v11382_v59 = vld [vmem:[%s16928_s1 + $0x498] ss:$12 sps:$4 sm:$0xff]  }
  0xcb   :  { %7251 = vmatpush1.bf16.xpose.msra.mxu0 %v11308_v61  ;;  %v11385_v61 = vld [vmem:[%s16928_s1 + $0x3c0] ss:$12 sps:$4 sm:$0xff]  }
  0xcc   :  { %7252 = vmatprep.subr.bf16.mxu0 %v11315_v36  ;;  %v11394_v36 = vld [vmem:[%s16928_s1 + $0x5f0] ss:$12 sps:$4 sm:$0xff]  }
  0xcd   :  { %10687 = vmatpush3.bf16.xpose.msra.mxu1 %v6231_v62  ;;  %v11388_v62 = vld [vmem:[%s16928_s1 + $0x480] ss:$12 sps:$4 sm:$0xff]  }
  0xce   :  { %11026 = vmatprep.subr.msk.bf16.mxu1 %vm6112_vm0, %v11316_v63  ;;  %v11393_v63 = vld [vmem:[%s16928_s1 + $0x5ec] ss:$12 sps:$4 sm:$0xff]  }
  0xd3   :  { %7253 = vmatpush1.bf16.xpose.msra.mxu0 %v11313_v0  ;;  %v11395_v0 = vld [vmem:[%s16928_s1 + $0x530] ss:$12 sps:$4 sm:$0xff]  }
  0xd4   :  { %7254 = vmatprep.subr.bf16.mxu0 %v11320_v2  ;;  %v11399_v2 = vld [vmem:[%s16928_s1 + $0x5d8] ss:$12 sps:$4 sm:$0xff]  }
  0xd5   :  { %10689 = vmatpush3.bf16.xpose.msra.mxu1 %v6228_v3  ;;  %v11391_v3 = vld [vmem:[%s16928_s1 + $0x5e8] ss:$12 sps:$4 sm:$0xff]  }
  0xd6   :  { %11027 = vmatprep.subr.msk.bf16.mxu1 %vm6112_vm0, %v11321_v4 }
  0xdb   :  { %7255 = vmatpush1.bf16.xpose.msra.mxu0 %v11318_v5  ;;  %v6282_v5 = vsel %vm6112_vm0, %v11395_v0, 0 }
  0xdc   :  { %7256 = vmatprep.subr.bf16.mxu0 %v11325_v7  ;;  %v13263_v7 = vld [vmem:[%s16927_s0] ss:$12 sps:$4 sm:$0xff]  }
  0xdd   :  { %10691 = vmatpush3.bf16.xpose.msra.mxu1 %v6225_v8  ;;  %v11398_v8 = vld [vmem:[%s16928_s1 + $0x5d4] ss:$12 sps:$4 sm:$0xff]  }
  0xde   :  { %11028 = vmatprep.subr.msk.bf16.mxu1 %vm6112_vm0, %v11326_v9 }
  0xe3   :  { %7257 = vmatpush1.bf16.xpose.msra.mxu0 %v11323_v10  ;;  %v11400_v10 = vld [vmem:[%s16928_s1 + $0x518] ss:$12 sps:$4 sm:$0xff]  }
  0xe4   :  { %7258 = vmatprep.subr.bf16.mxu0 %v11330_v12 }
  0xe5   :  { %10693 = vmatpush3.bf16.xpose.msra.mxu1 %v6222_v13 }
  0xe6   :  { %11029 = vmatprep.subr.msk.bf16.mxu1 %vm6112_vm0, %v11331_v14 }
  0xeb   :  { %7259 = vmatpush1.bf16.xpose.msra.mxu0 %v11328_v15  ;;  %v11404_v15 = vld [vmem:[%s16928_s1 + $0x5c0] ss:$12 sps:$4 sm:$0xff]  }
  0xec   :  { %7260 = vmatprep.subr.bf16.mxu0 %v11335_v17  ;;  %v11396_v17 = vld [vmem:[%s16928_s1 + $0x5d0] ss:$12 sps:$4 sm:$0xff]  }
  0xed   :  { %10695 = vmatpush3.bf16.xpose.msra.mxu1 %v6219_v18 }
  0xee   :  { %11030 = vmatprep.subr.msk.bf16.mxu1 %vm6112_vm0, %v11336_v19 }
  0xf3   :  { %7261 = vmatpush1.bf16.xpose.msra.mxu0 %v11333_v20 }
  0xf4   :  { %7262 = vmatprep.subr.bf16.mxu0 %v11340_v23  ;;  %v11405_v23 = vld [vmem:[%s16928_s1 + $0x500] ss:$12 sps:$4 sm:$0xff]  }
  0xf5   :  { %10697 = vmatpush3.bf16.xpose.msra.mxu1 %v6216_v22  ;;  %v11409_v22 = vld [vmem:[%s16928_s1 + $0x5a8] ss:$12 sps:$4 sm:$0xff]  }
  0xf6   :  { %11031 = vmatprep.subr.msk.bf16.mxu1 %vm6112_vm0, %v11341_v24  ;;  %v11401_v24 = vld [vmem:[%s16928_s1 + $0x5b8] ss:$12 sps:$4 sm:$0xff]  }
  0xfb   :  { %7263 = vmatpush1.bf16.xpose.msra.mxu0 %v11338_v25  ;;  %v6276_v25 = vsel %vm6112_vm0, %v11405_v23, 0  ;;  %v11451_v23 = vld [vmem:[%s16928_s1 + $0x648] ss:$12 sps:$4 sm:$0xff]  }
  0xfc   :  { %7264 = vmatprep.subr.bf16.mxu0 %v11345_v27  ;;  %v11410_v27 = vld [vmem:[%s16928_s1 + $0x4e8] ss:$12 sps:$4 sm:$0xff]  }
  0xfd   :  { %10699 = vmatpush3.bf16.xpose.msra.mxu1 %v6213_v28  ;;  %v11414_v28 = vld [vmem:[%s16928_s1 + $0x590] ss:$12 sps:$4 sm:$0xff]  }
  0xfe   :  { %7334 = vmatprep.subr.bf16.mxu1 %v11348_v29  ;;  %v11406_v29 = vld [vmem:[%s16928_s1 + $0x5a0] ss:$12 sps:$4 sm:$0xff]  }
 0x103   :  { %7265 = vmatpush2.bf16.xpose.msra.mxu0 %v11343_v30  ;;  %v7153_v1 = vpop.f32.mrf.mxu1  ;;  %v6273_v30 = vsel %vm6112_vm0, %v11410_v27, 0  ;;  %v11456_v27 = vld [vmem:[%s16928_s1 + $0x630] ss:$12 sps:$4 sm:$0xff]  }
 0x104   :  { %10701 = vmatmul.mubr.msk.bf16.vlgmr.msra.gmra.mxu1 %vm6112_vm0, %v13035_v57  ;;  %7266 = vmatprep.subr.bf16.mxu0 %v11351_v31  ;;  %v11413_v31 = vld [vmem:[%s16928_s1 + $0x58c] ss:$12 sps:$4 sm:$0xff]  }
 0x105   :  { %7335 = vmatpush1.bf16.xpose.msra.mxu1 %v11346_v32  ;;  %7366 = vmatprep.mubr.bf16.mxu1 %v13165_v35  ;;  %v7155_v4 = vpop.f32.mrf.mxu1  ;;  %v11415_v32 = vld [vmem:[%s16928_s1 + $0x4d0] ss:$12 sps:$4 sm:$0xff]  }
 0x106   :  { %7336 = vmatprep.subr.bf16.mxu1 %v11354_v33  ;;  %v11419_v33 = vld [vmem:[%s16928_s1 + $0x578] ss:$12 sps:$4 sm:$0xff]  }
 0x107   :  { %v7157_v11 = vpop.f32.mrf.mxu1 }
 0x109   :  { %v7159_v18 = vpop.f32.mrf.mxu1 }
 0x10b   :  { %7267 = vmatpush2.bf16.xpose.msra.mxu0 %v11349_v34  ;;  %v11411_v34 = vld [vmem:[%s16928_s1 + $0x588] ss:$12 sps:$4 sm:$0xff]  }
 0x10c   :  { %7268 = vmatprep.subr.bf16.mxu0 %v11357_v37  ;;  %v6270_v37 = vsel %vm6112_vm0, %v11415_v32, 0  ;;  %v11461_v32 = vld [vmem:[%s16928_s1 + $0x618] ss:$12 sps:$4 sm:$0xff]  }
 0x10d   :  { %7337 = vmatpush1.bf16.xpose.msra.mxu1 %v11352_v38  ;;  %v11418_v38 = vld [vmem:[%s16928_s1 + $0x574] ss:$12 sps:$4 sm:$0xff]  }
 0x10e   :  { %7338 = vmatprep.subr.bf16.mxu1 %v11360_v39  ;;  %v11420_v39 = vld [vmem:[%s16928_s1 + $0x4b8] ss:$12 sps:$4 sm:$0xff]  }
 0x113   :  { %7269 = vmatpush2.bf16.xpose.msra.mxu0 %v11355_v40  ;;  %v11424_v40 = vld [vmem:[%s16928_s1 + $0x560] ss:$12 sps:$4 sm:$0xff]  }
 0x114   :  { %7270 = vmatprep.subr.bf16.mxu0 %v11363_v41  ;;  %v11416_v41 = vld [vmem:[%s16928_s1 + $0x570] ss:$12 sps:$4 sm:$0xff]  }
 0x115   :  { %7339 = vmatpush1.bf16.xpose.msra.mxu1 %v11358_v42  ;;  %v6267_v42 = vsel %vm6112_vm0, %v11420_v39, 0  ;;  %v11466_v39 = vld [vmem:[%s16928_s1 + $0x600] ss:$12 sps:$4 sm:$0xff]  }
 0x116   :  { %7340 = vmatprep.subr.bf16.mxu1 %v11366_v43  ;;  %v11423_v43 = vld [vmem:[%s16928_s1 + $0x55c] ss:$12 sps:$4 sm:$0xff]  }
 0x11b   :  { %7271 = vmatpush2.bf16.xpose.msra.mxu0 %v11361_v44  ;;  %v11425_v44 = vld [vmem:[%s16928_s1 + $0x4a0] ss:$12 sps:$4 sm:$0xff]  }
 0x11c   :  { %7272 = vmatprep.subr.bf16.mxu0 %v11369_v45  ;;  %v11429_v45 = vld [vmem:[%s16928_s1 + $0x548] ss:$12 sps:$4 sm:$0xff]  }
 0x11d   :  { %7341 = vmatpush1.bf16.xpose.msra.mxu1 %v11364_v46  ;;  %v11421_v46 = vld [vmem:[%s16928_s1 + $0x558] ss:$12 sps:$4 sm:$0xff]  }
 0x11e   :  { %7342 = vmatprep.subr.bf16.mxu1 %v11372_v47  ;;  %v6264_v47 = vsel %vm6112_vm0, %v11425_v44, 0  ;;  %v11471_v44 = vld [vmem:[%s16928_s1 + $0x768] ss:$12 sps:$4 sm:$0xff]  }
 0x123   :  { %7273 = vmatpush2.bf16.xpose.msra.mxu0 %v11367_v48  ;;  %v11428_v48 = vld [vmem:[%s16928_s1 + $0x544] ss:$12 sps:$4 sm:$0xff]  }
 0x124   :  { %7274 = vmatprep.subr.bf16.mxu0 %v11375_v49  ;;  %v11430_v49 = vld [vmem:[%s16928_s1 + $0x488] ss:$12 sps:$4 sm:$0xff]  }
 0x125   :  { %7343 = vmatpush1.bf16.xpose.msra.mxu1 %v11370_v50  ;;  %v11433_v50 = vld [vmem:[%s16928_s1 + $0x6ac] ss:$12 sps:$4 sm:$0xff]  }
 0x126   :  { %7344 = vmatprep.subr.bf16.mxu1 %v11378_v51  ;;  %v11426_v51 = vld [vmem:[%s16928_s1 + $0x540] ss:$12 sps:$4 sm:$0xff]  }
 0x12b   :  { %7275 = vmatpush2.bf16.xpose.msra.mxu0 %v11373_v52  ;;  %v6261_v52 = vsel %vm6112_vm0, %v11430_v49, 0  ;;  %v13526_v49 = vld [vmem:[%s16927_s0 + $0x4] ss:$12 sps:$4 sm:$0xff]  }
 0x12c   :  { %7276 = vmatprep.subr.bf16.mxu0 %v11381_v53  ;;  %v11434_v53 = vld [vmem:[%s16928_s1 + $0x770] ss:$12 sps:$4 sm:$0xff]  }
 0x12d   :  { %7345 = vmatpush1.bf16.xpose.msra.mxu1 %v11376_v54  ;;  %v11435_v54 = vld [vmem:[%s16928_s1 + $0x6b0] ss:$12 sps:$4 sm:$0xff]  }
 0x12e   :  { %7346 = vmatprep.subr.bf16.mxu1 %v11384_v55  ;;  %v11431_v55 = vld [vmem:[%s16928_s1 + $0x6a8] ss:$12 sps:$4 sm:$0xff]  }
 0x133   :  { %7277 = vmatpush2.bf16.xpose.msra.mxu0 %v11379_v56  ;;  %v11438_v56 = vld [vmem:[%s16928_s1 + $0x694] ss:$12 sps:$4 sm:$0xff]  }
 0x134   :  { %7278 = vmatprep.subr.bf16.mxu0 %v11387_v58 }
 0x135   :  { %7347 = vmatpush1.bf16.xpose.msra.mxu1 %v11382_v59  ;;  %v13390_v59 = vld [vmem:[%s16927_s0 + $0x8] ss:$12 sps:$4 sm:$0xff]  }
 0x136   :  { %7348 = vmatprep.subr.bf16.mxu1 %v11390_v60  ;;  %v6330_v60 = vsel %vm6112_vm0, %v11435_v54, 0  ;;  %v11491_v54 = vld [vmem:[%s16928_s1 + $0x724] ss:$12 sps:$4 sm:$0xff]  }
 0x13b   :  { %7279 = vmatpush2.bf16.xpose.msra.mxu0 %v11385_v61  ;;  %v11439_v61 = vld [vmem:[%s16928_s1 + $0x758] ss:$12 sps:$4 sm:$0xff]  }
 0x13c   :  { %11032 = vmatprep.subr.msk.bf16.mxu0 %vm6112_vm0, %v11394_v36 }
 0x13d   :  { %7349 = vmatpush1.bf16.xpose.msra.mxu1 %v11388_v62 }
 0x13e   :  { %7350 = vmatprep.subr.bf16.mxu1 %v11393_v63  ;;  %v11440_v63 = vld [vmem:[%s16928_s1 + $0x698] ss:$12 sps:$4 sm:$0xff]  }
 0x142   :  { %v7110_v6 = vpop.f32.mrf.mxu0  ;;  %7281 = vmatmul.mubr.bf16.vlgmr.msra.gmra.mxu0 %v13263_v7 }
 0x143   :  { %v13269_v9 = vadd.f32 %v7153_v1, %v7110_v6  ;;  %10703 = vmatpush3.bf16.xpose.msra.mxu0 %v6282_v5  ;;  %10718 = vmatprep.mubr.msk.bf16.mxu0 %vm6112_vm0, %v13035_v57  ;;  %v6279_v57 = vsel %vm6112_vm0, %v11400_v10, 0  ;;  %v11436_v1 = vld [vmem:[%s16928_s1 + $0x690] ss:$12 sps:$4 sm:$0xff]   ;;  %v11441_v10 = vld [vmem:[%s16928_s1 + $0x678] ss:$12 sps:$4 sm:$0xff]  }
 0x144   :  { %v7112_v12 = vpop.f32.mrf.mxu0  ;;  %11033 = vmatprep.subr.msk.bf16.mxu0 %vm6112_vm0, %v11399_v2 }
 0x145   :  { %17009 = vst [vmem:[#allocation7_spill] sm:$0xff] %v13269_v9  ;;  %7351 = vmatpush2.bf16.xpose.msra.mxu1 %v11391_v3  ;;  %v13277_v13 = vadd.f32 %v7155_v4, %v7112_v12  ;;  %v11443_v3 = vld [vmem:[%s16928_s1 + $0x67c] ss:$12 sps:$4 sm:$0xff]   ;;  %v11448_v12 = vld [vmem:[%s16928_s1 + $0x664] ss:$12 sps:$4 sm:$0xff]  }
 0x146   :  { %v7114_v14 = vpop.f32.mrf.mxu0  ;;  %7352 = vmatprep.subr.bf16.mxu1 %v11398_v8  ;;  %v11444_v8 = vld [vmem:[%s16928_s1 + $0x740] ss:$12 sps:$4 sm:$0xff]  }
 0x147   :  { %17010 = vst [vmem:[#allocation8_spill] sm:$0xff] %v13277_v13  ;;  %v13282_v16 = vadd.f32 %v7157_v11, %v7114_v14  ;;  %v11445_v11 = vld [vmem:[%s16928_s1 + $0x680] ss:$12 sps:$4 sm:$0xff]  }
 0x148   :  { %v7116_v19 = vpop.f32.mrf.mxu0  ;;  %v6324_v14 = vsel %vm6112_vm0, %v11445_v11, 0  ;;  %v11510_v11 = vld [vmem:[%s16928_s1 + $0x798] ss:$12 sps:$4 sm:$0xff]  }
 0x149   :  { %17011 = vst [vmem:[#allocation9_spill] sm:$0xff] %v13282_v16  ;;  %v13288_v20 = vadd.f32 %v7159_v18, %v7116_v19  ;;  %v11453_v18 = vld [vmem:[%s16928_s1 + $0x64c] ss:$12 sps:$4 sm:$0xff]  }
 0x14b   :  { %17012 = vst [vmem:[#allocation10_spill] sm:$0xff] %v13288_v20  ;;  %10705 = vmatpush3.bf16.xpose.msra.mxu0 %v6279_v57  ;;  %v11450_v57 = vld [vmem:[%s16928_s1 + $0x668] ss:$12 sps:$4 sm:$0xff]  }
 0x14c   :  { %11034 = vmatprep.subr.msk.bf16.mxu0 %vm6112_vm0, %v11404_v15  ;;  %v11449_v15 = vld [vmem:[%s16928_s1 + $0x728] ss:$12 sps:$4 sm:$0xff]   ;;  %v6321_v19 = vsel %vm6112_vm0, %v11450_v57, 0  ;;  %v11521_v57 = vld [vmem:[%s16928_s1 + $0x8ec] ss:$12 sps:$4 sm:$0xff]  }
 0x14d   :  { %7353 = vmatpush2.bf16.xpose.msra.mxu1 %v11396_v17  ;;  %v11446_v17 = vld [vmem:[%s16928_s1 + $0x660] ss:$12 sps:$4 sm:$0xff]  }
 0x14e   :  { %7354 = vmatprep.subr.bf16.mxu1 %v11403_v21  ;;  %v11454_v21 = vld [vmem:[%s16928_s1 + $0x710] ss:$12 sps:$4 sm:$0xff]  }
 0x153   :  { %10707 = vmatpush3.bf16.xpose.msra.mxu0 %v6276_v25 }
 0x154   :  { %11035 = vmatprep.subr.msk.bf16.mxu0 %vm6112_vm0, %v11409_v22  ;;  %v11455_v22 = vld [vmem:[%s16928_s1 + $0x650] ss:$12 sps:$4 sm:$0xff]  }
 0x155   :  { %7355 = vmatpush2.bf16.xpose.msra.mxu1 %v11401_v24  ;;  %v11458_v24 = vld [vmem:[%s16928_s1 + $0x634] ss:$12 sps:$4 sm:$0xff]   ;;  %v6318_v25 = vsel %vm6112_vm0, %v11455_v22, 0 }
 0x156   :  { %7356 = vmatprep.subr.bf16.mxu1 %v11408_v26  ;;  %v11459_v26 = vld [vmem:[%s16928_s1 + $0x6f8] ss:$12 sps:$4 sm:$0xff]   ;;  %v11519_v22 = vld [vmem:[%s16928_s1 + $0x8e8] ss:$12 sps:$4 sm:$0xff]  }
 0x15b   :  { %10709 = vmatpush3.bf16.xpose.msra.mxu0 %v6273_v30 }
 0x15c   :  { %11036 = vmatprep.subr.msk.bf16.mxu0 %vm6112_vm0, %v11414_v28  ;;  %v11460_v28 = vld [vmem:[%s16928_s1 + $0x638] ss:$12 sps:$4 sm:$0xff]  }
 0x15d   :  { %7357 = vmatpush2.bf16.xpose.msra.mxu1 %v11406_v29  ;;  %v11463_v29 = vld [vmem:[%s16928_s1 + $0x61c] ss:$12 sps:$4 sm:$0xff]   ;;  %v6315_v30 = vsel %vm6112_vm0, %v11460_v28, 0  ;;  %v13628_v28 = vld [vmem:[%s16927_s0] ss:$12 sps:$4 sm:$0xff]  }
 0x15e   :  { %7358 = vmatprep.subr.bf16.mxu1 %v11413_v31  ;;  %v11464_v31 = vld [vmem:[%s16928_s1 + $0x6e0] ss:$12 sps:$4 sm:$0xff]  }
 0x163   :  { %10711 = vmatpush3.bf16.xpose.msra.mxu0 %v6270_v37 }
 0x164   :  { %11037 = vmatprep.subr.msk.bf16.mxu0 %vm6112_vm0, %v11419_v33  ;;  %v11465_v33 = vld [vmem:[%s16928_s1 + $0x620] ss:$12 sps:$4 sm:$0xff]  }
 0x165   :  { %7359 = vmatpush2.bf16.xpose.msra.mxu1 %v11411_v34  ;;  %v11468_v34 = vld [vmem:[%s16928_s1 + $0x604] ss:$12 sps:$4 sm:$0xff]   ;;  %v6312_v37 = vsel %vm6112_vm0, %v11465_v33, 0 }
 0x166   :  { %7360 = vmatprep.subr.bf16.mxu1 %v11418_v38  ;;  %v11469_v38 = vld [vmem:[%s16928_s1 + $0x6c8] ss:$12 sps:$4 sm:$0xff]  }
 0x16b   :  { %10713 = vmatpush3.bf16.xpose.msra.mxu0 %v6267_v42 }
 0x16c   :  { %11038 = vmatprep.subr.msk.bf16.mxu0 %vm6112_vm0, %v11424_v40  ;;  %v11470_v40 = vld [vmem:[%s16928_s1 + $0x608] ss:$12 sps:$4 sm:$0xff]  }
 0x16d   :  { %7361 = vmatpush2.bf16.xpose.msra.mxu1 %v11416_v41  ;;  %v11473_v41 = vld [vmem:[%s16928_s1 + $0x76c] ss:$12 sps:$4 sm:$0xff]   ;;  %v6309_v42 = vsel %vm6112_vm0, %v11470_v40, 0  ;;  %v11524_v40 = vld [vmem:[%s16928_s1 + $0x8d0] ss:$12 sps:$4 sm:$0xff]  }
 0x16e   :  { %7362 = vmatprep.subr.bf16.mxu1 %v11423_v43  ;;  %v11476_v43 = vld [vmem:[%s16928_s1 + $0x82c] ss:$12 sps:$4 sm:$0xff]  }
 0x173   :  { %10715 = vmatpush3.bf16.xpose.msra.mxu0 %v6264_v47  ;;  %v11482_v47 = vld [vmem:[%s16928_s1 + $0x814] ss:$12 sps:$4 sm:$0xff]  }
 0x174   :  { %11039 = vmatprep.subr.msk.bf16.mxu0 %vm6112_vm0, %v11429_v45  ;;  %v11479_v45 = vld [vmem:[%s16928_s1 + $0x754] ss:$12 sps:$4 sm:$0xff]  }
 0x175   :  { %7363 = vmatpush2.bf16.xpose.msra.mxu1 %v11421_v46  ;;  %v11474_v46 = vld [vmem:[%s16928_s1 + $0x828] ss:$12 sps:$4 sm:$0xff]  }
 0x176   :  { %7364 = vmatprep.subr.bf16.mxu1 %v11428_v48  ;;  %v11477_v48 = vld [vmem:[%s16928_s1 + $0x750] ss:$12 sps:$4 sm:$0xff]  }
 0x17b   :  { %10717 = vmatpush3.bf16.xpose.msra.mxu0 %v6261_v52  ;;  %v11488_v52 = vld [vmem:[%s16928_s1 + $0x7fc] ss:$12 sps:$4 sm:$0xff]  }
 0x17c   :  { %7420 = vmatprep.subr.bf16.mxu0 %v11433_v50  ;;  %v11485_v50 = vld [vmem:[%s16928_s1 + $0x73c] ss:$12 sps:$4 sm:$0xff]  }
 0x17d   :  { %7365 = vmatpush2.bf16.xpose.msra.mxu1 %v11426_v51  ;;  %v11480_v51 = vld [vmem:[%s16928_s1 + $0x810] ss:$12 sps:$4 sm:$0xff]  }
 0x17e   :  { %11040 = vmatprep.subr.msk.bf16.mxu1 %vm6112_vm0, %v11434_v53  ;;  %v11483_v53 = vld [vmem:[%s16928_s1 + $0x738] ss:$12 sps:$4 sm:$0xff]  }
 0x182   :  { %v7239_v58 = vpop.f32.mrf.mxu0  ;;  %10719 = vmatmul.mubr.msk.bf16.vlgmr.msra.gmra.mxu0 %vm6112_vm0, %v13390_v59 }
 0x183   :  { %7421 = vmatpush1.bf16.xpose.msra.mxu0 %v11431_v55  ;;  %7452 = vmatprep.mubr.bf16.mxu0 %v13165_v35  ;;  %v11486_v55 = vld [vmem:[%s16928_s1 + $0x7f8] ss:$12 sps:$4 sm:$0xff]  }
 0x184   :  { %v7196_v36 = vpop.f32.mrf.mxu1  ;;  %7367 = vmatmul.mubr.bf16.vlgmr.msra.gmra.mxu1 %v13263_v7  ;;  %v7241_v62 = vpop.f32.mrf.mxu0  ;;  %7422 = vmatprep.subr.bf16.mxu0 %v11438_v56  ;;  %v6327_v7 = vsel %vm6112_vm0, %v11440_v63, 0  ;;  %v11494_v56 = vld [vmem:[%s16928_s1 + $0x7e4] ss:$12 sps:$4 sm:$0xff]   ;;  %v11503_v63 = vld [vmem:[%s16928_s1 + $0x6f4] ss:$12 sps:$4 sm:$0xff]  }
 0x185   :  { %v13403_v0 = vadd.f32 %v7239_v58, %v7196_v36  ;;  %10721 = vmatpush3.bf16.xpose.msra.mxu1 %v6330_v60  ;;  %10736 = vmatprep.mubr.msk.bf16.mxu1 %vm6112_vm0, %v13390_v59  ;;  %v11489_v58 = vld [vmem:[%s16928_s1 + $0x720] ss:$12 sps:$4 sm:$0xff]  }
 0x186   :  { %v7198_v35 = vpop.f32.mrf.mxu1  ;;  %v7243_v2 = vpop.f32.mrf.mxu0  ;;  %11041 = vmatprep.subr.msk.bf16.mxu1 %vm6112_vm0, %v11439_v61  ;;  %v11497_v60 = vld [vmem:[%s16928_s1 + $0x70c] ss:$12 sps:$4 sm:$0xff]  }
 0x187   :  { %17013 = vst [vmem:[#allocation11_spill] sm:$0xff] %v13403_v0  ;;  %v13414_v4 = vadd.f32 %v7241_v62, %v7198_v35  ;;  %v11492_v61 = vld [vmem:[%s16928_s1 + $0x7e0] ss:$12 sps:$4 sm:$0xff]   ;;  %v11495_v62 = vld [vmem:[%s16928_s1 + $0x708] ss:$12 sps:$4 sm:$0xff]  }
 0x188   :  { %v7200_v5 = vpop.f32.mrf.mxu1  ;;  %v11500_v36 = vld [vmem:[%s16928_s1 + $0x7cc] ss:$12 sps:$4 sm:$0xff]   ;;  %v11506_v35 = vld [vmem:[%s16928_s1 + $0x7b4] ss:$12 sps:$4 sm:$0xff]  }
 0x189   :  { %17014 = vst [vmem:[#allocation12_spill] sm:$0xff] %v13414_v4  ;;  %v13416_v6 = vadd.f32 %v7243_v2, %v7200_v5  ;;  %v11501_v2 = vld [vmem:[%s16928_s1 + $0x6f0] ss:$12 sps:$4 sm:$0xff]  }
 0x18a   :  { %v11504_v5 = vld [vmem:[%s16928_s1 + $0x7b0] ss:$12 sps:$4 sm:$0xff]  }
 0x18b   :  { %17015 = vst [vmem:[#allocation13_spill] sm:$0xff] %v13416_v6  ;;  %7423 = vmatpush1.bf16.xpose.msra.mxu0 %v11436_v1  ;;  %v11498_v1 = vld [vmem:[%s16928_s1 + $0x7c8] ss:$12 sps:$4 sm:$0xff]  }
 0x18c   :  { %7424 = vmatprep.subr.bf16.mxu0 %v11443_v3  ;;  %v11509_v3 = vld [vmem:[%s16928_s1 + $0x6dc] ss:$12 sps:$4 sm:$0xff]  }
 0x18d   :  { %10723 = vmatpush3.bf16.xpose.msra.mxu1 %v6327_v7  ;;  %v11512_v7 = vld [vmem:[%s16928_s1 + $0x79c] ss:$12 sps:$4 sm:$0xff]  }
 0x18e   :  { %11042 = vmatprep.subr.msk.bf16.mxu1 %vm6112_vm0, %v11444_v8  ;;  %v11507_v8 = vld [vmem:[%s16928_s1 + $0x6d8] ss:$12 sps:$4 sm:$0xff]  }
 0x193   :  { %7425 = vmatpush1.bf16.xpose.msra.mxu0 %v11441_v10  ;;  %v11515_v10 = vld [vmem:[%s16928_s1 + $0x6c4] ss:$12 sps:$4 sm:$0xff]  }
 0x194   :  { %7426 = vmatprep.subr.bf16.mxu0 %v11448_v12  ;;  %v11518_v12 = vld [vmem:[%s16928_s1 + $0x784] ss:$12 sps:$4 sm:$0xff]  }
 0x195   :  { %10725 = vmatpush3.bf16.xpose.msra.mxu1 %v6324_v14  ;;  %v11513_v14 = vld [vmem:[%s16928_s1 + $0x6c0] ss:$12 sps:$4 sm:$0xff]  }
 0x196   :  { %11043 = vmatprep.subr.msk.bf16.mxu1 %vm6112_vm0, %v11449_v15  ;;  %v11522_v15 = vld [vmem:[%s16928_s1 + $0x8f0] ss:$12 sps:$4 sm:$0xff]  }
 0x19b   :  { %7427 = vmatpush1.bf16.xpose.msra.mxu0 %v11446_v17  ;;  %v11516_v17 = vld [vmem:[%s16928_s1 + $0x780] ss:$12 sps:$4 sm:$0xff]  }
 0x19c   :  { %7428 = vmatprep.subr.bf16.mxu0 %v11453_v18  ;;  %v13610_v18 = vpop.f32.mrf.mxu1 }
 0x19d   :  { %10727 = vmatpush3.bf16.xpose.msra.mxu1 %v6321_v19  ;;  %v11523_v19 = vld [vmem:[%s16928_s1 + $0x830] ss:$12 sps:$4 sm:$0xff]  }
 0x19e   :  { %11044 = vmatprep.subr.msk.bf16.mxu1 %vm6112_vm0, %v11454_v21 }
 0x1a3   :  { %7429 = vmatpush1.bf16.xpose.msra.mxu0 %v11451_v23  ;;  %v11527_v23 = vld [vmem:[%s16928_s1 + $0x8d8] ss:$12 sps:$4 sm:$0xff]  }
 0x1a4   :  { %7430 = vmatprep.subr.bf16.mxu0 %v11458_v24  ;;  %v13622_v24 = vpop.f32.mrf.mxu0 }
 0x1a5   :  { %10729 = vmatpush3.bf16.xpose.msra.mxu1 %v6318_v25 }
 0x1a6   :  { %11045 = vmatprep.subr.msk.bf16.mxu1 %vm6112_vm0, %v11459_v26  ;;  %v6378_v26 = vsel %vm6112_vm0, %v11523_v19, 0 }
 0x1ab   :  { %7431 = vmatpush1.bf16.xpose.msra.mxu0 %v11456_v27 }
 0x1ac   :  { %7432 = vmatprep.subr.bf16.mxu0 %v11463_v29  ;;  %v11526_v29 = vld [vmem:[%s16928_s1 + $0x8d4] ss:$12 sps:$4 sm:$0xff]  }
 0x1ad   :  { %10731 = vmatpush3.bf16.xpose.msra.mxu1 %v6315_v30 }
 0x1ae   :  { %11046 = vmatprep.subr.msk.bf16.mxu1 %vm6112_vm0, %v11464_v31  ;;  %v11528_v31 = vld [vmem:[%s16928_s1 + $0x818] ss:$12 sps:$4 sm:$0xff]  }
 0x1b3   :  { %7433 = vmatpush1.bf16.xpose.msra.mxu0 %v11461_v32 }
 0x1b4   :  { %7434 = vmatprep.subr.bf16.mxu0 %v11468_v34 }
 0x1b5   :  { %10733 = vmatpush3.bf16.xpose.msra.mxu1 %v6312_v37 }
 0x1b6   :  { %11047 = vmatprep.subr.msk.bf16.mxu1 %vm6112_vm0, %v11469_v38  ;;  %v11532_v38 = vld [vmem:[%s16928_s1 + $0x8c0] ss:$12 sps:$4 sm:$0xff]  }
 0x1bb   :  { %7435 = vmatpush1.bf16.xpose.msra.mxu0 %v11466_v39 }
 0x1bc   :  { %7436 = vmatprep.subr.bf16.mxu0 %v11473_v41 }
 0x1bd   :  { %10735 = vmatpush3.bf16.xpose.msra.mxu1 %v6309_v42  ;;  %v6375_v42 = vsel %vm6112_vm0, %v11528_v31, 0 }
 0x1be   :  { %7506 = vmatprep.subr.bf16.mxu1 %v11476_v43 }
 0x1c3   :  { %7437 = vmatpush2.bf16.xpose.msra.mxu0 %v11471_v44  ;;  %v11531_v44 = vld [vmem:[%s16928_s1 + $0x8bc] ss:$12 sps:$4 sm:$0xff]  }
 0x1c4   :  { %10737 = vmatmul.mubr.msk.bf16.vlgmr.msra.gmra.mxu1 %vm6112_vm0, %v13390_v59  ;;  %7438 = vmatprep.subr.bf16.mxu0 %v11479_v45  ;;  %v7325_v21 = vpop.f32.mrf.mxu1  ;;  %v11533_v45 = vld [vmem:[%s16928_s1 + $0x800] ss:$12 sps:$4 sm:$0xff]  }
 0x1c5   :  { %7507 = vmatpush1.bf16.xpose.msra.mxu1 %v11474_v46  ;;  %7538 = vmatprep.mubr.bf16.mxu1 %v13526_v49  ;;  %v11537_v46 = vld [vmem:[%s16928_s1 + $0x8a8] ss:$12 sps:$4 sm:$0xff]  }
 0x1c6   :  { %7508 = vmatprep.subr.bf16.mxu1 %v11482_v47  ;;  %v7327_v25 = vpop.f32.mrf.mxu1  ;;  %v11529_v47 = vld [vmem:[%s16928_s1 + $0x8b8] ss:$12 sps:$4 sm:$0xff]  }
 0x1c8   :  { %v7329_v32 = vpop.f32.mrf.mxu1 }
 0x1cb   :  { %7439 = vmatpush2.bf16.xpose.msra.mxu0 %v11477_v48  ;;  %v6372_v48 = vsel %vm6112_vm0, %v11533_v45, 0 }
 0x1cc   :  { %7440 = vmatprep.subr.bf16.mxu0 %v11485_v50  ;;  %v11536_v50 = vld [vmem:[%s16928_s1 + $0x8a4] ss:$12 sps:$4 sm:$0xff]  }
 0x1cd   :  { %7509 = vmatpush1.bf16.xpose.msra.mxu1 %v11480_v51  ;;  %v11538_v51 = vld [vmem:[%s16928_s1 + $0x7e8] ss:$12 sps:$4 sm:$0xff]  }
 0x1ce   :  { %7510 = vmatprep.subr.bf16.mxu1 %v11488_v52  ;;  %v11542_v52 = vld [vmem:[%s16928_s1 + $0x890] ss:$12 sps:$4 sm:$0xff]  }
 0x1d3   :  { %7441 = vmatpush2.bf16.xpose.msra.mxu0 %v11483_v53  ;;  %v11534_v53 = vld [vmem:[%s16928_s1 + $0x8a0] ss:$12 sps:$4 sm:$0xff]  }
 0x1d4   :  { %7442 = vmatprep.subr.bf16.mxu0 %v11491_v54  ;;  %v6369_v54 = vsel %vm6112_vm0, %v11538_v51, 0 }
 0x1d5   :  { %7511 = vmatpush1.bf16.xpose.msra.mxu1 %v11486_v55  ;;  %v11541_v55 = vld [vmem:[%s16928_s1 + $0x88c] ss:$12 sps:$4 sm:$0xff]  }
 0x1d6   :  { %7512 = vmatprep.subr.bf16.mxu1 %v11494_v56  ;;  %v11543_v56 = vld [vmem:[%s16928_s1 + $0x7d0] ss:$12 sps:$4 sm:$0xff]  }
 0x1db   :  { %7443 = vmatpush2.bf16.xpose.msra.mxu0 %v11489_v58 }
 0x1dc   :  { %7444 = vmatprep.subr.bf16.mxu0 %v11497_v60 }
 0x1dd   :  { %7513 = vmatpush1.bf16.xpose.msra.mxu1 %v11492_v61 }
 0x1de   :  { %7514 = vmatprep.subr.bf16.mxu1 %v11500_v36 }
 0x1e3   :  { %7445 = vmatpush2.bf16.xpose.msra.mxu0 %v11495_v62 }
 0x1e4   :  { %7446 = vmatprep.subr.bf16.mxu0 %v11503_v63 }
 0x1e5   :  { %7515 = vmatpush1.bf16.xpose.msra.mxu1 %v11498_v1 }
 0x1e6   :  { %7516 = vmatprep.subr.bf16.mxu1 %v11506_v35 }
 0x1eb   :  { %7447 = vmatpush2.bf16.xpose.msra.mxu0 %v11501_v2 }
 0x1ec   :  { %7448 = vmatprep.subr.bf16.mxu0 %v11509_v3 }
 0x1ed   :  { %7517 = vmatpush1.bf16.xpose.msra.mxu1 %v11504_v5 }
 0x1ee   :  { %7518 = vmatprep.subr.bf16.mxu1 %v11512_v7 }
 0x1f3   :  { %7449 = vmatpush2.bf16.xpose.msra.mxu0 %v11507_v8 }
 0x1f4   :  { %7450 = vmatprep.subr.bf16.mxu0 %v11515_v10 }
 0x1f5   :  { %7519 = vmatpush1.bf16.xpose.msra.mxu1 %v11510_v11 }
 0x1f6   :  { %7520 = vmatprep.subr.bf16.mxu1 %v11518_v12 }
 0x1fb   :  { %7451 = vmatpush2.bf16.xpose.msra.mxu0 %v11513_v14 }
 0x1fc   :  { %11048 = vmatprep.subr.msk.bf16.mxu0 %vm6112_vm0, %v11522_v15 }
 0x1fd   :  { %7521 = vmatpush1.bf16.xpose.msra.mxu1 %v11516_v17 }
 0x1fe   :  { %7522 = vmatprep.subr.bf16.mxu1 %v11521_v57 }
 0x202   :  { %v7282_v27 = vpop.f32.mrf.mxu0  ;;  %7453 = vmatmul.mubr.bf16.vlgmr.msra.gmra.mxu0 %v13628_v28 }
 0x203   :  { %v13634_v30 = vadd.f32 %v7325_v21, %v7282_v27  ;;  %10739 = vmatpush3.bf16.xpose.msra.mxu0 %v6378_v26  ;;  %10754 = vmatprep.mubr.msk.bf16.mxu0 %vm6112_vm0, %v13390_v59  ;;  %v7331_v59 = vpop.f32.mrf.mxu1 }
 0x204   :  { %v7284_v33 = vpop.f32.mrf.mxu0  ;;  %11049 = vmatprep.subr.msk.bf16.mxu0 %vm6112_vm0, %v11527_v23 }
 0x205   :  { %17016 = vst [vmem:[#allocation14_spill] sm:$0xff] %v13634_v30  ;;  %7523 = vmatpush2.bf16.xpose.msra.mxu1 %v11519_v22  ;;  %v13642_v34 = vadd.f32 %v7327_v25, %v7284_v33 }
 0x206   :  { %v7286_v37 = vpop.f32.mrf.mxu0  ;;  %7524 = vmatprep.subr.bf16.mxu1 %v11526_v29 }
 0x207   :  { %v13647_v39 = vadd.f32 %v7329_v32, %v7286_v37 }
 0x208   :  { %v7288_v41 = vpop.f32.mrf.mxu0 }
 0x209   :  { %17017 = vst [vmem:[#allocation15_spill] sm:$0xff] %v13647_v39  ;;  %v13653_v43 = vadd.f32 %v7331_v59, %v7288_v41 }
 0x20b   :  { %17018 = vst [vmem:[#allocation16_spill] sm:$0xff] %v13653_v43  ;;  %10741 = vmatpush3.bf16.xpose.msra.mxu0 %v6375_v42 }
 0x20c   :  { %11050 = vmatprep.subr.msk.bf16.mxu0 %vm6112_vm0, %v11532_v38 }
 0x20d   :  { %7525 = vmatpush2.bf16.xpose.msra.mxu1 %v11524_v40 }
 0x20e   :  { %7526 = vmatprep.subr.bf16.mxu1 %v11531_v44 }
 0x213   :  { %10743 = vmatpush3.bf16.xpose.msra.mxu0 %v6372_v48 }
 0x214   :  { %11051 = vmatprep.subr.msk.bf16.mxu0 %vm6112_vm0, %v11537_v46 }
 0x215   :  { %7527 = vmatpush2.bf16.xpose.msra.mxu1 %v11529_v47 }
 0x216   :  { %7528 = vmatprep.subr.bf16.mxu1 %v11536_v50 }
 0x21b   :  { %10745 = vmatpush3.bf16.xpose.msra.mxu0 %v6369_v54 }
 0x21c   :  { %11052 = vmatprep.subr.msk.bf16.mxu0 %vm6112_vm0, %v11542_v52 }
 0x21d   :  { %7 = vsyncpa [#allocation5], 0  ;;  %7529 = vmatpush2.bf16.xpose.msra.mxu1 %v11534_v53  ;;  %v6366_v58 = vsel %vm6112_vm0, %v11543_v56, 0  ;;  %v11547_v60 = vld [vmem:[%s16928_s1 + $0x878] ss:$12 sps:$4 sm:$0xff]  }
 0x21e   :  { %7530 = vmatprep.subr.bf16.mxu1 %v11541_v55  ;;  %v11539_v61 = vld [vmem:[%s16928_s1 + $0x888] ss:$12 sps:$4 sm:$0xff]   ;;  %v11548_v62 = vld [vmem:[%s16928_s1 + $0x7b8] ss:$12 sps:$4 sm:$0xff]   ;;  %v11552_v1 = vld [vmem:[%s16928_s1 + $0x860] ss:$12 sps:$4 sm:$0xff]  }
 0x21f   :  { %v11546_v36 = vld [vmem:[%s16928_s1 + $0x874] ss:$12 sps:$4 sm:$0xff]   ;;  %v6363_v63 = vsel %vm6112_vm0, %v11548_v62, 0  ;;  %v11544_v35 = vld [vmem:[%s16928_s1 + $0x870] ss:$12 sps:$4 sm:$0xff]  }
 0x220   :  { %v11551_v2 = vld [vmem:[%s16928_s1 + $0x85c] ss:$12 sps:$4 sm:$0xff]   ;;  %v11553_v3 = vld [vmem:[%s16928_s1 + $0x7a0] ss:$12 sps:$4 sm:$0xff]   ;;  %v11549_v8 = vld [vmem:[%s16928_s1 + $0x858] ss:$12 sps:$4 sm:$0xff]  }
 0x221   :  { %v6360_v5 = vsel %vm6112_vm0, %v11553_v3, 0  ;;  %v11557_v7 = vld [vmem:[%s16928_s1 + $0x848] ss:$12 sps:$4 sm:$0xff]   ;;  %v11556_v10 = vld [vmem:[%s16928_s1 + $0x844] ss:$12 sps:$4 sm:$0xff]  }
 0x222   :  { %v11558_v11 = vld [vmem:[%s16928_s1 + $0x788] ss:$12 sps:$4 sm:$0xff]   ;;  %v11561_v14 = vld [vmem:[%s16928_s1 + $0x9ac] ss:$12 sps:$4 sm:$0xff]   ;;  %v11562_v17 = vld [vmem:[%s16928_s1 + $0xa70] ss:$12 sps:$4 sm:$0xff]  }
 0x223   :  { %10747 = vmatpush3.bf16.xpose.msra.mxu0 %v6366_v58  ;;  %v6357_v12 = vsel %vm6112_vm0, %v11558_v11, 0  ;;  %v11554_v15 = vld [vmem:[%s16928_s1 + $0x840] ss:$12 sps:$4 sm:$0xff]   ;;  %v11563_v57 = vld [vmem:[%s16928_s1 + $0x9b0] ss:$12 sps:$4 sm:$0xff]  }
 0x224   :  { %11053 = vmatprep.subr.msk.bf16.mxu0 %vm6112_vm0, %v11547_v60  ;;  %v11559_v19 = vld [vmem:[%s16928_s1 + $0x9a8] ss:$12 sps:$4 sm:$0xff]   ;;  %v6426_v25 = vsel %vm6112_vm0, %v11563_v57, 0  ;;  %v11567_v26 = vld [vmem:[%s16928_s1 + $0xa58] ss:$12 sps:$4 sm:$0xff]  }
 0x225   :  { %7531 = vmatpush2.bf16.xpose.msra.mxu1 %v11539_v61  ;;  %v11566_v21 = vld [vmem:[%s16928_s1 + $0x994] ss:$12 sps:$4 sm:$0xff]   ;;  %v11568_v37 = vld [vmem:[%s16928_s1 + $0x998] ss:$12 sps:$4 sm:$0xff]   ;;  %v11564_v40 = vld [vmem:[%s16928_s1 + $0x990] ss:$12 sps:$4 sm:$0xff]  }
 0x226   :  { %7532 = vmatprep.subr.bf16.mxu1 %v11546_v36  ;;  %v13755_v22 = vld [vmem:[%s16927_s0 + $0x8] ss:$12 sps:$4 sm:$0xff]   ;;  %v6423_v46 = vsel %vm6112_vm0, %v11568_v37, 0  ;;  %v11572_v47 = vld [vmem:[%s16928_s1 + $0xa40] ss:$12 sps:$4 sm:$0xff]  }
 0x227   :  { %v11571_v42 = vld [vmem:[%s16928_s1 + $0x97c] ss:$12 sps:$4 sm:$0xff]   ;;  %v11573_v50 = vld [vmem:[%s16928_s1 + $0x980] ss:$12 sps:$4 sm:$0xff]   ;;  %v11569_v51 = vld [vmem:[%s16928_s1 + $0x978] ss:$12 sps:$4 sm:$0xff]  }
 0x228   :  { %v11576_v52 = vld [vmem:[%s16928_s1 + $0x964] ss:$12 sps:$4 sm:$0xff]   ;;  %v6420_v53 = vsel %vm6112_vm0, %v11573_v50, 0  ;;  %v11577_v54 = vld [vmem:[%s16928_s1 + $0xa28] ss:$12 sps:$4 sm:$0xff]  }
 0x229   :  { %v11578_v55 = vld [vmem:[%s16928_s1 + $0x968] ss:$12 sps:$4 sm:$0xff]   ;;  %v11574_v56 = vld [vmem:[%s16928_s1 + $0x960] ss:$12 sps:$4 sm:$0xff]   ;;  %v11582_v61 = vld [vmem:[%s16928_s1 + $0xa10] ss:$12 sps:$4 sm:$0xff]  }
 0x22a   :  { %v11581_v58 = vld [vmem:[%s16928_s1 + $0x94c] ss:$12 sps:$4 sm:$0xff]   ;;  %v6417_v60 = vsel %vm6112_vm0, %v11578_v55, 0  ;;  %v11583_v36 = vld [vmem:[%s16928_s1 + $0x950] ss:$12 sps:$4 sm:$0xff]  }
 0x22b   :  { %10749 = vmatpush3.bf16.xpose.msra.mxu0 %v6363_v63  ;;  %v11579_v62 = vld [vmem:[%s16928_s1 + $0x948] ss:$12 sps:$4 sm:$0xff]   ;;  %v11584_v3 = vld [vmem:[%s16928_s1 + $0x930] ss:$12 sps:$4 sm:$0xff]   ;;  %v11589_v11 = vld [vmem:[%s16928_s1 + $0x918] ss:$12 sps:$4 sm:$0xff]  }
 0x22c   :  { %11054 = vmatprep.subr.msk.bf16.mxu0 %vm6112_vm0, %v11552_v1  ;;  %v11586_v63 = vld [vmem:[%s16928_s1 + $0x934] ss:$12 sps:$4 sm:$0xff]   ;;  %v6414_v1 = vsel %vm6112_vm0, %v11583_v36, 0  ;;  %v11608_v37 = vld [vmem:[%s16928_s1 + $0xb10] ss:$12 sps:$4 sm:$0xff]  }
 0x22d   :  { %7533 = vmatpush2.bf16.xpose.msra.mxu1 %v11544_v35  ;;  %v11587_v35 = vld [vmem:[%s16928_s1 + $0x9f8] ss:$12 sps:$4 sm:$0xff]   ;;  %v11594_v57 = vld [vmem:[%s16928_s1 + $0x900] ss:$12 sps:$4 sm:$0xff]   ;;  %v11629_v55 = vld [vmem:[%s16928_s1 + $0x9f0] ss:$12 sps:$4 sm:$0xff]  }
 0x22e   :  { %7534 = vmatprep.subr.bf16.mxu1 %v11551_v2  ;;  %v11588_v2 = vld [vmem:[%s16928_s1 + $0x938] ss:$12 sps:$4 sm:$0xff]  }
 0x22f   :  { %v11628_v50 = vld [vmem:[%s16928_s1 + $0xacc] ss:$12 sps:$4 sm:$0xff]   ;;  %v11643_v36 = vld [vmem:[%s16928_s1 + $0x9c4] ss:$12 sps:$4 sm:$0xff]  }
 0x233   :  { %10751 = vmatpush3.bf16.xpose.msra.mxu0 %v6360_v5  ;;  %v11591_v5 = vld [vmem:[%s16928_s1 + $0x91c] ss:$12 sps:$4 sm:$0xff]  }
 0x234   :  { %11055 = vmatprep.subr.msk.bf16.mxu0 %vm6112_vm0, %v11557_v7  ;;  %v6411_v7 = vsel %vm6112_vm0, %v11588_v2, 0  ;;  %v11644_v2 = vld [vmem:[%s16928_s1 + $0xa80] ss:$12 sps:$4 sm:$0xff]  }
 0x235   :  { %7535 = vmatpush2.bf16.xpose.msra.mxu1 %v11549_v8  ;;  %v11592_v8 = vld [vmem:[%s16928_s1 + $0x9e0] ss:$12 sps:$4 sm:$0xff]  }
 0x236   :  { %7536 = vmatprep.subr.bf16.mxu1 %v11556_v10  ;;  %v11593_v10 = vld [vmem:[%s16928_s1 + $0x920] ss:$12 sps:$4 sm:$0xff]  }
 0x23b   :  { %10753 = vmatpush3.bf16.xpose.msra.mxu0 %v6357_v12  ;;  %v11596_v12 = vld [vmem:[%s16928_s1 + $0x904] ss:$12 sps:$4 sm:$0xff]  }
 0x23c   :  { %7592 = vmatprep.subr.bf16.mxu0 %v11561_v14  ;;  %v6408_v14 = vsel %vm6112_vm0, %v11593_v10, 0  ;;  %v11647_v10 = vld [vmem:[%s16928_s1 + $0xbe8] ss:$12 sps:$4 sm:$0xff]  }
 0x23d   :  { %7537 = vmatpush2.bf16.xpose.msra.mxu1 %v11554_v15  ;;  %v11597_v15 = vld [vmem:[%s16928_s1 + $0x9c8] ss:$12 sps:$4 sm:$0xff]  }
 0x23e   :  { %11056 = vmatprep.subr.msk.bf16.mxu1 %vm6112_vm0, %v11562_v17  ;;  %v11598_v17 = vld [vmem:[%s16928_s1 + $0x908] ss:$12 sps:$4 sm:$0xff]  }
 0x242   :  { %v7411_v23 = vpop.f32.mrf.mxu0  ;;  %10755 = vmatmul.mubr.msk.bf16.vlgmr.msra.gmra.mxu0 %vm6112_vm0, %v13755_v22 }
 0x243   :  { %7593 = vmatpush1.bf16.xpose.msra.mxu0 %v11559_v19  ;;  %7624 = vmatprep.mubr.bf16.mxu0 %v13526_v49  ;;  %v11601_v19 = vld [vmem:[%s16928_s1 + $0xa6c] ss:$12 sps:$4 sm:$0xff]  }
 0x244   :  { %v7368_v27 = vpop.f32.mrf.mxu1  ;;  %7539 = vmatmul.mubr.bf16.vlgmr.msra.gmra.mxu1 %v13628_v28  ;;  %v7413_v29 = vpop.f32.mrf.mxu0  ;;  %7594 = vmatprep.subr.bf16.mxu0 %v11566_v21  ;;  %v6405_v21 = vsel %vm6112_vm0, %v11598_v17, 0  ;;  %v11652_v17 = vld [vmem:[%s16928_s1 + $0xbd0] ss:$12 sps:$4 sm:$0xff]  }
 0x245   :  { %v13765_v31 = vadd.f32 %v7411_v23, %v7368_v27  ;;  %10757 = vmatpush3.bf16.xpose.msra.mxu1 %v6426_v25  ;;  %10772 = vmatprep.mubr.msk.bf16.mxu1 %vm6112_vm0, %v13755_v22  ;;  %v11604_v23 = vld [vmem:[%s16928_s1 + $0xb2c] ss:$12 sps:$4 sm:$0xff]   ;;  %v11599_v25 = vld [vmem:[%s16928_s1 + $0xa68] ss:$12 sps:$4 sm:$0xff]  }
 0x246   :  { %v7370_v32 = vpop.f32.mrf.mxu1  ;;  %v7415_v33 = vpop.f32.mrf.mxu0  ;;  %11057 = vmatprep.subr.msk.bf16.mxu1 %vm6112_vm0, %v11567_v26  ;;  %v11607_v26 = vld [vmem:[%s16928_s1 + $0xa54] ss:$12 sps:$4 sm:$0xff]  }
 0x247   :  { %v13773_v38 = vadd.f32 %v7413_v29, %v7370_v32  ;;  %v11602_v27 = vld [vmem:[%s16928_s1 + $0xb28] ss:$12 sps:$4 sm:$0xff]   ;;  %v11605_v32 = vld [vmem:[%s16928_s1 + $0xa50] ss:$12 sps:$4 sm:$0xff]  }
 0x248   :  { %v7372_v59 = vpop.f32.mrf.mxu1  ;;  %v7417_v41 = vpop.f32.mrf.mxu0  ;;  %v11610_v29 = vld [vmem:[%s16928_s1 + $0xb14] ss:$12 sps:$4 sm:$0xff]  }
 0x249   :  { %17019 = vst [vmem:[#allocation17_spill] sm:$0xff] %v13773_v38  ;;  %v13781_v44 = vadd.f32 %v7415_v33, %v7372_v59  ;;  %v11613_v33 = vld [vmem:[%s16928_s1 + $0xa3c] ss:$12 sps:$4 sm:$0xff]   ;;  %v11619_v59 = vld [vmem:[%s16928_s1 + $0xa24] ss:$12 sps:$4 sm:$0xff]  }
 0x24a   :  { %v7374_v45 = vpop.f32.mrf.mxu1 }
 0x24b   :  { %17020 = vst [vmem:[#allocation18_spill] sm:$0xff] %v13781_v44  ;;  %v13787_v48 = vadd.f32 %v7417_v41, %v7374_v45  ;;  %7595 = vmatpush1.bf16.xpose.msra.mxu0 %v11564_v40  ;;  %v11616_v40 = vld [vmem:[%s16928_s1 + $0xafc] ss:$12 sps:$4 sm:$0xff]   ;;  %v11614_v41 = vld [vmem:[%s16928_s1 + $0xaf8] ss:$12 sps:$4 sm:$0xff]  }
 0x24c   :  { %7596 = vmatprep.subr.bf16.mxu0 %v11571_v42  ;;  %v11622_v42 = vld [vmem:[%s16928_s1 + $0xae4] ss:$12 sps:$4 sm:$0xff]   ;;  %v11617_v45 = vld [vmem:[%s16928_s1 + $0xa20] ss:$12 sps:$4 sm:$0xff]  }
 0x24d   :  { %17021 = vst [vmem:[#allocation19_spill] sm:$0xff] %v13787_v48  ;;  %10759 = vmatpush3.bf16.xpose.msra.mxu1 %v6423_v46  ;;  %v11625_v46 = vld [vmem:[%s16928_s1 + $0xa0c] ss:$12 sps:$4 sm:$0xff]  }
 0x24e   :  { %11058 = vmatprep.subr.msk.bf16.mxu1 %vm6112_vm0, %v11572_v47  ;;  %v11620_v47 = vld [vmem:[%s16928_s1 + $0xae0] ss:$12 sps:$4 sm:$0xff]  }
 0x253   :  { %7597 = vmatpush1.bf16.xpose.msra.mxu0 %v11569_v51  ;;  %v11623_v51 = vld [vmem:[%s16928_s1 + $0xa08] ss:$12 sps:$4 sm:$0xff]  }
 0x254   :  { %7598 = vmatprep.subr.bf16.mxu0 %v11576_v52  ;;  %v11631_v52 = vld [vmem:[%s16928_s1 + $0x9f4] ss:$12 sps:$4 sm:$0xff]  }
 0x255   :  { %10761 = vmatpush3.bf16.xpose.msra.mxu1 %v6420_v53  ;;  %v11626_v53 = vld [vmem:[%s16928_s1 + $0xac8] ss:$12 sps:$4 sm:$0xff]  }
 0x256   :  { %11059 = vmatprep.subr.msk.bf16.mxu1 %vm6112_vm0, %v11577_v54  ;;  %v11634_v54 = vld [vmem:[%s16928_s1 + $0xab4] ss:$12 sps:$4 sm:$0xff]  }
 0x25b   :  { %7599 = vmatpush1.bf16.xpose.msra.mxu0 %v11574_v56  ;;  %v11637_v56 = vld [vmem:[%s16928_s1 + $0x9dc] ss:$12 sps:$4 sm:$0xff]  }
 0x25c   :  { %7600 = vmatprep.subr.bf16.mxu0 %v11581_v58  ;;  %v11632_v58 = vld [vmem:[%s16928_s1 + $0xab0] ss:$12 sps:$4 sm:$0xff]  }
 0x25d   :  { %10763 = vmatpush3.bf16.xpose.msra.mxu1 %v6417_v60  ;;  %v11640_v60 = vld [vmem:[%s16928_s1 + $0xa9c] ss:$12 sps:$4 sm:$0xff]  }
 0x25e   :  { %11060 = vmatprep.subr.msk.bf16.mxu1 %vm6112_vm0, %v11582_v61  ;;  %v11635_v61 = vld [vmem:[%s16928_s1 + $0x9d8] ss:$12 sps:$4 sm:$0xff]  }
 0x263   :  { %7601 = vmatpush1.bf16.xpose.msra.mxu0 %v11579_v62  ;;  %v11638_v62 = vld [vmem:[%s16928_s1 + $0xa98] ss:$12 sps:$4 sm:$0xff]  }
 0x264   :  { %7602 = vmatprep.subr.bf16.mxu0 %v11586_v63  ;;  %v11646_v63 = vld [vmem:[%s16928_s1 + $0xa84] ss:$12 sps:$4 sm:$0xff]  }
 0x265   :  { %10765 = vmatpush3.bf16.xpose.msra.mxu1 %v6414_v1  ;;  %v11641_v1 = vld [vmem:[%s16928_s1 + $0x9c0] ss:$12 sps:$4 sm:$0xff]  }
 0x266   :  { %11061 = vmatprep.subr.msk.bf16.mxu1 %vm6112_vm0, %v11587_v35  ;;  %v11650_v35 = vld [vmem:[%s16928_s1 + $0xbf0] ss:$12 sps:$4 sm:$0xff]  }
 0x26b   :  { %7603 = vmatpush1.bf16.xpose.msra.mxu0 %v11584_v3  ;;  %v11649_v3 = vld [vmem:[%s16928_s1 + $0xbec] ss:$12 sps:$4 sm:$0xff]  }
 0x26c   :  { %7604 = vmatprep.subr.bf16.mxu0 %v11591_v5  ;;  %v11651_v5 = vld [vmem:[%s16928_s1 + $0xb30] ss:$12 sps:$4 sm:$0xff]  }
 0x26d   :  { %10767 = vmatpush3.bf16.xpose.msra.mxu1 %v6411_v7  ;;  %v6474_v7 = vsel %vm6112_vm0, %v11651_v5, 0  ;;  %v14106_v5 = vld [vmem:[%s16927_s0 + $0x4] ss:$12 sps:$4 sm:$0xff]  }
 0x26e   :  { %11062 = vmatprep.subr.msk.bf16.mxu1 %vm6112_vm0, %v11592_v8  ;;  %v11655_v8 = vld [vmem:[%s16928_s1 + $0xbd8] ss:$12 sps:$4 sm:$0xff]  }
 0x273   :  { %7605 = vmatpush1.bf16.xpose.msra.mxu0 %v11589_v11  ;;  %v11654_v11 = vld [vmem:[%s16928_s1 + $0xbd4] ss:$12 sps:$4 sm:$0xff]  }
 0x274   :  { %7606 = vmatprep.subr.bf16.mxu0 %v11596_v12  ;;  %v11656_v12 = vld [vmem:[%s16928_s1 + $0xb18] ss:$12 sps:$4 sm:$0xff]  }
 0x275   :  { %10769 = vmatpush3.bf16.xpose.msra.mxu1 %v6408_v14  ;;  %v6471_v14 = vsel %vm6112_vm0, %v11656_v12, 0  ;;  %v11701_v12 = vld [vmem:[%s16928_s1 + $0xc80] ss:$12 sps:$4 sm:$0xff]  }
 0x276   :  { %11063 = vmatprep.subr.msk.bf16.mxu1 %vm6112_vm0, %v11597_v15  ;;  %v11660_v15 = vld [vmem:[%s16928_s1 + $0xbc0] ss:$12 sps:$4 sm:$0xff]  }
 0x27b   :  { %7607 = vmatpush1.bf16.xpose.msra.mxu0 %v11594_v57  ;;  %v11659_v57 = vld [vmem:[%s16928_s1 + $0xbbc] ss:$12 sps:$4 sm:$0xff]  }
 0x27c   :  { %7608 = vmatprep.subr.bf16.mxu0 %v11601_v19  ;;  %v11661_v19 = vld [vmem:[%s16928_s1 + $0xb00] ss:$12 sps:$4 sm:$0xff]  }
 0x27d   :  { %10771 = vmatpush3.bf16.xpose.msra.mxu1 %v6405_v21  ;;  %v6468_v21 = vsel %vm6112_vm0, %v11661_v19, 0  ;;  %v11706_v19 = vld [vmem:[%s16928_s1 + $0xc68] ss:$12 sps:$4 sm:$0xff]  }
 0x27e   :  { %7678 = vmatprep.subr.bf16.mxu1 %v11604_v23  ;;  %v11665_v23 = vld [vmem:[%s16928_s1 + $0xba8] ss:$12 sps:$4 sm:$0xff]  }
 0x283   :  { %7609 = vmatpush2.bf16.xpose.msra.mxu0 %v11599_v25  ;;  %v11657_v25 = vld [vmem:[%s16928_s1 + $0xbb8] ss:$12 sps:$4 sm:$0xff]  }
 0x284   :  { %10773 = vmatmul.mubr.msk.bf16.vlgmr.msra.gmra.mxu1 %vm6112_vm0, %v13755_v22  ;;  %7610 = vmatprep.subr.bf16.mxu0 %v11607_v26  ;;  %v11664_v26 = vld [vmem:[%s16928_s1 + $0xba4] ss:$12 sps:$4 sm:$0xff]  }
 0x285   :  { %7679 = vmatpush1.bf16.xpose.msra.mxu1 %v11602_v27  ;;  %7710 = vmatprep.mubr.bf16.mxu1 %v13526_v49  ;;  %v11611_v49 = vld [vmem:[%s16928_s1 + $0xa38] ss:$12 sps:$4 sm:$0xff]   ;;  %v11666_v27 = vld [vmem:[%s16928_s1 + $0xae8] ss:$12 sps:$4 sm:$0xff]  }
 0x286   :  { %7680 = vmatprep.subr.bf16.mxu1 %v11610_v29  ;;  %v6465_v29 = vsel %vm6112_vm0, %v11666_v27, 0  ;;  %v11711_v27 = vld [vmem:[%s16928_s1 + $0xc50] ss:$12 sps:$4 sm:$0xff]  }
 0x28b   :  { %7611 = vmatpush2.bf16.xpose.msra.mxu0 %v11605_v32  ;;  %v11670_v32 = vld [vmem:[%s16928_s1 + $0xb90] ss:$12 sps:$4 sm:$0xff]  }
 0x28c   :  { %7612 = vmatprep.subr.bf16.mxu0 %v11613_v33  ;;  %v11662_v33 = vld [vmem:[%s16928_s1 + $0xba0] ss:$12 sps:$4 sm:$0xff]  }
 0x28d   :  { %7681 = vmatpush1.bf16.xpose.msra.mxu1 %v11608_v37  ;;  %v11669_v37 = vld [vmem:[%s16928_s1 + $0xb8c] ss:$12 sps:$4 sm:$0xff]  }
 0x28e   :  { %7682 = vmatprep.subr.bf16.mxu1 %v11616_v40  ;;  %v11671_v40 = vld [vmem:[%s16928_s1 + $0xad0] ss:$12 sps:$4 sm:$0xff]  }
 0x293   :  { %7613 = vmatpush2.bf16.xpose.msra.mxu0 %v11611_v49  ;;  %v6462_v49 = vsel %vm6112_vm0, %v11671_v40, 0  ;;  %v11716_v40 = vld [vmem:[%s16928_s1 + $0xc38] ss:$12 sps:$4 sm:$0xff]  }
 0x294   :  { %7614 = vmatprep.subr.bf16.mxu0 %v11619_v59  ;;  %v11675_v59 = vld [vmem:[%s16928_s1 + $0xb78] ss:$12 sps:$4 sm:$0xff]  }
 0x295   :  { %7683 = vmatpush1.bf16.xpose.msra.mxu1 %v11614_v41  ;;  %v11667_v41 = vld [vmem:[%s16928_s1 + $0xb88] ss:$12 sps:$4 sm:$0xff]  }
 0x296   :  { %7684 = vmatprep.subr.bf16.mxu1 %v11622_v42  ;;  %v11674_v42 = vld [vmem:[%s16928_s1 + $0xb74] ss:$12 sps:$4 sm:$0xff]  }
 0x29b   :  { %7615 = vmatpush2.bf16.xpose.msra.mxu0 %v11617_v45  ;;  %v11676_v45 = vld [vmem:[%s16928_s1 + $0xab8] ss:$12 sps:$4 sm:$0xff]  }
 0x29c   :  { %7616 = vmatprep.subr.bf16.mxu0 %v11625_v46  ;;  %v6459_v46 = vsel %vm6112_vm0, %v11676_v45, 0  ;;  %v11721_v45 = vld [vmem:[%s16928_s1 + $0xc20] ss:$12 sps:$4 sm:$0xff]  }
 0x29d   :  { %7685 = vmatpush1.bf16.xpose.msra.mxu1 %v11620_v47  ;;  %v11680_v47 = vld [vmem:[%s16928_s1 + $0xb60] ss:$12 sps:$4 sm:$0xff]  }
 0x29e   :  { %7686 = vmatprep.subr.bf16.mxu1 %v11628_v50  ;;  %v11672_v50 = vld [vmem:[%s16928_s1 + $0xb70] ss:$12 sps:$4 sm:$0xff]  }
 0x2a3   :  { %7617 = vmatpush2.bf16.xpose.msra.mxu0 %v11623_v51  ;;  %v11679_v51 = vld [vmem:[%s16928_s1 + $0xb5c] ss:$12 sps:$4 sm:$0xff]  }
 0x2a4   :  { %7618 = vmatprep.subr.bf16.mxu0 %v11631_v52  ;;  %v11681_v52 = vld [vmem:[%s16928_s1 + $0xaa0] ss:$12 sps:$4 sm:$0xff]  }
 0x2a5   :  { %7687 = vmatpush1.bf16.xpose.msra.mxu1 %v11626_v53  ;;  %v6456_v53 = vsel %vm6112_vm0, %v11681_v52, 0  ;;  %v11726_v52 = vld [vmem:[%s16928_s1 + $0xc08] ss:$12 sps:$4 sm:$0xff]  }
 0x2a6   :  { %7688 = vmatprep.subr.bf16.mxu1 %v11634_v54  ;;  %v11685_v54 = vld [vmem:[%s16928_s1 + $0xb48] ss:$12 sps:$4 sm:$0xff]  }
 0x2ab   :  { %7619 = vmatpush2.bf16.xpose.msra.mxu0 %v11629_v55  ;;  %v11677_v55 = vld [vmem:[%s16928_s1 + $0xb58] ss:$12 sps:$4 sm:$0xff]  }
 0x2ac   :  { %7620 = vmatprep.subr.bf16.mxu0 %v11637_v56  ;;  %v11684_v56 = vld [vmem:[%s16928_s1 + $0xb44] ss:$12 sps:$4 sm:$0xff]  }
 0x2ad   :  { %7689 = vmatpush1.bf16.xpose.msra.mxu1 %v11632_v58  ;;  %v11686_v58 = vld [vmem:[%s16928_s1 + $0xa88] ss:$12 sps:$4 sm:$0xff]  }
 0x2ae   :  { %7690 = vmatprep.subr.bf16.mxu1 %v11640_v60  ;;  %v6453_v60 = vsel %vm6112_vm0, %v11686_v58, 0  ;;  %v11727_v58 = vld [vmem:[%s16928_s1 + $0xd68] ss:$12 sps:$4 sm:$0xff]  }
 0x2b3   :  { %7621 = vmatpush2.bf16.xpose.msra.mxu0 %v11635_v61  ;;  %v11689_v61 = vld [vmem:[%s16928_s1 + $0xcac] ss:$12 sps:$4 sm:$0xff]  }
 0x2b4   :  { %7622 = vmatprep.subr.bf16.mxu0 %v11643_v36  ;;  %v11682_v36 = vld [vmem:[%s16928_s1 + $0xb40] ss:$12 sps:$4 sm:$0xff]  }
 0x2b5   :  { %7691 = vmatpush1.bf16.xpose.msra.mxu1 %v11638_v62  ;;  %v11690_v62 = vld [vmem:[%s16928_s1 + $0xd70] ss:$12 sps:$4 sm:$0xff]  }
 0x2b6   :  { %7692 = vmatprep.subr.bf16.mxu1 %v11646_v63  ;;  %v11691_v63 = vld [vmem:[%s16928_s1 + $0xcb0] ss:$12 sps:$4 sm:$0xff]  }
 0x2bb   :  { %7623 = vmatpush2.bf16.xpose.msra.mxu0 %v11641_v1  ;;  %v11687_v1 = vld [vmem:[%s16928_s1 + $0xca8] ss:$12 sps:$4 sm:$0xff]  }
 0x2bc   :  { %11064 = vmatprep.subr.msk.bf16.mxu0 %vm6112_vm0, %v11650_v35  ;;  %v11694_v35 = vld [vmem:[%s16928_s1 + $0xc94] ss:$12 sps:$4 sm:$0xff]  }
 0x2bd   :  { %7693 = vmatpush1.bf16.xpose.msra.mxu1 %v11644_v2  ;;  %v6522_v2 = vsel %vm6112_vm0, %v11691_v63, 0  ;;  %v11741_v63 = vld [vmem:[%s16928_s1 + $0xd3c] ss:$12 sps:$4 sm:$0xff]  }
 0x2be   :  { %7694 = vmatprep.subr.bf16.mxu1 %v11649_v3  ;;  %v11695_v3 = vld [vmem:[%s16928_s1 + $0xd58] ss:$12 sps:$4 sm:$0xff]  }
 0x2c2   :  { %7625 = vmatmul.mubr.bf16.vlgmr.msra.gmra.mxu0 %v13628_v28 }
 0x2c3   :  { %10775 = vmatpush3.bf16.xpose.msra.mxu0 %v6474_v7  ;;  %10790 = vmatprep.mubr.msk.bf16.mxu0 %vm6112_vm0, %v13755_v22  ;;  %v11696_v7 = vld [vmem:[%s16928_s1 + $0xc98] ss:$12 sps:$4 sm:$0xff]  }
 0x2c4   :  { %11065 = vmatprep.subr.msk.bf16.mxu0 %vm6112_vm0, %v11655_v8  ;;  %v11692_v8 = vld [vmem:[%s16928_s1 + $0xc90] ss:$12 sps:$4 sm:$0xff]  }
 0x2c5   :  { %7695 = vmatpush2.bf16.xpose.msra.mxu1 %v11647_v10  ;;  %v11699_v10 = vld [vmem:[%s16928_s1 + $0xc7c] ss:$12 sps:$4 sm:$0xff]  }
 0x2c6   :  { %7696 = vmatprep.subr.bf16.mxu1 %v11654_v11  ;;  %v11700_v11 = vld [vmem:[%s16928_s1 + $0xd40] ss:$12 sps:$4 sm:$0xff]  }
 0x2cb   :  { %10777 = vmatpush3.bf16.xpose.msra.mxu0 %v6471_v14  ;;  %v11697_v14 = vld [vmem:[%s16928_s1 + $0xc78] ss:$12 sps:$4 sm:$0xff]  }
 0x2cc   :  { %11066 = vmatprep.subr.msk.bf16.mxu0 %vm6112_vm0, %v11660_v15  ;;  %v11704_v15 = vld [vmem:[%s16928_s1 + $0xc64] ss:$12 sps:$4 sm:$0xff]  }
 0x2cd   :  { %7697 = vmatpush2.bf16.xpose.msra.mxu1 %v11652_v17  ;;  %v6516_v17 = vsel %vm6112_vm0, %v11701_v12, 0  ;;  %v11756_v12 = vld [vmem:[%s16928_s1 + $0xdcc] ss:$12 sps:$4 sm:$0xff]  }
 0x2ce   :  { %7698 = vmatprep.subr.bf16.mxu1 %v11659_v57  ;;  %v11705_v57 = vld [vmem:[%s16928_s1 + $0xd28] ss:$12 sps:$4 sm:$0xff]  }
 0x2d3   :  { %10779 = vmatpush3.bf16.xpose.msra.mxu0 %v6468_v21  ;;  %v11702_v21 = vld [vmem:[%s16928_s1 + $0xc60] ss:$12 sps:$4 sm:$0xff]  }
 0x2d4   :  { %11067 = vmatprep.subr.msk.bf16.mxu0 %vm6112_vm0, %v11665_v23  ;;  %v11709_v23 = vld [vmem:[%s16928_s1 + $0xc4c] ss:$12 sps:$4 sm:$0xff]  }
 0x2d5   :  { %7699 = vmatpush2.bf16.xpose.msra.mxu1 %v11657_v25  ;;  %v6513_v25 = vsel %vm6112_vm0, %v11706_v19, 0  ;;  %v11757_v19 = vld [vmem:[%s16928_s1 + $0xcf0] ss:$12 sps:$4 sm:$0xff]  }
 0x2d6   :  { %7700 = vmatprep.subr.bf16.mxu1 %v11664_v26  ;;  %v11710_v26 = vld [vmem:[%s16928_s1 + $0xd10] ss:$12 sps:$4 sm:$0xff]  }
 0x2db   :  { %10781 = vmatpush3.bf16.xpose.msra.mxu0 %v6465_v29  ;;  %v11707_v29 = vld [vmem:[%s16928_s1 + $0xc48] ss:$12 sps:$4 sm:$0xff]  }
 0x2dc   :  { %11068 = vmatprep.subr.msk.bf16.mxu0 %vm6112_vm0, %v11670_v32  ;;  %v11714_v32 = vld [vmem:[%s16928_s1 + $0xc34] ss:$12 sps:$4 sm:$0xff]  }
 0x2dd   :  { %7701 = vmatpush2.bf16.xpose.msra.mxu1 %v11662_v33  ;;  %v6510_v33 = vsel %vm6112_vm0, %v11711_v27, 0  ;;  %v11771_v27 = vld [vmem:[%s16928_s1 + $0xcc4] ss:$12 sps:$4 sm:$0xff]  }
 0x2de   :  { %7702 = vmatprep.subr.bf16.mxu1 %v11669_v37  ;;  %v11715_v37 = vld [vmem:[%s16928_s1 + $0xcf8] ss:$12 sps:$4 sm:$0xff]  }
 0x2e3   :  { %10783 = vmatpush3.bf16.xpose.msra.mxu0 %v6462_v49  ;;  %v11712_v49 = vld [vmem:[%s16928_s1 + $0xc30] ss:$12 sps:$4 sm:$0xff]  }
 0x2e4   :  { %11069 = vmatprep.subr.msk.bf16.mxu0 %vm6112_vm0, %v11675_v59  ;;  %v11719_v59 = vld [vmem:[%s16928_s1 + $0xc1c] ss:$12 sps:$4 sm:$0xff]  }
 0x2e5   :  { %7703 = vmatpush2.bf16.xpose.msra.mxu1 %v11667_v41  ;;  %v6507_v41 = vsel %vm6112_vm0, %v11716_v40, 0  ;;  %v11772_v40 = vld [vmem:[%s16928_s1 + $0xd80] ss:$12 sps:$4 sm:$0xff]  }
 0x2e6   :  { %7704 = vmatprep.subr.bf16.mxu1 %v11674_v42  ;;  %v11720_v42 = vld [vmem:[%s16928_s1 + $0xce0] ss:$12 sps:$4 sm:$0xff]  }
 0x2eb   :  { %10785 = vmatpush3.bf16.xpose.msra.mxu0 %v6459_v46  ;;  %v11717_v46 = vld [vmem:[%s16928_s1 + $0xc18] ss:$12 sps:$4 sm:$0xff]  }
 0x2ec   :  { %11070 = vmatprep.subr.msk.bf16.mxu0 %vm6112_vm0, %v11680_v47  ;;  %v11724_v47 = vld [vmem:[%s16928_s1 + $0xc04] ss:$12 sps:$4 sm:$0xff]  }
 0x2ed   :  { %7705 = vmatpush2.bf16.xpose.msra.mxu1 %v11672_v50  ;;  %v6504_v50 = vsel %vm6112_vm0, %v11721_v45, 0  ;;  %v11775_v45 = vld [vmem:[%s16928_s1 + $0xee8] ss:$12 sps:$4 sm:$0xff]  }
 0x2ee   :  { %7706 = vmatprep.subr.bf16.mxu1 %v11679_v51  ;;  %v11725_v51 = vld [vmem:[%s16928_s1 + $0xcc8] ss:$12 sps:$4 sm:$0xff]  }
 0x2f3   :  { %10787 = vmatpush3.bf16.xpose.msra.mxu0 %v6456_v53  ;;  %v11722_v53 = vld [vmem:[%s16928_s1 + $0xc00] ss:$12 sps:$4 sm:$0xff]  }
 0x2f4   :  { %11071 = vmatprep.subr.msk.bf16.mxu0 %vm6112_vm0, %v11685_v54  ;;  %v11729_v54 = vld [vmem:[%s16928_s1 + $0xd6c] ss:$12 sps:$4 sm:$0xff]  }
 0x2f5   :  { %7707 = vmatpush2.bf16.xpose.msra.mxu1 %v11677_v55  ;;  %v6501_v55 = vsel %vm6112_vm0, %v11726_v52, 0  ;;  %v11788_v52 = vld [vmem:[%s16928_s1 + $0xec0] ss:$12 sps:$4 sm:$0xff]  }
 0x2f6   :  { %7708 = vmatprep.subr.bf16.mxu1 %v11684_v56  ;;  %v11732_v56 = vld [vmem:[%s16928_s1 + $0xe2c] ss:$12 sps:$4 sm:$0xff]  }
 0x2fb   :  { %10789 = vmatpush3.bf16.xpose.msra.mxu0 %v6453_v60  ;;  %v11735_v60 = vld [vmem:[%s16928_s1 + $0xd54] ss:$12 sps:$4 sm:$0xff]  }
 0x2fc   :  { %7764 = vmatprep.subr.bf16.mxu0 %v11689_v61  ;;  %v11730_v61 = vld [vmem:[%s16928_s1 + $0xe28] ss:$12 sps:$4 sm:$0xff]  }
 0x2fd   :  { %7709 = vmatpush2.bf16.xpose.msra.mxu1 %v11682_v36  ;;  %v11738_v36 = vld [vmem:[%s16928_s1 + $0xe14] ss:$12 sps:$4 sm:$0xff]  }
 0x2fe   :  { %11072 = vmatprep.subr.msk.bf16.mxu1 %vm6112_vm0, %v11690_v62  ;;  %v11733_v62 = vld [vmem:[%s16928_s1 + $0xd50] ss:$12 sps:$4 sm:$0xff]  }
 0x302   :  { %10791 = vmatmul.mubr.msk.bf16.vlgmr.msra.gmra.mxu0 %vm6112_vm0, %v13755_v22 }
 0x303   :  { %7765 = vmatpush1.bf16.xpose.msra.mxu0 %v11687_v1  ;;  %7796 = vmatprep.mubr.bf16.mxu0 %v14106_v5  ;;  %v11736_v1 = vld [vmem:[%s16928_s1 + $0xe10] ss:$12 sps:$4 sm:$0xff]  }
 0x304   :  { %7711 = vmatmul.mubr.bf16.vlgmr.msra.gmra.mxu1 %v13628_v28  ;;  %7766 = vmatprep.subr.bf16.mxu0 %v11694_v35  ;;  %v6519_v28 = vsel %vm6112_vm0, %v11696_v7, 0  ;;  %v11744_v35 = vld [vmem:[%s16928_s1 + $0xdfc] ss:$12 sps:$4 sm:$0xff]   ;;  %v11742_v7 = vld [vmem:[%s16928_s1 + $0xdf8] ss:$12 sps:$4 sm:$0xff]  }
 0x305   :  { %10793 = vmatpush3.bf16.xpose.msra.mxu1 %v6522_v2  ;;  %10808 = vmatprep.mubr.msk.bf16.mxu1 %vm6112_vm0, %v13755_v22  ;;  %v11739_v2 = vld [vmem:[%s16928_s1 + $0xd38] ss:$12 sps:$4 sm:$0xff]  }
 0x306   :  { %11073 = vmatprep.subr.msk.bf16.mxu1 %vm6112_vm0, %v11695_v3  ;;  %v11747_v3 = vld [vmem:[%s16928_s1 + $0xd24] ss:$12 sps:$4 sm:$0xff]  }
 0x30b   :  { %7767 = vmatpush1.bf16.xpose.msra.mxu0 %v11692_v8  ;;  %v11750_v8 = vld [vmem:[%s16928_s1 + $0xde4] ss:$12 sps:$4 sm:$0xff]  }
 0x30c   :  { %7768 = vmatprep.subr.bf16.mxu0 %v11699_v10  ;;  %v11745_v10 = vld [vmem:[%s16928_s1 + $0xd20] ss:$12 sps:$4 sm:$0xff]  }
 0x30d   :  { %10795 = vmatpush3.bf16.xpose.msra.mxu1 %v6519_v28  ;;  %v11753_v28 = vld [vmem:[%s16928_s1 + $0xd0c] ss:$12 sps:$4 sm:$0xff]  }
 0x30e   :  { %11074 = vmatprep.subr.msk.bf16.mxu1 %vm6112_vm0, %v11700_v11  ;;  %v11748_v11 = vld [vmem:[%s16928_s1 + $0xde0] ss:$12 sps:$4 sm:$0xff]  }
 0x313   :  { %7769 = vmatpush1.bf16.xpose.msra.mxu0 %v11697_v14  ;;  %v11751_v14 = vld [vmem:[%s16928_s1 + $0xd08] ss:$12 sps:$4 sm:$0xff]  }
 0x314   :  { %7770 = vmatprep.subr.bf16.mxu0 %v11704_v15  ;;  %v11759_v15 = vld [vmem:[%s16928_s1 + $0xcf4] ss:$12 sps:$4 sm:$0xff]  }
 0x315   :  { %10797 = vmatpush3.bf16.xpose.msra.mxu1 %v6516_v17  ;;  %v11754_v17 = vld [vmem:[%s16928_s1 + $0xdc8] ss:$12 sps:$4 sm:$0xff]  }
 0x316   :  { %11075 = vmatprep.subr.msk.bf16.mxu1 %vm6112_vm0, %v11705_v57  ;;  %v11762_v57 = vld [vmem:[%s16928_s1 + $0xdb4] ss:$12 sps:$4 sm:$0xff]  }
 0x31b   :  { %7771 = vmatpush1.bf16.xpose.msra.mxu0 %v11702_v21  ;;  %v11765_v21 = vld [vmem:[%s16928_s1 + $0xcdc] ss:$12 sps:$4 sm:$0xff]  }
 0x31c   :  { %7772 = vmatprep.subr.bf16.mxu0 %v11709_v23  ;;  %v11760_v23 = vld [vmem:[%s16928_s1 + $0xdb0] ss:$12 sps:$4 sm:$0xff]  }
 0x31d   :  { %10799 = vmatpush3.bf16.xpose.msra.mxu1 %v6513_v25  ;;  %v11768_v25 = vld [vmem:[%s16928_s1 + $0xd9c] ss:$12 sps:$4 sm:$0xff]  }
 0x31e   :  { %11076 = vmatprep.subr.msk.bf16.mxu1 %vm6112_vm0, %v11710_v26  ;;  %v11763_v26 = vld [vmem:[%s16928_s1 + $0xcd8] ss:$12 sps:$4 sm:$0xff]  }
 0x323   :  { %7773 = vmatpush1.bf16.xpose.msra.mxu0 %v11707_v29  ;;  %v11766_v29 = vld [vmem:[%s16928_s1 + $0xd98] ss:$12 sps:$4 sm:$0xff]  }
 0x324   :  { %7774 = vmatprep.subr.bf16.mxu0 %v11714_v32  ;;  %v11774_v32 = vld [vmem:[%s16928_s1 + $0xd84] ss:$12 sps:$4 sm:$0xff]  }
 0x325   :  { %10801 = vmatpush3.bf16.xpose.msra.mxu1 %v6510_v33  ;;  %v11769_v33 = vld [vmem:[%s16928_s1 + $0xcc0] ss:$12 sps:$4 sm:$0xff]  }
 0x326   :  { %11077 = vmatprep.subr.msk.bf16.mxu1 %vm6112_vm0, %v11715_v37  ;;  %v11778_v37 = vld [vmem:[%s16928_s1 + $0xef0] ss:$12 sps:$4 sm:$0xff]  }
 0x32b   :  { %7775 = vmatpush1.bf16.xpose.msra.mxu0 %v11712_v49  ;;  %v11777_v49 = vld [vmem:[%s16928_s1 + $0xeec] ss:$12 sps:$4 sm:$0xff]  }
 0x32c   :  { %7776 = vmatprep.subr.bf16.mxu0 %v11719_v59  ;;  %v11779_v59 = vld [vmem:[%s16928_s1 + $0xe30] ss:$12 sps:$4 sm:$0xff]  }
 0x32d   :  { %10803 = vmatpush3.bf16.xpose.msra.mxu1 %v6507_v41  ;;  %v6570_v41 = vsel %vm6112_vm0, %v11779_v59, 0  ;;  %v11823_v59 = vld [vmem:[%s16928_s1 + $0x1058] ss:$12 sps:$4 sm:$0xff]  }
 0x32e   :  { %11078 = vmatprep.subr.msk.bf16.mxu1 %vm6112_vm0, %v11720_v42  ;;  %v11783_v42 = vld [vmem:[%s16928_s1 + $0xed8] ss:$12 sps:$4 sm:$0xff]  }
 0x333   :  { %7777 = vmatpush1.bf16.xpose.msra.mxu0 %v11717_v46  ;;  %v14323_v46 = vld [vmem:[%s16927_s0] ss:$12 sps:$4 sm:$0xff]  }
 0x334   :  { %7778 = vmatprep.subr.bf16.mxu0 %v11724_v47  ;;  %v11782_v47 = vld [vmem:[%s16928_s1 + $0xed4] ss:$12 sps:$4 sm:$0xff]  }
 0x335   :  { %10805 = vmatpush3.bf16.xpose.msra.mxu1 %v6504_v50  ;;  %v11784_v50 = vld [vmem:[%s16928_s1 + $0xe18] ss:$12 sps:$4 sm:$0xff]  }
 0x336   :  { %11079 = vmatprep.subr.msk.bf16.mxu1 %vm6112_vm0, %v11725_v51  ;;  %v6567_v51 = vsel %vm6112_vm0, %v11784_v50, 0  ;;  %v11829_v50 = vld [vmem:[%s16928_s1 + $0xf80] ss:$12 sps:$4 sm:$0xff]  }
 0x33b   :  { %7779 = vmatpush1.bf16.xpose.msra.mxu0 %v11722_v53  ;;  %v11780_v53 = vld [vmem:[%s16928_s1 + $0xed0] ss:$12 sps:$4 sm:$0xff]  }
 0x33c   :  { %7780 = vmatprep.subr.bf16.mxu0 %v11729_v54  ;;  %v11787_v54 = vld [vmem:[%s16928_s1 + $0xebc] ss:$12 sps:$4 sm:$0xff]  }
 0x33d   :  { %10807 = vmatpush3.bf16.xpose.msra.mxu1 %v6501_v55  ;;  %v11789_v55 = vld [vmem:[%s16928_s1 + $0xe00] ss:$12 sps:$4 sm:$0xff]  }
 0x33e   :  { %7850 = vmatprep.subr.bf16.mxu1 %v11732_v56  ;;  %v6564_v56 = vsel %vm6112_vm0, %v11789_v55, 0  ;;  %v11834_v55 = vld [vmem:[%s16928_s1 + $0xf68] ss:$12 sps:$4 sm:$0xff]  }
 0x343   :  { %7781 = vmatpush2.bf16.xpose.msra.mxu0 %v11727_v58  ;;  %v11793_v58 = vld [vmem:[%s16928_s1 + $0xea8] ss:$12 sps:$4 sm:$0xff]  }
 0x344   :  { %10809 = vmatmul.mubr.msk.bf16.vlgmr.msra.gmra.mxu1 %vm6112_vm0, %v13755_v22  ;;  %7782 = vmatprep.subr.bf16.mxu0 %v11735_v60  ;;  %v11785_v60 = vld [vmem:[%s16928_s1 + $0xeb8] ss:$12 sps:$4 sm:$0xff]  }
 0x345   :  { %7851 = vmatpush1.bf16.xpose.msra.mxu1 %v11730_v61  ;;  %7882 = vmatprep.mubr.bf16.mxu1 %v14106_v5  ;;  %v11792_v61 = vld [vmem:[%s16928_s1 + $0xea4] ss:$12 sps:$4 sm:$0xff]  }
 0x346   :  { %7852 = vmatprep.subr.bf16.mxu1 %v11738_v36  ;;  %v11794_v36 = vld [vmem:[%s16928_s1 + $0xde8] ss:$12 sps:$4 sm:$0xff]  }
 0x34b   :  { %7783 = vmatpush2.bf16.xpose.msra.mxu0 %v11733_v62  ;;  %v6561_v62 = vsel %vm6112_vm0, %v11794_v36, 0  ;;  %v11839_v36 = vld [vmem:[%s16928_s1 + $0xf50] ss:$12 sps:$4 sm:$0xff]  }
 0x34c   :  { %7784 = vmatprep.subr.bf16.mxu0 %v11741_v63  ;;  %v11798_v63 = vld [vmem:[%s16928_s1 + $0xe90] ss:$12 sps:$4 sm:$0xff]  }
 0x34d   :  { %7853 = vmatpush1.bf16.xpose.msra.mxu1 %v11736_v1  ;;  %v11790_v1 = vld [vmem:[%s16928_s1 + $0xea0] ss:$12 sps:$4 sm:$0xff]  }
 0x34e   :  { %7854 = vmatprep.subr.bf16.mxu1 %v11744_v35  ;;  %v11797_v35 = vld [vmem:[%s16928_s1 + $0xe8c] ss:$12 sps:$4 sm:$0xff]  }
 0x353   :  { %7785 = vmatpush2.bf16.xpose.msra.mxu0 %v11739_v2  ;;  %v11799_v2 = vld [vmem:[%s16928_s1 + $0xdd0] ss:$12 sps:$4 sm:$0xff]  }
 0x354   :  { %7786 = vmatprep.subr.bf16.mxu0 %v11747_v3  ;;  %v6558_v3 = vsel %vm6112_vm0, %v11799_v2, 0  ;;  %v11844_v2 = vld [vmem:[%s16928_s1 + $0xf38] ss:$12 sps:$4 sm:$0xff]  }
 0x355   :  { %7855 = vmatpush1.bf16.xpose.msra.mxu1 %v11742_v7  ;;  %v11803_v7 = vld [vmem:[%s16928_s1 + $0xe78] ss:$12 sps:$4 sm:$0xff]  }
 0x356   :  { %7856 = vmatprep.subr.bf16.mxu1 %v11750_v8  ;;  %v11795_v8 = vld [vmem:[%s16928_s1 + $0xe88] ss:$12 sps:$4 sm:$0xff]  }
 0x35b   :  { %7787 = vmatpush2.bf16.xpose.msra.mxu0 %v11745_v10  ;;  %v11802_v10 = vld [vmem:[%s16928_s1 + $0xe74] ss:$12 sps:$4 sm:$0xff]  }
 0x35c   :  { %7788 = vmatprep.subr.bf16.mxu0 %v11753_v28  ;;  %v11804_v28 = vld [vmem:[%s16928_s1 + $0xdb8] ss:$12 sps:$4 sm:$0xff]  }
 0x35d   :  { %7857 = vmatpush1.bf16.xpose.msra.mxu1 %v11748_v11  ;;  %v6555_v11 = vsel %vm6112_vm0, %v11804_v28, 0  ;;  %v11849_v28 = vld [vmem:[%s16928_s1 + $0xf20] ss:$12 sps:$4 sm:$0xff]  }
 0x35e   :  { %7858 = vmatprep.subr.bf16.mxu1 %v11756_v12  ;;  %v11808_v12 = vld [vmem:[%s16928_s1 + $0xe60] ss:$12 sps:$4 sm:$0xff]  }
 0x363   :  { %7789 = vmatpush2.bf16.xpose.msra.mxu0 %v11751_v14  ;;  %v11800_v14 = vld [vmem:[%s16928_s1 + $0xe70] ss:$12 sps:$4 sm:$0xff]  }
 0x364   :  { %7790 = vmatprep.subr.bf16.mxu0 %v11759_v15  ;;  %v11807_v15 = vld [vmem:[%s16928_s1 + $0xe5c] ss:$12 sps:$4 sm:$0xff]  }
 0x365   :  { %7859 = vmatpush1.bf16.xpose.msra.mxu1 %v11754_v17  ;;  %v11809_v17 = vld [vmem:[%s16928_s1 + $0xda0] ss:$12 sps:$4 sm:$0xff]  }
 0x366   :  { %7860 = vmatprep.subr.bf16.mxu1 %v11762_v57  ;;  %v6552_v57 = vsel %vm6112_vm0, %v11809_v17, 0  ;;  %v11854_v17 = vld [vmem:[%s16928_s1 + $0xf08] ss:$12 sps:$4 sm:$0xff]  }
 0x36b   :  { %7791 = vmatpush2.bf16.xpose.msra.mxu0 %v11757_v19  ;;  %v11813_v19 = vld [vmem:[%s16928_s1 + $0xe48] ss:$12 sps:$4 sm:$0xff]  }
 0x36c   :  { %7792 = vmatprep.subr.bf16.mxu0 %v11765_v21  ;;  %v11805_v21 = vld [vmem:[%s16928_s1 + $0xe58] ss:$12 sps:$4 sm:$0xff]  }
 0x36d   :  { %7861 = vmatpush1.bf16.xpose.msra.mxu1 %v11760_v23  ;;  %v11812_v23 = vld [vmem:[%s16928_s1 + $0xe44] ss:$12 sps:$4 sm:$0xff]  }
 0x36e   :  { %7862 = vmatprep.subr.bf16.mxu1 %v11768_v25  ;;  %v11814_v25 = vld [vmem:[%s16928_s1 + $0xd88] ss:$12 sps:$4 sm:$0xff]  }
 0x373   :  { %7793 = vmatpush2.bf16.xpose.msra.mxu0 %v11763_v26  ;;  %v6549_v26 = vsel %vm6112_vm0, %v11814_v25, 0  ;;  %v11855_v25 = vld [vmem:[%s16928_s1 + $0x1068] ss:$12 sps:$4 sm:$0xff]  }
 0x374   :  { %7794 = vmatprep.subr.bf16.mxu0 %v11771_v27  ;;  %v11817_v27 = vld [vmem:[%s16928_s1 + $0xfac] ss:$12 sps:$4 sm:$0xff]  }
 0x375   :  { %7863 = vmatpush1.bf16.xpose.msra.mxu1 %v11766_v29  ;;  %v11810_v29 = vld [vmem:[%s16928_s1 + $0xe40] ss:$12 sps:$4 sm:$0xff]  }
 0x376   :  { %7864 = vmatprep.subr.bf16.mxu1 %v11774_v32  ;;  %v11818_v32 = vld [vmem:[%s16928_s1 + $0x1070] ss:$12 sps:$4 sm:$0xff]  }
 0x37b   :  { %7795 = vmatpush2.bf16.xpose.msra.mxu0 %v11769_v33  ;;  %v11819_v33 = vld [vmem:[%s16928_s1 + $0xfb0] ss:$12 sps:$4 sm:$0xff]  }
 0x37c   :  { %11080 = vmatprep.subr.msk.bf16.mxu0 %vm6112_vm0, %v11778_v37  ;;  %v11815_v37 = vld [vmem:[%s16928_s1 + $0xfa8] ss:$12 sps:$4 sm:$0xff]  }
 0x37d   :  { %7865 = vmatpush1.bf16.xpose.msra.mxu1 %v11772_v40  ;;  %v11822_v40 = vld [vmem:[%s16928_s1 + $0xf94] ss:$12 sps:$4 sm:$0xff]  }
 0x37e   :  { %7866 = vmatprep.subr.bf16.mxu1 %v11777_v49  ;;  %v6618_v49 = vsel %vm6112_vm0, %v11819_v33, 0  ;;  %v11861_v33 = vld [vmem:[%s16928_s1 + $0x1050] ss:$12 sps:$4 sm:$0xff]  }
 0x382   :  { %7797 = vmatmul.mubr.bf16.vlgmr.msra.gmra.mxu0 %v14323_v46 }
 0x383   :  { %10811 = vmatpush3.bf16.xpose.msra.mxu0 %v6570_v41  ;;  %10826 = vmatprep.mubr.msk.bf16.mxu0 %vm6112_vm0, %v13755_v22  ;;  %v11824_v41 = vld [vmem:[%s16928_s1 + $0xf98] ss:$12 sps:$4 sm:$0xff]  }
 0x384   :  { %11081 = vmatprep.subr.msk.bf16.mxu0 %vm6112_vm0, %v11783_v42  ;;  %v11820_v42 = vld [vmem:[%s16928_s1 + $0xf90] ss:$12 sps:$4 sm:$0xff]  }
 0x385   :  { %7867 = vmatpush2.bf16.xpose.msra.mxu1 %v11775_v45  ;;  %v11827_v45 = vld [vmem:[%s16928_s1 + $0xf7c] ss:$12 sps:$4 sm:$0xff]  }
 0x386   :  { %7868 = vmatprep.subr.bf16.mxu1 %v11782_v47  ;;  %v6615_v47 = vsel %vm6112_vm0, %v11824_v41, 0  ;;  %v11875_v41 = vld [vmem:[%s16928_s1 + $0x1024] ss:$12 sps:$4 sm:$0xff]  }
 0x38b   :  { %10813 = vmatpush3.bf16.xpose.msra.mxu0 %v6567_v51  ;;  %v11825_v51 = vld [vmem:[%s16928_s1 + $0xf78] ss:$12 sps:$4 sm:$0xff]  }
 0x38c   :  { %11082 = vmatprep.subr.msk.bf16.mxu0 %vm6112_vm0, %v11788_v52  ;;  %v11832_v52 = vld [vmem:[%s16928_s1 + $0xf64] ss:$12 sps:$4 sm:$0xff]  }
 0x38d   :  { %7869 = vmatpush2.bf16.xpose.msra.mxu1 %v11780_v53  ;;  %v6612_v53 = vsel %vm6112_vm0, %v11829_v50, 0  ;;  %v11876_v50 = vld [vmem:[%s16928_s1 + $0x10e0] ss:$12 sps:$4 sm:$0xff]  }
 0x38e   :  { %7870 = vmatprep.subr.bf16.mxu1 %v11787_v54  ;;  %v11833_v54 = vld [vmem:[%s16928_s1 + $0x1028] ss:$12 sps:$4 sm:$0xff]  }
 0x393   :  { %10815 = vmatpush3.bf16.xpose.msra.mxu0 %v6564_v56  ;;  %v11830_v56 = vld [vmem:[%s16928_s1 + $0xf60] ss:$12 sps:$4 sm:$0xff]  }
 0x394   :  { %11083 = vmatprep.subr.msk.bf16.mxu0 %vm6112_vm0, %v11793_v58  ;;  %v11837_v58 = vld [vmem:[%s16928_s1 + $0xf4c] ss:$12 sps:$4 sm:$0xff]  }
 0x395   :  { %7871 = vmatpush2.bf16.xpose.msra.mxu1 %v11785_v60  ;;  %v6609_v60 = vsel %vm6112_vm0, %v11834_v55, 0  ;;  %v11890_v55 = vld [vmem:[%s16928_s1 + $0x10b4] ss:$12 sps:$4 sm:$0xff]  }
 0x396   :  { %7872 = vmatprep.subr.bf16.mxu1 %v11792_v61  ;;  %v11838_v61 = vld [vmem:[%s16928_s1 + $0x1010] ss:$12 sps:$4 sm:$0xff]  }
 0x39b   :  { %10817 = vmatpush3.bf16.xpose.msra.mxu0 %v6561_v62  ;;  %v11835_v62 = vld [vmem:[%s16928_s1 + $0xf48] ss:$12 sps:$4 sm:$0xff]  }
 0x39c   :  { %11084 = vmatprep.subr.msk.bf16.mxu0 %vm6112_vm0, %v11798_v63  ;;  %v11842_v63 = vld [vmem:[%s16928_s1 + $0xf34] ss:$12 sps:$4 sm:$0xff]  }
 0x39d   :  { %7873 = vmatpush2.bf16.xpose.msra.mxu1 %v11790_v1  ;;  %v6606_v1 = vsel %vm6112_vm0, %v11839_v36, 0  ;;  %v11891_v36 = vld [vmem:[%s16928_s1 + $0xfd8] ss:$12 sps:$4 sm:$0xff]  }
 0x39e   :  { %7874 = vmatprep.subr.bf16.mxu1 %v11797_v35  ;;  %v11843_v35 = vld [vmem:[%s16928_s1 + $0xff8] ss:$12 sps:$4 sm:$0xff]  }
 0x3a3   :  { %10819 = vmatpush3.bf16.xpose.msra.mxu0 %v6558_v3  ;;  %v11840_v3 = vld [vmem:[%s16928_s1 + $0xf30] ss:$12 sps:$4 sm:$0xff]  }
 0x3a4   :  { %11085 = vmatprep.subr.msk.bf16.mxu0 %vm6112_vm0, %v11803_v7  ;;  %v11847_v7 = vld [vmem:[%s16928_s1 + $0xf1c] ss:$12 sps:$4 sm:$0xff]  }
 0x3a5   :  { %7875 = vmatpush2.bf16.xpose.msra.mxu1 %v11795_v8  ;;  %v6603_v8 = vsel %vm6112_vm0, %v11844_v2, 0  ;;  %v11906_v2 = vld [vmem:[%s16928_s1 + $0x11f0] ss:$12 sps:$4 sm:$0xff]  }
 0x3a6   :  { %7876 = vmatprep.subr.bf16.mxu1 %v11802_v10  ;;  %v11848_v10 = vld [vmem:[%s16928_s1 + $0xfe0] ss:$12 sps:$4 sm:$0xff]  }
 0x3ab   :  { %10821 = vmatpush3.bf16.xpose.msra.mxu0 %v6555_v11  ;;  %v11845_v11 = vld [vmem:[%s16928_s1 + $0xf18] ss:$12 sps:$4 sm:$0xff]  }
 0x3ac   :  { %11086 = vmatprep.subr.msk.bf16.mxu0 %vm6112_vm0, %v11808_v12  ;;  %v11852_v12 = vld [vmem:[%s16928_s1 + $0xf04] ss:$12 sps:$4 sm:$0xff]  }
 0x3ad   :  { %7877 = vmatpush2.bf16.xpose.msra.mxu1 %v11800_v14  ;;  %v6600_v14 = vsel %vm6112_vm0, %v11849_v28, 0  ;;  %v11911_v28 = vld [vmem:[%s16928_s1 + $0x11d8] ss:$12 sps:$4 sm:$0xff]  }
 0x3ae   :  { %7878 = vmatprep.subr.bf16.mxu1 %v11807_v15  ;;  %v11853_v15 = vld [vmem:[%s16928_s1 + $0xfc8] ss:$12 sps:$4 sm:$0xff]  }
 0x3b3   :  { %10823 = vmatpush3.bf16.xpose.msra.mxu0 %v6552_v57  ;;  %v11850_v57 = vld [vmem:[%s16928_s1 + $0xf00] ss:$12 sps:$4 sm:$0xff]  }
 0x3b4   :  { %11087 = vmatprep.subr.msk.bf16.mxu0 %vm6112_vm0, %v11813_v19  ;;  %v11857_v19 = vld [vmem:[%s16928_s1 + $0x106c] ss:$12 sps:$4 sm:$0xff]  }
 0x3b5   :  { %7879 = vmatpush2.bf16.xpose.msra.mxu1 %v11805_v21  ;;  %v6597_v21 = vsel %vm6112_vm0, %v11854_v17, 0  ;;  %v11916_v17 = vld [vmem:[%s16928_s1 + $0x11c0] ss:$12 sps:$4 sm:$0xff]  }
 0x3b6   :  { %7880 = vmatprep.subr.bf16.mxu1 %v11812_v23  ;;  %v11860_v23 = vld [vmem:[%s16928_s1 + $0x112c] ss:$12 sps:$4 sm:$0xff]  }
 0x3bb   :  { %10825 = vmatpush3.bf16.xpose.msra.mxu0 %v6549_v26  ;;  %v11863_v26 = vld [vmem:[%s16928_s1 + $0x1054] ss:$12 sps:$4 sm:$0xff]  }
 0x3bc   :  { %7936 = vmatprep.subr.bf16.mxu0 %v11817_v27  ;;  %v11858_v27 = vld [vmem:[%s16928_s1 + $0x1128] ss:$12 sps:$4 sm:$0xff]  }
 0x3bd   :  { %7881 = vmatpush2.bf16.xpose.msra.mxu1 %v11810_v29  ;;  %v11866_v29 = vld [vmem:[%s16928_s1 + $0x1114] ss:$12 sps:$4 sm:$0xff]  }
 0x3be   :  { %11088 = vmatprep.subr.msk.bf16.mxu1 %vm6112_vm0, %v11818_v32  ;;  %v14562_v32 = vld [vmem:[%s16927_s0 + $0x8] ss:$12 sps:$4 sm:$0xff]  }
 0x3c2   :  { %10827 = vmatmul.mubr.msk.bf16.vlgmr.msra.gmra.mxu0 %vm6112_vm0, %v13755_v22 }
 0x3c3   :  { %7937 = vmatpush1.bf16.xpose.msra.mxu0 %v11815_v37  ;;  %7968 = vmatprep.mubr.bf16.mxu0 %v14106_v5  ;;  %v11869_v37 = vld [vmem:[%s16928_s1 + $0x103c] ss:$12 sps:$4 sm:$0xff]  }
 0x3c4   :  { %7883 = vmatmul.mubr.bf16.vlgmr.msra.gmra.mxu1 %v14323_v46  ;;  %7938 = vmatprep.subr.bf16.mxu0 %v11822_v40  ;;  %v11864_v40 = vld [vmem:[%s16928_s1 + $0x1110] ss:$12 sps:$4 sm:$0xff]  }
 0x3c5   :  { %10829 = vmatpush3.bf16.xpose.msra.mxu1 %v6618_v49  ;;  %10844 = vmatprep.mubr.msk.bf16.mxu1 %vm6112_vm0, %v13755_v22  ;;  %v11828_v22 = vld [vmem:[%s16928_s1 + $0x1040] ss:$12 sps:$4 sm:$0xff]   ;;  %v11872_v49 = vld [vmem:[%s16928_s1 + $0x10fc] ss:$12 sps:$4 sm:$0xff]  }
 0x3c6   :  { %11089 = vmatprep.subr.msk.bf16.mxu1 %vm6112_vm0, %v11823_v59  ;;  %v11867_v59 = vld [vmem:[%s16928_s1 + $0x1038] ss:$12 sps:$4 sm:$0xff]  }
 0x3cb   :  { %7939 = vmatpush1.bf16.xpose.msra.mxu0 %v11820_v42  ;;  %v11870_v42 = vld [vmem:[%s16928_s1 + $0x10f8] ss:$12 sps:$4 sm:$0xff]  }
 0x3cc   :  { %7940 = vmatprep.subr.bf16.mxu0 %v11827_v45  ;;  %v11878_v45 = vld [vmem:[%s16928_s1 + $0x10e4] ss:$12 sps:$4 sm:$0xff]  }
 0x3cd   :  { %10831 = vmatpush3.bf16.xpose.msra.mxu1 %v6615_v47  ;;  %v11873_v47 = vld [vmem:[%s16928_s1 + $0x1020] ss:$12 sps:$4 sm:$0xff]  }
 0x3ce   :  { %11090 = vmatprep.subr.msk.bf16.mxu1 %vm6112_vm0, %v11828_v22  ;;  %v11881_v22 = vld [vmem:[%s16928_s1 + $0x100c] ss:$12 sps:$4 sm:$0xff]  }
 0x3d3   :  { %7941 = vmatpush1.bf16.xpose.msra.mxu0 %v11825_v51  ;;  %v11884_v51 = vld [vmem:[%s16928_s1 + $0x10cc] ss:$12 sps:$4 sm:$0xff]  }
 0x3d4   :  { %7942 = vmatprep.subr.bf16.mxu0 %v11832_v52  ;;  %v11879_v52 = vld [vmem:[%s16928_s1 + $0x1008] ss:$12 sps:$4 sm:$0xff]  }
 0x3d5   :  { %10833 = vmatpush3.bf16.xpose.msra.mxu1 %v6612_v53  ;;  %v11887_v53 = vld [vmem:[%s16928_s1 + $0xff4] ss:$12 sps:$4 sm:$0xff]  }
 0x3d6   :  { %11091 = vmatprep.subr.msk.bf16.mxu1 %vm6112_vm0, %v11833_v54  ;;  %v11882_v54 = vld [vmem:[%s16928_s1 + $0x10c8] ss:$12 sps:$4 sm:$0xff]  }
 0x3db   :  { %7943 = vmatpush1.bf16.xpose.msra.mxu0 %v11830_v56  ;;  %v11885_v56 = vld [vmem:[%s16928_s1 + $0xff0] ss:$12 sps:$4 sm:$0xff]  }
 0x3dc   :  { %7944 = vmatprep.subr.bf16.mxu0 %v11837_v58  ;;  %v11893_v58 = vld [vmem:[%s16928_s1 + $0xfdc] ss:$12 sps:$4 sm:$0xff]  }
 0x3dd   :  { %10835 = vmatpush3.bf16.xpose.msra.mxu1 %v6609_v60  ;;  %v11888_v60 = vld [vmem:[%s16928_s1 + $0x10b0] ss:$12 sps:$4 sm:$0xff]  }
 0x3de   :  { %11092 = vmatprep.subr.msk.bf16.mxu1 %vm6112_vm0, %v11838_v61  ;;  %v11896_v61 = vld [vmem:[%s16928_s1 + $0x109c] ss:$12 sps:$4 sm:$0xff]  }
 0x3e3   :  { %7945 = vmatpush1.bf16.xpose.msra.mxu0 %v11835_v62  ;;  %v11899_v62 = vld [vmem:[%s16928_s1 + $0xfc4] ss:$12 sps:$4 sm:$0xff]  }
 0x3e4   :  { %7946 = vmatprep.subr.bf16.mxu0 %v11842_v63  ;;  %v11894_v63 = vld [vmem:[%s16928_s1 + $0x1098] ss:$12 sps:$4 sm:$0xff]  }
 0x3e5   :  { %10837 = vmatpush3.bf16.xpose.msra.mxu1 %v6606_v1  ;;  %v11902_v1 = vld [vmem:[%s16928_s1 + $0x1084] ss:$12 sps:$4 sm:$0xff]  }
 0x3e6   :  { %11093 = vmatprep.subr.msk.bf16.mxu1 %vm6112_vm0, %v11843_v35  ;;  %v11897_v35 = vld [vmem:[%s16928_s1 + $0xfc0] ss:$12 sps:$4 sm:$0xff]  }
 0x3eb   :  { %7947 = vmatpush1.bf16.xpose.msra.mxu0 %v11840_v3  ;;  %v11900_v3 = vld [vmem:[%s16928_s1 + $0x1080] ss:$12 sps:$4 sm:$0xff]  }
 0x3ec   :  { %7948 = vmatprep.subr.bf16.mxu0 %v11847_v7  ;;  %v11905_v7 = vld [vmem:[%s16928_s1 + $0x11ec] ss:$12 sps:$4 sm:$0xff]  }
 0x3ed   :  { %10839 = vmatpush3.bf16.xpose.msra.mxu1 %v6603_v8  ;;  %v11907_v8 = vld [vmem:[%s16928_s1 + $0x1130] ss:$12 sps:$4 sm:$0xff]  }
 0x3ee   :  { %11094 = vmatprep.subr.msk.bf16.mxu1 %vm6112_vm0, %v11848_v10  ;;  %v6666_v10 = vsel %vm6112_vm0, %v11907_v8, 0  ;;  %v11951_v8 = vld [vmem:[%s16928_s1 + $0x1358] ss:$12 sps:$4 sm:$0xff]  }
 0x3f3   :  { %7949 = vmatpush1.bf16.xpose.msra.mxu0 %v11845_v11  ;;  %v11903_v11 = vld [vmem:[%s16928_s1 + $0x11e8] ss:$12 sps:$4 sm:$0xff]  }
 0x3f4   :  { %7950 = vmatprep.subr.bf16.mxu0 %v11852_v12  ;;  %v11910_v12 = vld [vmem:[%s16928_s1 + $0x11d4] ss:$12 sps:$4 sm:$0xff]  }
 0x3f5   :  { %10841 = vmatpush3.bf16.xpose.msra.mxu1 %v6600_v14  ;;  %v11912_v14 = vld [vmem:[%s16928_s1 + $0x1118] ss:$12 sps:$4 sm:$0xff]  }
 0x3f6   :  { %11095 = vmatprep.subr.msk.bf16.mxu1 %vm6112_vm0, %v11853_v15  ;;  %v6663_v15 = vsel %vm6112_vm0, %v11912_v14, 0  ;;  %v11956_v14 = vld [vmem:[%s16928_s1 + $0x1340] ss:$12 sps:$4 sm:$0xff]  }
 0x3fb   :  { %7951 = vmatpush1.bf16.xpose.msra.mxu0 %v11850_v57  ;;  %v11908_v57 = vld [vmem:[%s16928_s1 + $0x11d0] ss:$12 sps:$4 sm:$0xff]  }
 0x3fc   :  { %7952 = vmatprep.subr.bf16.mxu0 %v11857_v19  ;;  %v11915_v19 = vld [vmem:[%s16928_s1 + $0x11bc] ss:$12 sps:$4 sm:$0xff]  }
 0x3fd   :  { %10843 = vmatpush3.bf16.xpose.msra.mxu1 %v6597_v21  ;;  %v11917_v21 = vld [vmem:[%s16928_s1 + $0x1100] ss:$12 sps:$4 sm:$0xff]  }
 0x3fe   :  { %8022 = vmatprep.subr.bf16.mxu1 %v11860_v23  ;;  %v6660_v23 = vsel %vm6112_vm0, %v11917_v21, 0  ;;  %v11961_v21 = vld [vmem:[%s16928_s1 + $0x1328] ss:$12 sps:$4 sm:$0xff]  }
 0x403   :  { %7953 = vmatpush2.bf16.xpose.msra.mxu0 %v11855_v25  ;;  %v11921_v25 = vld [vmem:[%s16928_s1 + $0x11a8] ss:$12 sps:$4 sm:$0xff]  }
 0x404   :  { %10845 = vmatmul.mubr.msk.bf16.vlgmr.msra.gmra.mxu1 %vm6112_vm0, %v14562_v32  ;;  %7954 = vmatprep.subr.bf16.mxu0 %v11863_v26  ;;  %v11913_v26 = vld [vmem:[%s16928_s1 + $0x11b8] ss:$12 sps:$4 sm:$0xff]  }
 0x405   :  { %8023 = vmatpush1.bf16.xpose.msra.mxu1 %v11858_v27  ;;  %8054 = vmatprep.mubr.bf16.mxu1 %v14106_v5  ;;  %v11920_v27 = vld [vmem:[%s16928_s1 + $0x11a4] ss:$12 sps:$4 sm:$0xff]  }
 0x406   :  { %8024 = vmatprep.subr.bf16.mxu1 %v11866_v29  ;;  %v11922_v29 = vld [vmem:[%s16928_s1 + $0x10e8] ss:$12 sps:$4 sm:$0xff]  }
 0x40b   :  { %7955 = vmatpush2.bf16.xpose.msra.mxu0 %v11861_v33  ;;  %v6657_v33 = vsel %vm6112_vm0, %v11922_v29, 0  ;;  %v11966_v29 = vld [vmem:[%s16928_s1 + $0x1310] ss:$12 sps:$4 sm:$0xff]  }
 0x40c   :  { %7956 = vmatprep.subr.bf16.mxu0 %v11869_v37  ;;  %v11926_v37 = vld [vmem:[%s16928_s1 + $0x1190] ss:$12 sps:$4 sm:$0xff]  }
 0x40d   :  { %8025 = vmatpush1.bf16.xpose.msra.mxu1 %v11864_v40  ;;  %v11918_v40 = vld [vmem:[%s16928_s1 + $0x11a0] ss:$12 sps:$4 sm:$0xff]  }
 0x40e   :  { %8026 = vmatprep.subr.bf16.mxu1 %v11872_v49  ;;  %v11925_v49 = vld [vmem:[%s16928_s1 + $0x118c] ss:$12 sps:$4 sm:$0xff]  }
 0x413   :  { %7957 = vmatpush2.bf16.xpose.msra.mxu0 %v11867_v59  ;;  %v11927_v59 = vld [vmem:[%s16928_s1 + $0x10d0] ss:$12 sps:$4 sm:$0xff]  }
 0x414   :  { %7958 = vmatprep.subr.bf16.mxu0 %v11875_v41  ;;  %v6654_v41 = vsel %vm6112_vm0, %v11927_v59, 0  ;;  %v11971_v59 = vld [vmem:[%s16928_s1 + $0x12f8] ss:$12 sps:$4 sm:$0xff]  }
 0x415   :  { %8027 = vmatpush1.bf16.xpose.msra.mxu1 %v11870_v42  ;;  %v11931_v42 = vld [vmem:[%s16928_s1 + $0x1178] ss:$12 sps:$4 sm:$0xff]  }
 0x416   :  { %8028 = vmatprep.subr.bf16.mxu1 %v11878_v45  ;;  %v11923_v45 = vld [vmem:[%s16928_s1 + $0x1188] ss:$12 sps:$4 sm:$0xff]  }
 0x41b   :  { %7959 = vmatpush2.bf16.xpose.msra.mxu0 %v11873_v47  ;;  %v11930_v47 = vld [vmem:[%s16928_s1 + $0x1174] ss:$12 sps:$4 sm:$0xff]  }
 0x41c   :  { %7960 = vmatprep.subr.bf16.mxu0 %v11881_v22  ;;  %v11932_v22 = vld [vmem:[%s16928_s1 + $0x10b8] ss:$12 sps:$4 sm:$0xff]  }
 0x41d   :  { %8029 = vmatpush1.bf16.xpose.msra.mxu1 %v11876_v50  ;;  %v6651_v50 = vsel %vm6112_vm0, %v11932_v22, 0  ;;  %v11976_v22 = vld [vmem:[%s16928_s1 + $0x12e0] ss:$12 sps:$4 sm:$0xff]  }
 0x41e   :  { %8030 = vmatprep.subr.bf16.mxu1 %v11884_v51  ;;  %v11936_v51 = vld [vmem:[%s16928_s1 + $0x1160] ss:$12 sps:$4 sm:$0xff]  }
 0x423   :  { %7961 = vmatpush2.bf16.xpose.msra.mxu0 %v11879_v52  ;;  %v11928_v52 = vld [vmem:[%s16928_s1 + $0x1170] ss:$12 sps:$4 sm:$0xff]  }
 0x424   :  { %7962 = vmatprep.subr.bf16.mxu0 %v11887_v53  ;;  %v11935_v53 = vld [vmem:[%s16928_s1 + $0x115c] ss:$12 sps:$4 sm:$0xff]  }
 0x425   :  { %8031 = vmatpush1.bf16.xpose.msra.mxu1 %v11882_v54  ;;  %v11937_v54 = vld [vmem:[%s16928_s1 + $0x10a0] ss:$12 sps:$4 sm:$0xff]  }
 0x426   :  { %8032 = vmatprep.subr.bf16.mxu1 %v11890_v55  ;;  %v6648_v55 = vsel %vm6112_vm0, %v11937_v54, 0  ;;  %v11981_v54 = vld [vmem:[%s16928_s1 + $0x12c8] ss:$12 sps:$4 sm:$0xff]  }
 0x42b   :  { %7963 = vmatpush2.bf16.xpose.msra.mxu0 %v11885_v56  ;;  %v11941_v56 = vld [vmem:[%s16928_s1 + $0x1148] ss:$12 sps:$4 sm:$0xff]  }
 0x42c   :  { %7964 = vmatprep.subr.bf16.mxu0 %v11893_v58  ;;  %v11933_v58 = vld [vmem:[%s16928_s1 + $0x1158] ss:$12 sps:$4 sm:$0xff]  }
 0x42d   :  { %8033 = vmatpush1.bf16.xpose.msra.mxu1 %v11888_v60  ;;  %v11940_v60 = vld [vmem:[%s16928_s1 + $0x1144] ss:$12 sps:$4 sm:$0xff]  }
 0x42e   :  { %8034 = vmatprep.subr.bf16.mxu1 %v11896_v61  ;;  %v11942_v61 = vld [vmem:[%s16928_s1 + $0x1088] ss:$12 sps:$4 sm:$0xff]  }
 0x433   :  { %7965 = vmatpush2.bf16.xpose.msra.mxu0 %v11891_v36  ;;  %v6645_v36 = vsel %vm6112_vm0, %v11942_v61, 0  ;;  %v11988_v61 = vld [vmem:[%s16928_s1 + $0x142c] ss:$12 sps:$4 sm:$0xff]  }
 0x434   :  { %7966 = vmatprep.subr.bf16.mxu0 %v11899_v62  ;;  %v11945_v62 = vld [vmem:[%s16928_s1 + $0x12ac] ss:$12 sps:$4 sm:$0xff]  }
 0x435   :  { %8035 = vmatpush1.bf16.xpose.msra.mxu1 %v11894_v63  ;;  %v11938_v63 = vld [vmem:[%s16928_s1 + $0x1140] ss:$12 sps:$4 sm:$0xff]  }
 0x436   :  { %8036 = vmatprep.subr.bf16.mxu1 %v11902_v1  ;;  %v11946_v1 = vld [vmem:[%s16928_s1 + $0x1370] ss:$12 sps:$4 sm:$0xff]  }
 0x43b   :  { %7967 = vmatpush2.bf16.xpose.msra.mxu0 %v11897_v35  ;;  %v11947_v35 = vld [vmem:[%s16928_s1 + $0x12b0] ss:$12 sps:$4 sm:$0xff]  }
 0x43c   :  { %11096 = vmatprep.subr.msk.bf16.mxu0 %vm6112_vm0, %v11906_v2  ;;  %v11943_v2 = vld [vmem:[%s16928_s1 + $0x12a8] ss:$12 sps:$4 sm:$0xff]  }
 0x43d   :  { %8037 = vmatpush1.bf16.xpose.msra.mxu1 %v11900_v3  ;;  %v11950_v3 = vld [vmem:[%s16928_s1 + $0x1294] ss:$12 sps:$4 sm:$0xff]  }
 0x43e   :  { %8038 = vmatprep.subr.bf16.mxu1 %v11905_v7  ;;  %v6714_v7 = vsel %vm6112_vm0, %v11947_v35, 0  ;;  %v11989_v35 = vld [vmem:[%s16928_s1 + $0x1350] ss:$12 sps:$4 sm:$0xff]  }
 0x442   :  { %7969 = vmatmul.mubr.bf16.vlgmr.msra.gmra.mxu0 %v14323_v46 }
 0x443   :  { %10847 = vmatpush3.bf16.xpose.msra.mxu0 %v6666_v10  ;;  %10862 = vmatprep.mubr.msk.bf16.mxu0 %vm6112_vm0, %v14562_v32  ;;  %v11952_v10 = vld [vmem:[%s16928_s1 + $0x1298] ss:$12 sps:$4 sm:$0xff]  }
 0x444   :  { %11097 = vmatprep.subr.msk.bf16.mxu0 %vm6112_vm0, %v11911_v28  ;;  %v11948_v28 = vld [vmem:[%s16928_s1 + $0x1290] ss:$12 sps:$4 sm:$0xff]  }
 0x445   :  { %8039 = vmatpush2.bf16.xpose.msra.mxu1 %v11903_v11  ;;  %v11955_v11 = vld [vmem:[%s16928_s1 + $0x127c] ss:$12 sps:$4 sm:$0xff]  }
 0x446   :  { %8040 = vmatprep.subr.bf16.mxu1 %v11910_v12  ;;  %v6711_v12 = vsel %vm6112_vm0, %v11952_v10, 0  ;;  %v11998_v10 = vld [vmem:[%s16928_s1 + $0x13f8] ss:$12 sps:$4 sm:$0xff]  }
 0x44b   :  { %10849 = vmatpush3.bf16.xpose.msra.mxu0 %v6663_v15  ;;  %v11957_v15 = vld [vmem:[%s16928_s1 + $0x1280] ss:$12 sps:$4 sm:$0xff]  }
 0x44c   :  { %11098 = vmatprep.subr.msk.bf16.mxu0 %vm6112_vm0, %v11916_v17  ;;  %v11953_v17 = vld [vmem:[%s16928_s1 + $0x1278] ss:$12 sps:$4 sm:$0xff]  }
 0x44d   :  { %8041 = vmatpush2.bf16.xpose.msra.mxu1 %v11908_v57  ;;  %v11960_v57 = vld [vmem:[%s16928_s1 + $0x1264] ss:$12 sps:$4 sm:$0xff]  }
 0x44e   :  { %8042 = vmatprep.subr.bf16.mxu1 %v11915_v19  ;;  %v6708_v19 = vsel %vm6112_vm0, %v11957_v15, 0  ;;  %v12012_v15 = vld [vmem:[%s16928_s1 + $0x13cc] ss:$12 sps:$4 sm:$0xff]  }
 0x453   :  { %10851 = vmatpush3.bf16.xpose.msra.mxu0 %v6660_v23  ;;  %v11962_v23 = vld [vmem:[%s16928_s1 + $0x1268] ss:$12 sps:$4 sm:$0xff]  }
 0x454   :  { %11099 = vmatprep.subr.msk.bf16.mxu0 %vm6112_vm0, %v11921_v25  ;;  %v11958_v25 = vld [vmem:[%s16928_s1 + $0x1260] ss:$12 sps:$4 sm:$0xff]  }
 0x455   :  { %8043 = vmatpush2.bf16.xpose.msra.mxu1 %v11913_v26  ;;  %v11965_v26 = vld [vmem:[%s16928_s1 + $0x124c] ss:$12 sps:$4 sm:$0xff]  }
 0x456   :  { %8044 = vmatprep.subr.bf16.mxu1 %v11920_v27  ;;  %v6705_v27 = vsel %vm6112_vm0, %v11962_v23, 0  ;;  %v12013_v23 = vld [vmem:[%s16928_s1 + $0x12f0] ss:$12 sps:$4 sm:$0xff]  }
 0x45b   :  { %10853 = vmatpush3.bf16.xpose.msra.mxu0 %v6657_v33  ;;  %v11967_v33 = vld [vmem:[%s16928_s1 + $0x1250] ss:$12 sps:$4 sm:$0xff]  }
 0x45c   :  { %11100 = vmatprep.subr.msk.bf16.mxu0 %vm6112_vm0, %v11926_v37  ;;  %v11963_v37 = vld [vmem:[%s16928_s1 + $0x1248] ss:$12 sps:$4 sm:$0xff]  }
 0x45d   :  { %8045 = vmatpush2.bf16.xpose.msra.mxu1 %v11918_v40  ;;  %v11970_v40 = vld [vmem:[%s16928_s1 + $0x1234] ss:$12 sps:$4 sm:$0xff]  }
 0x45e   :  { %8046 = vmatprep.subr.bf16.mxu1 %v11925_v49  ;;  %v6702_v49 = vsel %vm6112_vm0, %v11967_v33, 0  ;;  %v12027_v33 = vld [vmem:[%s16928_s1 + $0x12c4] ss:$12 sps:$4 sm:$0xff]  }
 0x463   :  { %10855 = vmatpush3.bf16.xpose.msra.mxu0 %v6654_v41  ;;  %v11972_v41 = vld [vmem:[%s16928_s1 + $0x1238] ss:$12 sps:$4 sm:$0xff]  }
 0x464   :  { %11101 = vmatprep.subr.msk.bf16.mxu0 %vm6112_vm0, %v11931_v42  ;;  %v11968_v42 = vld [vmem:[%s16928_s1 + $0x1230] ss:$12 sps:$4 sm:$0xff]  }
 0x465   :  { %8047 = vmatpush2.bf16.xpose.msra.mxu1 %v11923_v45  ;;  %v11975_v45 = vld [vmem:[%s16928_s1 + $0x121c] ss:$12 sps:$4 sm:$0xff]  }
 0x466   :  { %8048 = vmatprep.subr.bf16.mxu1 %v11930_v47  ;;  %v6699_v47 = vsel %vm6112_vm0, %v11972_v41, 0  ;;  %v12028_v41 = vld [vmem:[%s16928_s1 + $0x1380] ss:$12 sps:$4 sm:$0xff]  }
 0x46b   :  { %10857 = vmatpush3.bf16.xpose.msra.mxu0 %v6651_v50  ;;  %v11977_v50 = vld [vmem:[%s16928_s1 + $0x1220] ss:$12 sps:$4 sm:$0xff]  }
 0x46c   :  { %11102 = vmatprep.subr.msk.bf16.mxu0 %vm6112_vm0, %v11936_v51  ;;  %v11973_v51 = vld [vmem:[%s16928_s1 + $0x1218] ss:$12 sps:$4 sm:$0xff]  }
 0x46d   :  { %8049 = vmatpush2.bf16.xpose.msra.mxu1 %v11928_v52  ;;  %v11980_v52 = vld [vmem:[%s16928_s1 + $0x1204] ss:$12 sps:$4 sm:$0xff]  }
 0x46e   :  { %8050 = vmatprep.subr.bf16.mxu1 %v11935_v53  ;;  %v6696_v53 = vsel %vm6112_vm0, %v11977_v50, 0  ;;  %v12031_v50 = vld [vmem:[%s16928_s1 + $0x14e8] ss:$12 sps:$4 sm:$0xff]  }
 0x473   :  { %10859 = vmatpush3.bf16.xpose.msra.mxu0 %v6648_v55  ;;  %v11982_v55 = vld [vmem:[%s16928_s1 + $0x1208] ss:$12 sps:$4 sm:$0xff]  }
 0x474   :  { %11103 = vmatprep.subr.msk.bf16.mxu0 %vm6112_vm0, %v11941_v56  ;;  %v11978_v56 = vld [vmem:[%s16928_s1 + $0x1200] ss:$12 sps:$4 sm:$0xff]  }
 0x475   :  { %8051 = vmatpush2.bf16.xpose.msra.mxu1 %v11933_v58  ;;  %v11985_v58 = vld [vmem:[%s16928_s1 + $0x136c] ss:$12 sps:$4 sm:$0xff]  }
 0x476   :  { %8052 = vmatprep.subr.bf16.mxu1 %v11940_v60  ;;  %v6693_v60 = vsel %vm6112_vm0, %v11982_v55, 0  ;;  %v12036_v55 = vld [vmem:[%s16928_s1 + $0x14d0] ss:$12 sps:$4 sm:$0xff]  }
 0x47b   :  { %10861 = vmatpush3.bf16.xpose.msra.mxu0 %v6645_v36  ;;  %v11983_v36 = vld [vmem:[%s16928_s1 + $0x1368] ss:$12 sps:$4 sm:$0xff]  }
 0x47c   :  { %8108 = vmatprep.subr.bf16.mxu0 %v11945_v62  ;;  %v11991_v62 = vld [vmem:[%s16928_s1 + $0x1354] ss:$12 sps:$4 sm:$0xff]  }
 0x47d   :  { %8053 = vmatpush2.bf16.xpose.msra.mxu1 %v11938_v63  ;;  %v11986_v63 = vld [vmem:[%s16928_s1 + $0x1428] ss:$12 sps:$4 sm:$0xff]  }
 0x47e   :  { %11104 = vmatprep.subr.msk.bf16.mxu1 %vm6112_vm0, %v11946_v1  ;;  %v11994_v1 = vld [vmem:[%s16928_s1 + $0x1414] ss:$12 sps:$4 sm:$0xff]  }
 0x482   :  { %10863 = vmatmul.mubr.msk.bf16.vlgmr.msra.gmra.mxu0 %vm6112_vm0, %v14562_v32 }
 0x483   :  { %8109 = vmatpush1.bf16.xpose.msra.mxu0 %v11943_v2  ;;  %8140 = vmatprep.mubr.bf16.mxu0 %v14106_v5  ;;  %v11997_v2 = vld [vmem:[%s16928_s1 + $0x133c] ss:$12 sps:$4 sm:$0xff]  }
 0x484   :  { %8055 = vmatmul.mubr.bf16.vlgmr.msra.gmra.mxu1 %v14323_v46  ;;  %8110 = vmatprep.subr.bf16.mxu0 %v11950_v3  ;;  %v11992_v3 = vld [vmem:[%s16928_s1 + $0x1410] ss:$12 sps:$4 sm:$0xff]  }
 0x485   :  { %10865 = vmatpush3.bf16.xpose.msra.mxu1 %v6714_v7  ;;  %10880 = vmatprep.mubr.msk.bf16.mxu1 %vm6112_vm0, %v14562_v32  ;;  %v12000_v7 = vld [vmem:[%s16928_s1 + $0x13fc] ss:$12 sps:$4 sm:$0xff]  }
 0x486   :  { %11105 = vmatprep.subr.msk.bf16.mxu1 %vm6112_vm0, %v11951_v8  ;;  %v12003_v8 = vld [vmem:[%s16928_s1 + $0x1324] ss:$12 sps:$4 sm:$0xff]  }
 0x48b   :  { %8111 = vmatpush1.bf16.xpose.msra.mxu0 %v11948_v28  ;;  %v12006_v28 = vld [vmem:[%s16928_s1 + $0x13e4] ss:$12 sps:$4 sm:$0xff]  }
 0x48c   :  { %8112 = vmatprep.subr.bf16.mxu0 %v11955_v11  ;;  %v12001_v11 = vld [vmem:[%s16928_s1 + $0x1320] ss:$12 sps:$4 sm:$0xff]  }
 0x48d   :  { %10867 = vmatpush3.bf16.xpose.msra.mxu1 %v6711_v12  ;;  %v12009_v12 = vld [vmem:[%s16928_s1 + $0x130c] ss:$12 sps:$4 sm:$0xff]  }
 0x48e   :  { %11106 = vmatprep.subr.msk.bf16.mxu1 %vm6112_vm0, %v11956_v14  ;;  %v12004_v14 = vld [vmem:[%s16928_s1 + $0x13e0] ss:$12 sps:$4 sm:$0xff]  }
 0x493   :  { %8113 = vmatpush1.bf16.xpose.msra.mxu0 %v11953_v17  ;;  %v12007_v17 = vld [vmem:[%s16928_s1 + $0x1308] ss:$12 sps:$4 sm:$0xff]  }
 0x494   :  { %8114 = vmatprep.subr.bf16.mxu0 %v11960_v57  ;;  %v12015_v57 = vld [vmem:[%s16928_s1 + $0x12f4] ss:$12 sps:$4 sm:$0xff]  }
 0x495   :  { %10869 = vmatpush3.bf16.xpose.msra.mxu1 %v6708_v19  ;;  %v12010_v19 = vld [vmem:[%s16928_s1 + $0x13c8] ss:$12 sps:$4 sm:$0xff]  }
 0x496   :  { %11107 = vmatprep.subr.msk.bf16.mxu1 %vm6112_vm0, %v11961_v21  ;;  %v12018_v21 = vld [vmem:[%s16928_s1 + $0x13b4] ss:$12 sps:$4 sm:$0xff]  }
 0x49b   :  { %8115 = vmatpush1.bf16.xpose.msra.mxu0 %v11958_v25  ;;  %v12021_v25 = vld [vmem:[%s16928_s1 + $0x12dc] ss:$12 sps:$4 sm:$0xff]  }
 0x49c   :  { %8116 = vmatprep.subr.bf16.mxu0 %v11965_v26  ;;  %v12016_v26 = vld [vmem:[%s16928_s1 + $0x13b0] ss:$12 sps:$4 sm:$0xff]  }
 0x49d   :  { %10871 = vmatpush3.bf16.xpose.msra.mxu1 %v6705_v27  ;;  %v12024_v27 = vld [vmem:[%s16928_s1 + $0x139c] ss:$12 sps:$4 sm:$0xff]  }
 0x49e   :  { %11108 = vmatprep.subr.msk.bf16.mxu1 %vm6112_vm0, %v11966_v29  ;;  %v12019_v29 = vld [vmem:[%s16928_s1 + $0x12d8] ss:$12 sps:$4 sm:$0xff]  }
 0x4a3   :  { %8117 = vmatpush1.bf16.xpose.msra.mxu0 %v11963_v37  ;;  %v12022_v37 = vld [vmem:[%s16928_s1 + $0x1398] ss:$12 sps:$4 sm:$0xff]  }
 0x4a4   :  { %8118 = vmatprep.subr.bf16.mxu0 %v11970_v40  ;;  %v12030_v40 = vld [vmem:[%s16928_s1 + $0x1384] ss:$12 sps:$4 sm:$0xff]  }
 0x4a5   :  { %10873 = vmatpush3.bf16.xpose.msra.mxu1 %v6702_v49  ;;  %v12025_v49 = vld [vmem:[%s16928_s1 + $0x12c0] ss:$12 sps:$4 sm:$0xff]  }
 0x4a6   :  { %11109 = vmatprep.subr.msk.bf16.mxu1 %vm6112_vm0, %v11971_v59  ;;  %v12034_v59 = vld [vmem:[%s16928_s1 + $0x14f0] ss:$12 sps:$4 sm:$0xff]  }
 0x4ab   :  { %8119 = vmatpush1.bf16.xpose.msra.mxu0 %v11968_v42  ;;  %v12033_v42 = vld [vmem:[%s16928_s1 + $0x14ec] ss:$12 sps:$4 sm:$0xff]  }
 0x4ac   :  { %8120 = vmatprep.subr.bf16.mxu0 %v11975_v45  ;;  %v12035_v45 = vld [vmem:[%s16928_s1 + $0x1430] ss:$12 sps:$4 sm:$0xff]  }
 0x4ad   :  { %10875 = vmatpush3.bf16.xpose.msra.mxu1 %v6699_v47  ;;  %v6762_v47 = vsel %vm6112_vm0, %v12035_v45, 0  ;;  %v15117_v45 = vld [vmem:[%s16927_s0 + $0x4] ss:$12 sps:$4 sm:$0xff]  }
 0x4ae   :  { %11110 = vmatprep.subr.msk.bf16.mxu1 %vm6112_vm0, %v11976_v22  ;;  %v12039_v22 = vld [vmem:[%s16928_s1 + $0x14d8] ss:$12 sps:$4 sm:$0xff]  }
 0x4b3   :  { %8121 = vmatpush1.bf16.xpose.msra.mxu0 %v11973_v51  ;;  %v12038_v51 = vld [vmem:[%s16928_s1 + $0x14d4] ss:$12 sps:$4 sm:$0xff]  }
 0x4b4   :  { %8122 = vmatprep.subr.bf16.mxu0 %v11980_v52  ;;  %v12040_v52 = vld [vmem:[%s16928_s1 + $0x1418] ss:$12 sps:$4 sm:$0xff]  }
 0x4b5   :  { %10877 = vmatpush3.bf16.xpose.msra.mxu1 %v6696_v53  ;;  %v6759_v53 = vsel %vm6112_vm0, %v12040_v52, 0  ;;  %v12085_v52 = vld [vmem:[%s16928_s1 + $0x1580] ss:$12 sps:$4 sm:$0xff]  }
 0x4b6   :  { %11111 = vmatprep.subr.msk.bf16.mxu1 %vm6112_vm0, %v11981_v54  ;;  %v12044_v54 = vld [vmem:[%s16928_s1 + $0x14c0] ss:$12 sps:$4 sm:$0xff]  }
 0x4bb   :  { %8123 = vmatpush1.bf16.xpose.msra.mxu0 %v11978_v56  ;;  %v12043_v56 = vld [vmem:[%s16928_s1 + $0x14bc] ss:$12 sps:$4 sm:$0xff]  }
 0x4bc   :  { %8124 = vmatprep.subr.bf16.mxu0 %v11985_v58  ;;  %v12045_v58 = vld [vmem:[%s16928_s1 + $0x1400] ss:$12 sps:$4 sm:$0xff]  }
 0x4bd   :  { %10879 = vmatpush3.bf16.xpose.msra.mxu1 %v6693_v60  ;;  %v6756_v60 = vsel %vm6112_vm0, %v12045_v58, 0  ;;  %v12090_v58 = vld [vmem:[%s16928_s1 + $0x1568] ss:$12 sps:$4 sm:$0xff]  }
 0x4be   :  { %8194 = vmatprep.subr.bf16.mxu1 %v11988_v61  ;;  %v12049_v61 = vld [vmem:[%s16928_s1 + $0x14a8] ss:$12 sps:$4 sm:$0xff]  }
 0x4c3   :  { %8125 = vmatpush2.bf16.xpose.msra.mxu0 %v11983_v36  ;;  %v12041_v36 = vld [vmem:[%s16928_s1 + $0x14b8] ss:$12 sps:$4 sm:$0xff]  }
 0x4c4   :  { %10881 = vmatmul.mubr.msk.bf16.vlgmr.msra.gmra.mxu1 %vm6112_vm0, %v14562_v32  ;;  %8126 = vmatprep.subr.bf16.mxu0 %v11991_v62  ;;  %v12048_v62 = vld [vmem:[%s16928_s1 + $0x14a4] ss:$12 sps:$4 sm:$0xff]  }
 0x4c5   :  { %8195 = vmatpush1.bf16.xpose.msra.mxu1 %v11986_v63  ;;  %8226 = vmatprep.mubr.bf16.mxu1 %v14106_v5  ;;  %v11995_v5 = vld [vmem:[%s16928_s1 + $0x1338] ss:$12 sps:$4 sm:$0xff]   ;;  %v12050_v63 = vld [vmem:[%s16928_s1 + $0x13e8] ss:$12 sps:$4 sm:$0xff]  }
 0x4c6   :  { %8196 = vmatprep.subr.bf16.mxu1 %v11994_v1  ;;  %v6753_v1 = vsel %vm6112_vm0, %v12050_v63, 0  ;;  %v12095_v63 = vld [vmem:[%s16928_s1 + $0x1550] ss:$12 sps:$4 sm:$0xff]  }
 0x4cb   :  { %8127 = vmatpush2.bf16.xpose.msra.mxu0 %v11989_v35  ;;  %v12054_v35 = vld [vmem:[%s16928_s1 + $0x1490] ss:$12 sps:$4 sm:$0xff]  }
 0x4cc   :  { %8128 = vmatprep.subr.bf16.mxu0 %v11997_v2  ;;  %v12046_v2 = vld [vmem:[%s16928_s1 + $0x14a0] ss:$12 sps:$4 sm:$0xff]  }
 0x4cd   :  { %8197 = vmatpush1.bf16.xpose.msra.mxu1 %v11992_v3  ;;  %v12053_v3 = vld [vmem:[%s16928_s1 + $0x148c] ss:$12 sps:$4 sm:$0xff]  }
 0x4ce   :  { %8198 = vmatprep.subr.bf16.mxu1 %v12000_v7  ;;  %v12055_v7 = vld [vmem:[%s16928_s1 + $0x13d0] ss:$12 sps:$4 sm:$0xff]  }
 0x4d3   :  { %8129 = vmatpush2.bf16.xpose.msra.mxu0 %v11995_v5  ;;  %v6750_v5 = vsel %vm6112_vm0, %v12055_v7, 0  ;;  %v12100_v7 = vld [vmem:[%s16928_s1 + $0x1538] ss:$12 sps:$4 sm:$0xff]  }
 0x4d4   :  { %8130 = vmatprep.subr.bf16.mxu0 %v12003_v8  ;;  %v12059_v8 = vld [vmem:[%s16928_s1 + $0x1478] ss:$12 sps:$4 sm:$0xff]  }
 0x4d5   :  { %8199 = vmatpush1.bf16.xpose.msra.mxu1 %v11998_v10  ;;  %v12051_v10 = vld [vmem:[%s16928_s1 + $0x1488] ss:$12 sps:$4 sm:$0xff]  }
 0x4d6   :  { %8200 = vmatprep.subr.bf16.mxu1 %v12006_v28  ;;  %v12058_v28 = vld [vmem:[%s16928_s1 + $0x1474] ss:$12 sps:$4 sm:$0xff]  }
 0x4db   :  { %8131 = vmatpush2.bf16.xpose.msra.mxu0 %v12001_v11  ;;  %v12060_v11 = vld [vmem:[%s16928_s1 + $0x13b8] ss:$12 sps:$4 sm:$0xff]  }
 0x4dc   :  { %8132 = vmatprep.subr.bf16.mxu0 %v12009_v12  ;;  %v6747_v12 = vsel %vm6112_vm0, %v12060_v11, 0  ;;  %v12105_v11 = vld [vmem:[%s16928_s1 + $0x1520] ss:$12 sps:$4 sm:$0xff]  }
 0x4dd   :  { %8201 = vmatpush1.bf16.xpose.msra.mxu1 %v12004_v14  ;;  %v12064_v14 = vld [vmem:[%s16928_s1 + $0x1460] ss:$12 sps:$4 sm:$0xff]  }
 0x4de   :  { %8202 = vmatprep.subr.bf16.mxu1 %v12012_v15  ;;  %v12056_v15 = vld [vmem:[%s16928_s1 + $0x1470] ss:$12 sps:$4 sm:$0xff]  }
 0x4e3   :  { %8133 = vmatpush2.bf16.xpose.msra.mxu0 %v12007_v17  ;;  %v12063_v17 = vld [vmem:[%s16928_s1 + $0x145c] ss:$12 sps:$4 sm:$0xff]  }
 0x4e4   :  { %8134 = vmatprep.subr.bf16.mxu0 %v12015_v57  ;;  %v12065_v57 = vld [vmem:[%s16928_s1 + $0x13a0] ss:$12 sps:$4 sm:$0xff]  }
 0x4e5   :  { %8203 = vmatpush1.bf16.xpose.msra.mxu1 %v12010_v19  ;;  %v6744_v19 = vsel %vm6112_vm0, %v12065_v57, 0  ;;  %v12110_v57 = vld [vmem:[%s16928_s1 + $0x1508] ss:$12 sps:$4 sm:$0xff]  }
 0x4e6   :  { %8204 = vmatprep.subr.bf16.mxu1 %v12018_v21  ;;  %v12069_v21 = vld [vmem:[%s16928_s1 + $0x1448] ss:$12 sps:$4 sm:$0xff]  }
 0x4eb   :  { %8135 = vmatpush2.bf16.xpose.msra.mxu0 %v12013_v23  ;;  %v12061_v23 = vld [vmem:[%s16928_s1 + $0x1458] ss:$12 sps:$4 sm:$0xff]  }
 0x4ec   :  { %8136 = vmatprep.subr.bf16.mxu0 %v12021_v25  ;;  %v12068_v25 = vld [vmem:[%s16928_s1 + $0x1444] ss:$12 sps:$4 sm:$0xff]  }
 0x4ed   :  { %8205 = vmatpush1.bf16.xpose.msra.mxu1 %v12016_v26  ;;  %v12070_v26 = vld [vmem:[%s16928_s1 + $0x1388] ss:$12 sps:$4 sm:$0xff]  }
 0x4ee   :  { %8206 = vmatprep.subr.bf16.mxu1 %v12024_v27  ;;  %v6741_v27 = vsel %vm6112_vm0, %v12070_v26, 0  ;;  %v12111_v26 = vld [vmem:[%s16928_s1 + $0x1668] ss:$12 sps:$4 sm:$0xff]  }
 0x4f3   :  { %8137 = vmatpush2.bf16.xpose.msra.mxu0 %v12019_v29  ;;  %v12073_v29 = vld [vmem:[%s16928_s1 + $0x15ac] ss:$12 sps:$4 sm:$0xff]  }
 0x4f4   :  { %8138 = vmatprep.subr.bf16.mxu0 %v12027_v33  ;;  %v12066_v33 = vld [vmem:[%s16928_s1 + $0x1440] ss:$12 sps:$4 sm:$0xff]  }
 0x4f5   :  { %8207 = vmatpush1.bf16.xpose.msra.mxu1 %v12022_v37  ;;  %v12074_v37 = vld [vmem:[%s16928_s1 + $0x1670] ss:$12 sps:$4 sm:$0xff]  }
 0x4f6   :  { %8208 = vmatprep.subr.bf16.mxu1 %v12030_v40  ;;  %v12075_v40 = vld [vmem:[%s16928_s1 + $0x15b0] ss:$12 sps:$4 sm:$0xff]  }
 0x4fb   :  { %8139 = vmatpush2.bf16.xpose.msra.mxu0 %v12025_v49  ;;  %v12071_v49 = vld [vmem:[%s16928_s1 + $0x15a8] ss:$12 sps:$4 sm:$0xff]  }
 0x4fc   :  { %11112 = vmatprep.subr.msk.bf16.mxu0 %vm6112_vm0, %v12034_v59  ;;  %v12078_v59 = vld [vmem:[%s16928_s1 + $0x1594] ss:$12 sps:$4 sm:$0xff]  }
 0x4fd   :  { %8209 = vmatpush1.bf16.xpose.msra.mxu1 %v12028_v41  ;;  %v6810_v41 = vsel %vm6112_vm0, %v12075_v40, 0  ;;  %v12125_v40 = vld [vmem:[%s16928_s1 + $0x163c] ss:$12 sps:$4 sm:$0xff]  }
 0x4fe   :  { %8210 = vmatprep.subr.bf16.mxu1 %v12033_v42  ;;  %v12079_v42 = vld [vmem:[%s16928_s1 + $0x1658] ss:$12 sps:$4 sm:$0xff]  }
 0x502   :  { %8141 = vmatmul.mubr.bf16.vlgmr.msra.gmra.mxu0 %v14323_v46 }
 0x503   :  { %10883 = vmatpush3.bf16.xpose.msra.mxu0 %v6762_v47  ;;  %10898 = vmatprep.mubr.msk.bf16.mxu0 %vm6112_vm0, %v14562_v32  ;;  %v12080_v47 = vld [vmem:[%s16928_s1 + $0x1598] ss:$12 sps:$4 sm:$0xff]  }
 0x504   :  { %11113 = vmatprep.subr.msk.bf16.mxu0 %vm6112_vm0, %v12039_v22  ;;  %v12076_v22 = vld [vmem:[%s16928_s1 + $0x1590] ss:$12 sps:$4 sm:$0xff]  }
 0x505   :  { %8211 = vmatpush2.bf16.xpose.msra.mxu1 %v12031_v50  ;;  %v12083_v50 = vld [vmem:[%s16928_s1 + $0x157c] ss:$12 sps:$4 sm:$0xff]  }
 0x506   :  { %8212 = vmatprep.subr.bf16.mxu1 %v12038_v51  ;;  %v12084_v51 = vld [vmem:[%s16928_s1 + $0x1640] ss:$12 sps:$4 sm:$0xff]  }
 0x50b   :  { %10885 = vmatpush3.bf16.xpose.msra.mxu0 %v6759_v53  ;;  %v12081_v53 = vld [vmem:[%s16928_s1 + $0x1578] ss:$12 sps:$4 sm:$0xff]  }
 0x50c   :  { %11114 = vmatprep.subr.msk.bf16.mxu0 %vm6112_vm0, %v12044_v54  ;;  %v12088_v54 = vld [vmem:[%s16928_s1 + $0x1564] ss:$12 sps:$4 sm:$0xff]  }
 0x50d   :  { %8213 = vmatpush2.bf16.xpose.msra.mxu1 %v12036_v55  ;;  %v6804_v55 = vsel %vm6112_vm0, %v12085_v52, 0  ;;  %v12140_v52 = vld [vmem:[%s16928_s1 + $0x16cc] ss:$12 sps:$4 sm:$0xff]  }
 0x50e   :  { %8214 = vmatprep.subr.bf16.mxu1 %v12043_v56  ;;  %v12089_v56 = vld [vmem:[%s16928_s1 + $0x1628] ss:$12 sps:$4 sm:$0xff]  }
 0x513   :  { %10887 = vmatpush3.bf16.xpose.msra.mxu0 %v6756_v60  ;;  %v12086_v60 = vld [vmem:[%s16928_s1 + $0x1560] ss:$12 sps:$4 sm:$0xff]  }
 0x514   :  { %11115 = vmatprep.subr.msk.bf16.mxu0 %vm6112_vm0, %v12049_v61  ;;  %v12093_v61 = vld [vmem:[%s16928_s1 + $0x154c] ss:$12 sps:$4 sm:$0xff]  }
 0x515   :  { %8215 = vmatpush2.bf16.xpose.msra.mxu1 %v12041_v36  ;;  %v6801_v36 = vsel %vm6112_vm0, %v12090_v58, 0  ;;  %v12141_v58 = vld [vmem:[%s16928_s1 + $0x15f0] ss:$12 sps:$4 sm:$0xff]  }
 0x516   :  { %8216 = vmatprep.subr.bf16.mxu1 %v12048_v62  ;;  %v12094_v62 = vld [vmem:[%s16928_s1 + $0x1610] ss:$12 sps:$4 sm:$0xff]  }
 0x51b   :  { %10889 = vmatpush3.bf16.xpose.msra.mxu0 %v6753_v1  ;;  %v12091_v1 = vld [vmem:[%s16928_s1 + $0x1548] ss:$12 sps:$4 sm:$0xff]  }
 0x51c   :  { %11116 = vmatprep.subr.msk.bf16.mxu0 %vm6112_vm0, %v12054_v35  ;;  %v12098_v35 = vld [vmem:[%s16928_s1 + $0x1534] ss:$12 sps:$4 sm:$0xff]  }
 0x51d   :  { %8217 = vmatpush2.bf16.xpose.msra.mxu1 %v12046_v2  ;;  %v6798_v2 = vsel %vm6112_vm0, %v12095_v63, 0  ;;  %v12155_v63 = vld [vmem:[%s16928_s1 + $0x15c4] ss:$12 sps:$4 sm:$0xff]  }
 0x51e   :  { %8218 = vmatprep.subr.bf16.mxu1 %v12053_v3  ;;  %v12099_v3 = vld [vmem:[%s16928_s1 + $0x15f8] ss:$12 sps:$4 sm:$0xff]  }
 0x523   :  { %10891 = vmatpush3.bf16.xpose.msra.mxu0 %v6750_v5  ;;  %v12096_v5 = vld [vmem:[%s16928_s1 + $0x1530] ss:$12 sps:$4 sm:$0xff]  }
 0x524   :  { %11117 = vmatprep.subr.msk.bf16.mxu0 %vm6112_vm0, %v12059_v8  ;;  %v12103_v8 = vld [vmem:[%s16928_s1 + $0x151c] ss:$12 sps:$4 sm:$0xff]  }
 0x525   :  { %8219 = vmatpush2.bf16.xpose.msra.mxu1 %v12051_v10  ;;  %v6795_v10 = vsel %vm6112_vm0, %v12100_v7, 0  ;;  %v12156_v7 = vld [vmem:[%s16928_s1 + $0x1680] ss:$12 sps:$4 sm:$0xff]  }
 0x526   :  { %8220 = vmatprep.subr.bf16.mxu1 %v12058_v28  ;;  %v12104_v28 = vld [vmem:[%s16928_s1 + $0x15e0] ss:$12 sps:$4 sm:$0xff]  }
 0x52b   :  { %10893 = vmatpush3.bf16.xpose.msra.mxu0 %v6747_v12  ;;  %v12101_v12 = vld [vmem:[%s16928_s1 + $0x1518] ss:$12 sps:$4 sm:$0xff]  }
 0x52c   :  { %11118 = vmatprep.subr.msk.bf16.mxu0 %vm6112_vm0, %v12064_v14  ;;  %v12108_v14 = vld [vmem:[%s16928_s1 + $0x1504] ss:$12 sps:$4 sm:$0xff]  }
 0x52d   :  { %8221 = vmatpush2.bf16.xpose.msra.mxu1 %v12056_v15  ;;  %v6792_v15 = vsel %vm6112_vm0, %v12105_v11, 0  ;;  %v12159_v11 = vld [vmem:[%s16928_s1 + $0x17e8] ss:$12 sps:$4 sm:$0xff]  }
 0x52e   :  { %8222 = vmatprep.subr.bf16.mxu1 %v12063_v17  ;;  %v12109_v17 = vld [vmem:[%s16928_s1 + $0x15c8] ss:$12 sps:$4 sm:$0xff]  }
 0x533   :  { %10895 = vmatpush3.bf16.xpose.msra.mxu0 %v6744_v19  ;;  %v12106_v19 = vld [vmem:[%s16928_s1 + $0x1500] ss:$12 sps:$4 sm:$0xff]  }
 0x534   :  { %11119 = vmatprep.subr.msk.bf16.mxu0 %vm6112_vm0, %v12069_v21  ;;  %v12113_v21 = vld [vmem:[%s16928_s1 + $0x166c] ss:$12 sps:$4 sm:$0xff]  }
 0x535   :  { %8223 = vmatpush2.bf16.xpose.msra.mxu1 %v12061_v23  ;;  %v6789_v23 = vsel %vm6112_vm0, %v12110_v57, 0  ;;  %v12172_v57 = vld [vmem:[%s16928_s1 + $0x17c0] ss:$12 sps:$4 sm:$0xff]  }
 0x536   :  { %8224 = vmatprep.subr.bf16.mxu1 %v12068_v25  ;;  %v12116_v25 = vld [vmem:[%s16928_s1 + $0x172c] ss:$12 sps:$4 sm:$0xff]  }
 0x53b   :  { %10897 = vmatpush3.bf16.xpose.msra.mxu0 %v6741_v27  ;;  %v12119_v27 = vld [vmem:[%s16928_s1 + $0x1654] ss:$12 sps:$4 sm:$0xff]  }
 0x53c   :  { %8280 = vmatprep.subr.bf16.mxu0 %v12073_v29  ;;  %v12114_v29 = vld [vmem:[%s16928_s1 + $0x1728] ss:$12 sps:$4 sm:$0xff]  }
 0x53d   :  { %8225 = vmatpush2.bf16.xpose.msra.mxu1 %v12066_v33  ;;  %v12122_v33 = vld [vmem:[%s16928_s1 + $0x1714] ss:$12 sps:$4 sm:$0xff]  }
 0x53e   :  { %11120 = vmatprep.subr.msk.bf16.mxu1 %vm6112_vm0, %v12074_v37  ;;  %v12117_v37 = vld [vmem:[%s16928_s1 + $0x1650] ss:$12 sps:$4 sm:$0xff]  }
 0x542   :  { %10899 = vmatmul.mubr.msk.bf16.vlgmr.msra.gmra.mxu0 %vm6112_vm0, %v14562_v32 }
 0x543   :  { %8281 = vmatpush1.bf16.xpose.msra.mxu0 %v12071_v49  ;;  %8312 = vmatprep.mubr.bf16.mxu0 %v15117_v45  ;;  %v12120_v49 = vld [vmem:[%s16928_s1 + $0x1710] ss:$12 sps:$4 sm:$0xff]  }
 0x544   :  { %8227 = vmatmul.mubr.bf16.vlgmr.msra.gmra.mxu1 %v14323_v46  ;;  %8282 = vmatprep.subr.bf16.mxu0 %v12078_v59  ;;  %v6807_v46 = vsel %vm6112_vm0, %v12080_v47, 0  ;;  %v12128_v59 = vld [vmem:[%s16928_s1 + $0x16fc] ss:$12 sps:$4 sm:$0xff]   ;;  %v12126_v47 = vld [vmem:[%s16928_s1 + $0x16f8] ss:$12 sps:$4 sm:$0xff]  }
 0x545   :  { %10901 = vmatpush3.bf16.xpose.msra.mxu1 %v6810_v41  ;;  %10916 = vmatprep.mubr.msk.bf16.mxu1 %vm6112_vm0, %v14562_v32  ;;  %v12123_v41 = vld [vmem:[%s16928_s1 + $0x1638] ss:$12 sps:$4 sm:$0xff]  }
 0x546   :  { %11121 = vmatprep.subr.msk.bf16.mxu1 %vm6112_vm0, %v12079_v42  ;;  %v12131_v42 = vld [vmem:[%s16928_s1 + $0x1624] ss:$12 sps:$4 sm:$0xff]  }
 0x54b   :  { %8283 = vmatpush1.bf16.xpose.msra.mxu0 %v12076_v22  ;;  %v12134_v22 = vld [vmem:[%s16928_s1 + $0x16e4] ss:$12 sps:$4 sm:$0xff]  }
 0x54c   :  { %8284 = vmatprep.subr.bf16.mxu0 %v12083_v50  ;;  %v12129_v50 = vld [vmem:[%s16928_s1 + $0x1620] ss:$12 sps:$4 sm:$0xff]  }
 0x54d   :  { %10903 = vmatpush3.bf16.xpose.msra.mxu1 %v6807_v46  ;;  %v12137_v46 = vld [vmem:[%s16928_s1 + $0x160c] ss:$12 sps:$4 sm:$0xff]  }
 0x54e   :  { %11122 = vmatprep.subr.msk.bf16.mxu1 %vm6112_vm0, %v12084_v51  ;;  %v12132_v51 = vld [vmem:[%s16928_s1 + $0x16e0] ss:$12 sps:$4 sm:$0xff]  }
 0x553   :  { %8285 = vmatpush1.bf16.xpose.msra.mxu0 %v12081_v53  ;;  %v12135_v53 = vld [vmem:[%s16928_s1 + $0x1608] ss:$12 sps:$4 sm:$0xff]  }
 0x554   :  { %8286 = vmatprep.subr.bf16.mxu0 %v12088_v54  ;;  %v12143_v54 = vld [vmem:[%s16928_s1 + $0x15f4] ss:$12 sps:$4 sm:$0xff]  }
 0x555   :  { %10905 = vmatpush3.bf16.xpose.msra.mxu1 %v6804_v55  ;;  %v12138_v55 = vld [vmem:[%s16928_s1 + $0x16c8] ss:$12 sps:$4 sm:$0xff]  }
 0x556   :  { %11123 = vmatprep.subr.msk.bf16.mxu1 %vm6112_vm0, %v12089_v56  ;;  %v12146_v56 = vld [vmem:[%s16928_s1 + $0x16b4] ss:$12 sps:$4 sm:$0xff]  }
 0x55b   :  { %8287 = vmatpush1.bf16.xpose.msra.mxu0 %v12086_v60  ;;  %v12149_v60 = vld [vmem:[%s16928_s1 + $0x15dc] ss:$12 sps:$4 sm:$0xff]  }
 0x55c   :  { %8288 = vmatprep.subr.bf16.mxu0 %v12093_v61  ;;  %v12144_v61 = vld [vmem:[%s16928_s1 + $0x16b0] ss:$12 sps:$4 sm:$0xff]  }
 0x55d   :  { %10907 = vmatpush3.bf16.xpose.msra.mxu1 %v6801_v36  ;;  %v12152_v36 = vld [vmem:[%s16928_s1 + $0x169c] ss:$12 sps:$4 sm:$0xff]  }
 0x55e   :  { %11124 = vmatprep.subr.msk.bf16.mxu1 %vm6112_vm0, %v12094_v62  ;;  %v12147_v62 = vld [vmem:[%s16928_s1 + $0x15d8] ss:$12 sps:$4 sm:$0xff]  }
 0x563   :  { %8289 = vmatpush1.bf16.xpose.msra.mxu0 %v12091_v1  ;;  %v12150_v1 = vld [vmem:[%s16928_s1 + $0x1698] ss:$12 sps:$4 sm:$0xff]  }
 0x564   :  { %8290 = vmatprep.subr.bf16.mxu0 %v12098_v35  ;;  %v12158_v35 = vld [vmem:[%s16928_s1 + $0x1684] ss:$12 sps:$4 sm:$0xff]  }
 0x565   :  { %10909 = vmatpush3.bf16.xpose.msra.mxu1 %v6798_v2  ;;  %v12153_v2 = vld [vmem:[%s16928_s1 + $0x15c0] ss:$12 sps:$4 sm:$0xff]  }
 0x566   :  { %11125 = vmatprep.subr.msk.bf16.mxu1 %vm6112_vm0, %v12099_v3  ;;  %v12162_v3 = vld [vmem:[%s16928_s1 + $0x17f0] ss:$12 sps:$4 sm:$0xff]  }
 0x56b   :  { %8291 = vmatpush1.bf16.xpose.msra.mxu0 %v12096_v5  ;;  %v12161_v5 = vld [vmem:[%s16928_s1 + $0x17ec] ss:$12 sps:$4 sm:$0xff]  }
 0x56c   :  { %8292 = vmatprep.subr.bf16.mxu0 %v12103_v8  ;;  %v12163_v8 = vld [vmem:[%s16928_s1 + $0x1730] ss:$12 sps:$4 sm:$0xff]  }
 0x56d   :  { %10911 = vmatpush3.bf16.xpose.msra.mxu1 %v6795_v10  ;;  %v6858_v10 = vsel %vm6112_vm0, %v12163_v8, 0  ;;  %v12207_v8 = vld [vmem:[%s16928_s1 + $0x1958] ss:$12 sps:$4 sm:$0xff]  }
 0x56e   :  { %11126 = vmatprep.subr.msk.bf16.mxu1 %vm6112_vm0, %v12104_v28  ;;  %v12167_v28 = vld [vmem:[%s16928_s1 + $0x17d8] ss:$12 sps:$4 sm:$0xff]  }
 0x573   :  { %8293 = vmatpush1.bf16.xpose.msra.mxu0 %v12101_v12  ;;  %v15334_v12 = vld [vmem:[%s16927_s0] ss:$12 sps:$4 sm:$0xff]  }
 0x574   :  { %8294 = vmatprep.subr.bf16.mxu0 %v12108_v14  ;;  %v12166_v14 = vld [vmem:[%s16928_s1 + $0x17d4] ss:$12 sps:$4 sm:$0xff]  }
 0x575   :  { %10913 = vmatpush3.bf16.xpose.msra.mxu1 %v6792_v15  ;;  %v12168_v15 = vld [vmem:[%s16928_s1 + $0x1718] ss:$12 sps:$4 sm:$0xff]  }
 0x576   :  { %11127 = vmatprep.subr.msk.bf16.mxu1 %vm6112_vm0, %v12109_v17  ;;  %v6855_v17 = vsel %vm6112_vm0, %v12168_v15, 0  ;;  %v12212_v15 = vld [vmem:[%s16928_s1 + $0x1940] ss:$12 sps:$4 sm:$0xff]  }
 0x57b   :  { %8295 = vmatpush1.bf16.xpose.msra.mxu0 %v12106_v19  ;;  %v12164_v19 = vld [vmem:[%s16928_s1 + $0x17d0] ss:$12 sps:$4 sm:$0xff]  }
 0x57c   :  { %8296 = vmatprep.subr.bf16.mxu0 %v12113_v21  ;;  %v12173_v21 = vld [vmem:[%s16928_s1 + $0x1700] ss:$12 sps:$4 sm:$0xff]  }
 0x57d   :  { %10915 = vmatpush3.bf16.xpose.msra.mxu1 %v6789_v23  ;;  %v6852_v23 = vsel %vm6112_vm0, %v12173_v21, 0  ;;  %v12217_v21 = vld [vmem:[%s16928_s1 + $0x1928] ss:$12 sps:$4 sm:$0xff]  }
 0x57e   :  { %8366 = vmatprep.subr.bf16.mxu1 %v12116_v25  ;;  %v12177_v25 = vld [vmem:[%s16928_s1 + $0x17a8] ss:$12 sps:$4 sm:$0xff]  }
 0x583   :  { %8297 = vmatpush2.bf16.xpose.msra.mxu0 %v12111_v26  ;;  %v12169_v26 = vld [vmem:[%s16928_s1 + $0x17b8] ss:$12 sps:$4 sm:$0xff]  }
 0x584   :  { %10917 = vmatmul.mubr.msk.bf16.vlgmr.msra.gmra.mxu1 %vm6112_vm0, %v14562_v32  ;;  %8298 = vmatprep.subr.bf16.mxu0 %v12119_v27  ;;  %v12176_v27 = vld [vmem:[%s16928_s1 + $0x17a4] ss:$12 sps:$4 sm:$0xff]  }
 0x585   :  { %8367 = vmatpush1.bf16.xpose.msra.mxu1 %v12114_v29  ;;  %8398 = vmatprep.mubr.bf16.mxu1 %v15117_v45  ;;  %v12178_v29 = vld [vmem:[%s16928_s1 + $0x16e8] ss:$12 sps:$4 sm:$0xff]  }
 0x586   :  { %8368 = vmatprep.subr.bf16.mxu1 %v12122_v33  ;;  %v6849_v33 = vsel %vm6112_vm0, %v12178_v29, 0  ;;  %v12222_v29 = vld [vmem:[%s16928_s1 + $0x1910] ss:$12 sps:$4 sm:$0xff]  }
 0x58b   :  { %8299 = vmatpush2.bf16.xpose.msra.mxu0 %v12117_v37  ;;  %v12182_v37 = vld [vmem:[%s16928_s1 + $0x1790] ss:$12 sps:$4 sm:$0xff]  }
 0x58c   :  { %8300 = vmatprep.subr.bf16.mxu0 %v12125_v40  ;;  %v12174_v40 = vld [vmem:[%s16928_s1 + $0x17a0] ss:$12 sps:$4 sm:$0xff]  }
 0x58d   :  { %8369 = vmatpush1.bf16.xpose.msra.mxu1 %v12120_v49  ;;  %v12181_v49 = vld [vmem:[%s16928_s1 + $0x178c] ss:$12 sps:$4 sm:$0xff]  }
 0x58e   :  { %8370 = vmatprep.subr.bf16.mxu1 %v12128_v59  ;;  %v12183_v59 = vld [vmem:[%s16928_s1 + $0x16d0] ss:$12 sps:$4 sm:$0xff]  }
 0x593   :  { %8301 = vmatpush2.bf16.xpose.msra.mxu0 %v12123_v41  ;;  %v6846_v41 = vsel %vm6112_vm0, %v12183_v59, 0  ;;  %v12227_v59 = vld [vmem:[%s16928_s1 + $0x18f8] ss:$12 sps:$4 sm:$0xff]  }
 0x594   :  { %8302 = vmatprep.subr.bf16.mxu0 %v12131_v42  ;;  %v12187_v42 = vld [vmem:[%s16928_s1 + $0x1778] ss:$12 sps:$4 sm:$0xff]  }
 0x595   :  { %8371 = vmatpush1.bf16.xpose.msra.mxu1 %v12126_v47  ;;  %v12179_v47 = vld [vmem:[%s16928_s1 + $0x1788] ss:$12 sps:$4 sm:$0xff]  }
 0x596   :  { %8372 = vmatprep.subr.bf16.mxu1 %v12134_v22  ;;  %v12186_v22 = vld [vmem:[%s16928_s1 + $0x1774] ss:$12 sps:$4 sm:$0xff]  }
 0x59b   :  { %8303 = vmatpush2.bf16.xpose.msra.mxu0 %v12129_v50  ;;  %v12188_v50 = vld [vmem:[%s16928_s1 + $0x16b8] ss:$12 sps:$4 sm:$0xff]  }
 0x59c   :  { %8304 = vmatprep.subr.bf16.mxu0 %v12137_v46  ;;  %v6843_v46 = vsel %vm6112_vm0, %v12188_v50, 0  ;;  %v12232_v50 = vld [vmem:[%s16928_s1 + $0x18e0] ss:$12 sps:$4 sm:$0xff]  }
 0x59d   :  { %8373 = vmatpush1.bf16.xpose.msra.mxu1 %v12132_v51  ;;  %v12192_v51 = vld [vmem:[%s16928_s1 + $0x1760] ss:$12 sps:$4 sm:$0xff]  }
 0x59e   :  { %8374 = vmatprep.subr.bf16.mxu1 %v12140_v52  ;;  %v12184_v52 = vld [vmem:[%s16928_s1 + $0x1770] ss:$12 sps:$4 sm:$0xff]  }
 0x5a3   :  { %8305 = vmatpush2.bf16.xpose.msra.mxu0 %v12135_v53  ;;  %v12191_v53 = vld [vmem:[%s16928_s1 + $0x175c] ss:$12 sps:$4 sm:$0xff]  }
 0x5a4   :  { %8306 = vmatprep.subr.bf16.mxu0 %v12143_v54  ;;  %v12193_v54 = vld [vmem:[%s16928_s1 + $0x16a0] ss:$12 sps:$4 sm:$0xff]  }
 0x5a5   :  { %8375 = vmatpush1.bf16.xpose.msra.mxu1 %v12138_v55  ;;  %v6840_v55 = vsel %vm6112_vm0, %v12193_v54, 0  ;;  %v12237_v54 = vld [vmem:[%s16928_s1 + $0x18c8] ss:$12 sps:$4 sm:$0xff]  }
 0x5a6   :  { %8376 = vmatprep.subr.bf16.mxu1 %v12146_v56  ;;  %v12197_v56 = vld [vmem:[%s16928_s1 + $0x1748] ss:$12 sps:$4 sm:$0xff]  }
 0x5ab   :  { %8307 = vmatpush2.bf16.xpose.msra.mxu0 %v12141_v58  ;;  %v12189_v58 = vld [vmem:[%s16928_s1 + $0x1758] ss:$12 sps:$4 sm:$0xff]  }
 0x5ac   :  { %8308 = vmatprep.subr.bf16.mxu0 %v12149_v60  ;;  %v12196_v60 = vld [vmem:[%s16928_s1 + $0x1744] ss:$12 sps:$4 sm:$0xff]  }
 0x5ad   :  { %8377 = vmatpush1.bf16.xpose.msra.mxu1 %v12144_v61  ;;  %v12198_v61 = vld [vmem:[%s16928_s1 + $0x1688] ss:$12 sps:$4 sm:$0xff]  }
 0x5ae   :  { %8378 = vmatprep.subr.bf16.mxu1 %v12152_v36  ;;  %v6837_v36 = vsel %vm6112_vm0, %v12198_v61, 0  ;;  %v12244_v61 = vld [vmem:[%s16928_s1 + $0x1a2c] ss:$12 sps:$4 sm:$0xff]  }
 0x5b3   :  { %8309 = vmatpush2.bf16.xpose.msra.mxu0 %v12147_v62  ;;  %v12201_v62 = vld [vmem:[%s16928_s1 + $0x18ac] ss:$12 sps:$4 sm:$0xff]  }
 0x5b4   :  { %8310 = vmatprep.subr.bf16.mxu0 %v12155_v63  ;;  %v12194_v63 = vld [vmem:[%s16928_s1 + $0x1740] ss:$12 sps:$4 sm:$0xff]  }
 0x5b5   :  { %8379 = vmatpush1.bf16.xpose.msra.mxu1 %v12150_v1  ;;  %v12202_v1 = vld [vmem:[%s16928_s1 + $0x1970] ss:$12 sps:$4 sm:$0xff]  }
 0x5b6   :  { %8380 = vmatprep.subr.bf16.mxu1 %v12158_v35  ;;  %v12203_v35 = vld [vmem:[%s16928_s1 + $0x18b0] ss:$12 sps:$4 sm:$0xff]  }
 0x5bb   :  { %8311 = vmatpush2.bf16.xpose.msra.mxu0 %v12153_v2  ;;  %v12199_v2 = vld [vmem:[%s16928_s1 + $0x18a8] ss:$12 sps:$4 sm:$0xff]  }
 0x5bc   :  { %11128 = vmatprep.subr.msk.bf16.mxu0 %vm6112_vm0, %v12162_v3  ;;  %v12206_v3 = vld [vmem:[%s16928_s1 + $0x1894] ss:$12 sps:$4 sm:$0xff]  }
 0x5bd   :  { %8381 = vmatpush1.bf16.xpose.msra.mxu1 %v12156_v7  ;;  %v15453_v7 = vld [vmem:[%s16927_s0 + $0x8] ss:$12 sps:$4 sm:$0xff]  }
 0x5be   :  { %8382 = vmatprep.subr.bf16.mxu1 %v12161_v5  ;;  %v6906_v5 = vsel %vm6112_vm0, %v12203_v35, 0  ;;  %v12245_v35 = vld [vmem:[%s16928_s1 + $0x1950] ss:$12 sps:$4 sm:$0xff]  }
 0x5c2   :  { %8313 = vmatmul.mubr.bf16.vlgmr.msra.gmra.mxu0 %v15334_v12 }
 0x5c3   :  { %10919 = vmatpush3.bf16.xpose.msra.mxu0 %v6858_v10  ;;  %10934 = vmatprep.mubr.msk.bf16.mxu0 %vm6112_vm0, %v14562_v32  ;;  %v12171_v32 = vld [vmem:[%s16928_s1 + $0x17bc] ss:$12 sps:$4 sm:$0xff]   ;;  %v12208_v10 = vld [vmem:[%s16928_s1 + $0x1898] ss:$12 sps:$4 sm:$0xff]  }
 0x5c4   :  { %11129 = vmatprep.subr.msk.bf16.mxu0 %vm6112_vm0, %v12167_v28  ;;  %v12204_v28 = vld [vmem:[%s16928_s1 + $0x1890] ss:$12 sps:$4 sm:$0xff]  }
 0x5c5   :  { %8383 = vmatpush2.bf16.xpose.msra.mxu1 %v12159_v11  ;;  %v12211_v11 = vld [vmem:[%s16928_s1 + $0x187c] ss:$12 sps:$4 sm:$0xff]  }
 0x5c6   :  { %8384 = vmatprep.subr.bf16.mxu1 %v12166_v14  ;;  %v6903_v14 = vsel %vm6112_vm0, %v12208_v10, 0  ;;  %v12259_v10 = vld [vmem:[%s16928_s1 + $0x1924] ss:$12 sps:$4 sm:$0xff]  }
 0x5cb   :  { %10921 = vmatpush3.bf16.xpose.msra.mxu0 %v6855_v17  ;;  %v12213_v17 = vld [vmem:[%s16928_s1 + $0x1880] ss:$12 sps:$4 sm:$0xff]  }
 0x5cc   :  { %11130 = vmatprep.subr.msk.bf16.mxu0 %vm6112_vm0, %v12172_v57  ;;  %v12209_v57 = vld [vmem:[%s16928_s1 + $0x1878] ss:$12 sps:$4 sm:$0xff]  }
 0x5cd   :  { %8385 = vmatpush2.bf16.xpose.msra.mxu1 %v12164_v19  ;;  %v12216_v19 = vld [vmem:[%s16928_s1 + $0x1864] ss:$12 sps:$4 sm:$0xff]  }
 0x5ce   :  { %8386 = vmatprep.subr.bf16.mxu1 %v12171_v32  ;;  %v6900_v32 = vsel %vm6112_vm0, %v12213_v17, 0  ;;  %v12260_v17 = vld [vmem:[%s16928_s1 + $0x19e0] ss:$12 sps:$4 sm:$0xff]  }
 0x5d3   :  { %10923 = vmatpush3.bf16.xpose.msra.mxu0 %v6852_v23  ;;  %v12218_v23 = vld [vmem:[%s16928_s1 + $0x1868] ss:$12 sps:$4 sm:$0xff]  }
 0x5d4   :  { %11131 = vmatprep.subr.msk.bf16.mxu0 %vm6112_vm0, %v12177_v25  ;;  %v12214_v25 = vld [vmem:[%s16928_s1 + $0x1860] ss:$12 sps:$4 sm:$0xff]  }
 0x5d5   :  { %8387 = vmatpush2.bf16.xpose.msra.mxu1 %v12169_v26  ;;  %v12221_v26 = vld [vmem:[%s16928_s1 + $0x184c] ss:$12 sps:$4 sm:$0xff]  }
 0x5d6   :  { %8388 = vmatprep.subr.bf16.mxu1 %v12176_v27  ;;  %v6897_v27 = vsel %vm6112_vm0, %v12218_v23, 0  ;;  %v12274_v23 = vld [vmem:[%s16928_s1 + $0x19b4] ss:$12 sps:$4 sm:$0xff]  }
 0x5db   :  { %10925 = vmatpush3.bf16.xpose.msra.mxu0 %v6849_v33  ;;  %v12223_v33 = vld [vmem:[%s16928_s1 + $0x1850] ss:$12 sps:$4 sm:$0xff]  }
 0x5dc   :  { %11132 = vmatprep.subr.msk.bf16.mxu0 %vm6112_vm0, %v12182_v37  ;;  %v12219_v37 = vld [vmem:[%s16928_s1 + $0x1848] ss:$12 sps:$4 sm:$0xff]  }
 0x5dd   :  { %8389 = vmatpush2.bf16.xpose.msra.mxu1 %v12174_v40  ;;  %v12226_v40 = vld [vmem:[%s16928_s1 + $0x1834] ss:$12 sps:$4 sm:$0xff]  }
 0x5de   :  { %8390 = vmatprep.subr.bf16.mxu1 %v12181_v49  ;;  %v6894_v49 = vsel %vm6112_vm0, %v12223_v33, 0  ;;  %v12275_v33 = vld [vmem:[%s16928_s1 + $0x18d8] ss:$12 sps:$4 sm:$0xff]  }
 0x5e3   :  { %10927 = vmatpush3.bf16.xpose.msra.mxu0 %v6846_v41  ;;  %v12228_v41 = vld [vmem:[%s16928_s1 + $0x1838] ss:$12 sps:$4 sm:$0xff]  }
 0x5e4   :  { %11133 = vmatprep.subr.msk.bf16.mxu0 %vm6112_vm0, %v12187_v42  ;;  %v12224_v42 = vld [vmem:[%s16928_s1 + $0x1830] ss:$12 sps:$4 sm:$0xff]  }
 0x5e5   :  { %8391 = vmatpush2.bf16.xpose.msra.mxu1 %v12179_v47  ;;  %v12231_v47 = vld [vmem:[%s16928_s1 + $0x181c] ss:$12 sps:$4 sm:$0xff]  }
 0x5e6   :  { %8392 = vmatprep.subr.bf16.mxu1 %v12186_v22  ;;  %v6891_v22 = vsel %vm6112_vm0, %v12228_v41, 0  ;;  %v12290_v41 = vld [vmem:[%s16928_s1 + $0x1af0] ss:$12 sps:$4 sm:$0xff]  }
 0x5eb   :  { %10929 = vmatpush3.bf16.xpose.msra.mxu0 %v6843_v46  ;;  %v12233_v46 = vld [vmem:[%s16928_s1 + $0x1820] ss:$12 sps:$4 sm:$0xff]  }
 0x5ec   :  { %11134 = vmatprep.subr.msk.bf16.mxu0 %vm6112_vm0, %v12192_v51  ;;  %v12229_v51 = vld [vmem:[%s16928_s1 + $0x1818] ss:$12 sps:$4 sm:$0xff]  }
 0x5ed   :  { %8393 = vmatpush2.bf16.xpose.msra.mxu1 %v12184_v52  ;;  %v12236_v52 = vld [vmem:[%s16928_s1 + $0x1804] ss:$12 sps:$4 sm:$0xff]  }
 0x5ee   :  { %8394 = vmatprep.subr.bf16.mxu1 %v12191_v53  ;;  %v6888_v53 = vsel %vm6112_vm0, %v12233_v46, 0  ;;  %v12295_v46 = vld [vmem:[%s16928_s1 + $0x1ad8] ss:$12 sps:$4 sm:$0xff]  }
 0x5f3   :  { %10931 = vmatpush3.bf16.xpose.msra.mxu0 %v6840_v55  ;;  %v12238_v55 = vld [vmem:[%s16928_s1 + $0x1808] ss:$12 sps:$4 sm:$0xff]  }
 0x5f4   :  { %11135 = vmatprep.subr.msk.bf16.mxu0 %vm6112_vm0, %v12197_v56  ;;  %v12234_v56 = vld [vmem:[%s16928_s1 + $0x1800] ss:$12 sps:$4 sm:$0xff]  }
 0x5f5   :  { %8395 = vmatpush2.bf16.xpose.msra.mxu1 %v12189_v58  ;;  %v12241_v58 = vld [vmem:[%s16928_s1 + $0x196c] ss:$12 sps:$4 sm:$0xff]  }
 0x5f6   :  { %8396 = vmatprep.subr.bf16.mxu1 %v12196_v60  ;;  %v6885_v60 = vsel %vm6112_vm0, %v12238_v55, 0  ;;  %v12300_v55 = vld [vmem:[%s16928_s1 + $0x1ac0] ss:$12 sps:$4 sm:$0xff]  }
 0x5fb   :  { %10933 = vmatpush3.bf16.xpose.msra.mxu0 %v6837_v36  ;;  %v12239_v36 = vld [vmem:[%s16928_s1 + $0x1968] ss:$12 sps:$4 sm:$0xff]  }
 0x5fc   :  { %8452 = vmatprep.subr.bf16.mxu0 %v12201_v62  ;;  %v12247_v62 = vld [vmem:[%s16928_s1 + $0x1954] ss:$12 sps:$4 sm:$0xff]  }
 0x5fd   :  { %8397 = vmatpush2.bf16.xpose.msra.mxu1 %v12194_v63  ;;  %v12242_v63 = vld [vmem:[%s16928_s1 + $0x1a28] ss:$12 sps:$4 sm:$0xff]  }
 0x5fe   :  { %11136 = vmatprep.subr.msk.bf16.mxu1 %vm6112_vm0, %v12202_v1  ;;  %v12250_v1 = vld [vmem:[%s16928_s1 + $0x1a14] ss:$12 sps:$4 sm:$0xff]  }
 0x602   :  { %10935 = vmatmul.mubr.msk.bf16.vlgmr.msra.gmra.mxu0 %vm6112_vm0, %v15453_v7 }
 0x603   :  { %8453 = vmatpush1.bf16.xpose.msra.mxu0 %v12199_v2  ;;  %8484 = vmatprep.mubr.bf16.mxu0 %v15117_v45  ;;  %v12253_v2 = vld [vmem:[%s16928_s1 + $0x193c] ss:$12 sps:$4 sm:$0xff]  }
 0x604   :  { %8399 = vmatmul.mubr.bf16.vlgmr.msra.gmra.mxu1 %v15334_v12  ;;  %8454 = vmatprep.subr.bf16.mxu0 %v12206_v3  ;;  %v12248_v3 = vld [vmem:[%s16928_s1 + $0x1a10] ss:$12 sps:$4 sm:$0xff]  }
 0x605   :  { %10937 = vmatpush3.bf16.xpose.msra.mxu1 %v6906_v5  ;;  %10952 = vmatprep.mubr.msk.bf16.mxu1 %vm6112_vm0, %v15453_v7  ;;  %v12256_v5 = vld [vmem:[%s16928_s1 + $0x19fc] ss:$12 sps:$4 sm:$0xff]  }
 0x606   :  { %11137 = vmatprep.subr.msk.bf16.mxu1 %vm6112_vm0, %v12207_v8  ;;  %v12251_v8 = vld [vmem:[%s16928_s1 + $0x1938] ss:$12 sps:$4 sm:$0xff]  }
 0x60b   :  { %8455 = vmatpush1.bf16.xpose.msra.mxu0 %v12204_v28  ;;  %v12254_v28 = vld [vmem:[%s16928_s1 + $0x19f8] ss:$12 sps:$4 sm:$0xff]  }
 0x60c   :  { %8456 = vmatprep.subr.bf16.mxu0 %v12211_v11  ;;  %v12262_v11 = vld [vmem:[%s16928_s1 + $0x19e4] ss:$12 sps:$4 sm:$0xff]  }
 0x60d   :  { %10939 = vmatpush3.bf16.xpose.msra.mxu1 %v6903_v14  ;;  %v12257_v14 = vld [vmem:[%s16928_s1 + $0x1920] ss:$12 sps:$4 sm:$0xff]  }
 0x60e   :  { %11138 = vmatprep.subr.msk.bf16.mxu1 %vm6112_vm0, %v12212_v15  ;;  %v12265_v15 = vld [vmem:[%s16928_s1 + $0x190c] ss:$12 sps:$4 sm:$0xff]  }
 0x613   :  { %8457 = vmatpush1.bf16.xpose.msra.mxu0 %v12209_v57  ;;  %v12268_v57 = vld [vmem:[%s16928_s1 + $0x19cc] ss:$12 sps:$4 sm:$0xff]  }
 0x614   :  { %8458 = vmatprep.subr.bf16.mxu0 %v12216_v19  ;;  %v12263_v19 = vld [vmem:[%s16928_s1 + $0x1908] ss:$12 sps:$4 sm:$0xff]  }
 0x615   :  { %10941 = vmatpush3.bf16.xpose.msra.mxu1 %v6900_v32  ;;  %v12271_v32 = vld [vmem:[%s16928_s1 + $0x18f4] ss:$12 sps:$4 sm:$0xff]  }
 0x616   :  { %11139 = vmatprep.subr.msk.bf16.mxu1 %vm6112_vm0, %v12217_v21  ;;  %v12266_v21 = vld [vmem:[%s16928_s1 + $0x19c8] ss:$12 sps:$4 sm:$0xff]  }
 0x61b   :  { %8459 = vmatpush1.bf16.xpose.msra.mxu0 %v12214_v25  ;;  %v12269_v25 = vld [vmem:[%s16928_s1 + $0x18f0] ss:$12 sps:$4 sm:$0xff]  }
 0x61c   :  { %8460 = vmatprep.subr.bf16.mxu0 %v12221_v26  ;;  %v12277_v26 = vld [vmem:[%s16928_s1 + $0x18dc] ss:$12 sps:$4 sm:$0xff]  }
 0x61d   :  { %10943 = vmatpush3.bf16.xpose.msra.mxu1 %v6897_v27  ;;  %v12272_v27 = vld [vmem:[%s16928_s1 + $0x19b0] ss:$12 sps:$4 sm:$0xff]  }
 0x61e   :  { %11140 = vmatprep.subr.msk.bf16.mxu1 %vm6112_vm0, %v12222_v29  ;;  %v12280_v29 = vld [vmem:[%s16928_s1 + $0x199c] ss:$12 sps:$4 sm:$0xff]  }
 0x623   :  { %8461 = vmatpush1.bf16.xpose.msra.mxu0 %v12219_v37  ;;  %v12283_v37 = vld [vmem:[%s16928_s1 + $0x18c4] ss:$12 sps:$4 sm:$0xff]  }
 0x624   :  { %8462 = vmatprep.subr.bf16.mxu0 %v12226_v40  ;;  %v12278_v40 = vld [vmem:[%s16928_s1 + $0x1998] ss:$12 sps:$4 sm:$0xff]  }
 0x625   :  { %10945 = vmatpush3.bf16.xpose.msra.mxu1 %v6894_v49  ;;  %v12286_v49 = vld [vmem:[%s16928_s1 + $0x1984] ss:$12 sps:$4 sm:$0xff]  }
 0x626   :  { %11141 = vmatprep.subr.msk.bf16.mxu1 %vm6112_vm0, %v12227_v59  ;;  %v12281_v59 = vld [vmem:[%s16928_s1 + $0x18c0] ss:$12 sps:$4 sm:$0xff]  }
 0x62b   :  { %8463 = vmatpush1.bf16.xpose.msra.mxu0 %v12224_v42  ;;  %v12284_v42 = vld [vmem:[%s16928_s1 + $0x1980] ss:$12 sps:$4 sm:$0xff]  }
 0x62c   :  { %8464 = vmatprep.subr.bf16.mxu0 %v12231_v47  ;;  %v12289_v47 = vld [vmem:[%s16928_s1 + $0x1aec] ss:$12 sps:$4 sm:$0xff]  }
 0x62d   :  { %10947 = vmatpush3.bf16.xpose.msra.mxu1 %v6891_v22  ;;  %v12291_v22 = vld [vmem:[%s16928_s1 + $0x1a30] ss:$12 sps:$4 sm:$0xff]  }
 0x62e   :  { %11142 = vmatprep.subr.msk.bf16.mxu1 %vm6112_vm0, %v12232_v50  ;;  %v6954_v50 = vsel %vm6112_vm0, %v12291_v22, 0  ;;  %v12335_v22 = vld [vmem:[%s16928_s1 + $0x1c58] ss:$12 sps:$4 sm:$0xff]  }
 0x633   :  { %8465 = vmatpush1.bf16.xpose.msra.mxu0 %v12229_v51  ;;  %v12287_v51 = vld [vmem:[%s16928_s1 + $0x1ae8] ss:$12 sps:$4 sm:$0xff]  }
 0x634   :  { %8466 = vmatprep.subr.bf16.mxu0 %v12236_v52  ;;  %v12294_v52 = vld [vmem:[%s16928_s1 + $0x1ad4] ss:$12 sps:$4 sm:$0xff]  }
 0x635   :  { %10949 = vmatpush3.bf16.xpose.msra.mxu1 %v6888_v53  ;;  %v12296_v53 = vld [vmem:[%s16928_s1 + $0x1a18] ss:$12 sps:$4 sm:$0xff]  }
 0x636   :  { %11143 = vmatprep.subr.msk.bf16.mxu1 %vm6112_vm0, %v12237_v54  ;;  %v6951_v54 = vsel %vm6112_vm0, %v12296_v53, 0  ;;  %v12340_v53 = vld [vmem:[%s16928_s1 + $0x1c40] ss:$12 sps:$4 sm:$0xff]  }
 0x63b   :  { %8467 = vmatpush1.bf16.xpose.msra.mxu0 %v12234_v56  ;;  %v12292_v56 = vld [vmem:[%s16928_s1 + $0x1ad0] ss:$12 sps:$4 sm:$0xff]  }
 0x63c   :  { %8468 = vmatprep.subr.bf16.mxu0 %v12241_v58  ;;  %v12299_v58 = vld [vmem:[%s16928_s1 + $0x1abc] ss:$12 sps:$4 sm:$0xff]  }
 0x63d   :  { %10951 = vmatpush3.bf16.xpose.msra.mxu1 %v6885_v60  ;;  %v12301_v60 = vld [vmem:[%s16928_s1 + $0x1a00] ss:$12 sps:$4 sm:$0xff]  }
 0x63e   :  { %8538 = vmatprep.subr.bf16.mxu1 %v12244_v61  ;;  %v6948_v61 = vsel %vm6112_vm0, %v12301_v60, 0  ;;  %v12345_v60 = vld [vmem:[%s16928_s1 + $0x1c28] ss:$12 sps:$4 sm:$0xff]  }
 0x643   :  { %8469 = vmatpush2.bf16.xpose.msra.mxu0 %v12239_v36  ;;  %v12305_v36 = vld [vmem:[%s16928_s1 + $0x1aa8] ss:$12 sps:$4 sm:$0xff]  }
 0x644   :  { %10953 = vmatmul.mubr.msk.bf16.vlgmr.msra.gmra.mxu1 %vm6112_vm0, %v15453_v7  ;;  %8470 = vmatprep.subr.bf16.mxu0 %v12247_v62  ;;  %v12297_v62 = vld [vmem:[%s16928_s1 + $0x1ab8] ss:$12 sps:$4 sm:$0xff]  }
 0x645   :  { %8539 = vmatpush1.bf16.xpose.msra.mxu1 %v12242_v63  ;;  %8570 = vmatprep.mubr.bf16.mxu1 %v15117_v45  ;;  %v12304_v63 = vld [vmem:[%s16928_s1 + $0x1aa4] ss:$12 sps:$4 sm:$0xff]  }
 0x646   :  { %8540 = vmatprep.subr.bf16.mxu1 %v12250_v1  ;;  %v12306_v1 = vld [vmem:[%s16928_s1 + $0x19e8] ss:$12 sps:$4 sm:$0xff]  }
 0x64b   :  { %8471 = vmatpush2.bf16.xpose.msra.mxu0 %v12245_v35  ;;  %v6945_v35 = vsel %vm6112_vm0, %v12306_v1, 0  ;;  %v12350_v1 = vld [vmem:[%s16928_s1 + $0x1c10] ss:$12 sps:$4 sm:$0xff]  }
 0x64c   :  { %8472 = vmatprep.subr.bf16.mxu0 %v12253_v2  ;;  %v12310_v2 = vld [vmem:[%s16928_s1 + $0x1a90] ss:$12 sps:$4 sm:$0xff]  }
 0x64d   :  { %8541 = vmatpush1.bf16.xpose.msra.mxu1 %v12248_v3  ;;  %v12302_v3 = vld [vmem:[%s16928_s1 + $0x1aa0] ss:$12 sps:$4 sm:$0xff]  }
 0x64e   :  { %8542 = vmatprep.subr.bf16.mxu1 %v12256_v5  ;;  %v12309_v5 = vld [vmem:[%s16928_s1 + $0x1a8c] ss:$12 sps:$4 sm:$0xff]  }
 0x653   :  { %8473 = vmatpush2.bf16.xpose.msra.mxu0 %v12251_v8  ;;  %v12311_v8 = vld [vmem:[%s16928_s1 + $0x19d0] ss:$12 sps:$4 sm:$0xff]  }
 0x654   :  { %8474 = vmatprep.subr.bf16.mxu0 %v12259_v10  ;;  %v6942_v10 = vsel %vm6112_vm0, %v12311_v8, 0  ;;  %v12355_v8 = vld [vmem:[%s16928_s1 + $0x1bf8] ss:$12 sps:$4 sm:$0xff]  }
 0x655   :  { %8543 = vmatpush1.bf16.xpose.msra.mxu1 %v12254_v28  ;;  %v12315_v28 = vld [vmem:[%s16928_s1 + $0x1a78] ss:$12 sps:$4 sm:$0xff]  }
 0x656   :  { %8544 = vmatprep.subr.bf16.mxu1 %v12262_v11  ;;  %v12307_v11 = vld [vmem:[%s16928_s1 + $0x1a88] ss:$12 sps:$4 sm:$0xff]  }
 0x65b   :  { %8475 = vmatpush2.bf16.xpose.msra.mxu0 %v12257_v14  ;;  %v12314_v14 = vld [vmem:[%s16928_s1 + $0x1a74] ss:$12 sps:$4 sm:$0xff]  }
 0x65c   :  { %8476 = vmatprep.subr.bf16.mxu0 %v12265_v15  ;;  %v12316_v15 = vld [vmem:[%s16928_s1 + $0x19b8] ss:$12 sps:$4 sm:$0xff]  }
 0x65d   :  { %8545 = vmatpush1.bf16.xpose.msra.mxu1 %v12260_v17  ;;  %v6939_v17 = vsel %vm6112_vm0, %v12316_v15, 0  ;;  %v12360_v15 = vld [vmem:[%s16928_s1 + $0x1be0] ss:$12 sps:$4 sm:$0xff]  }
 0x65e   :  { %8546 = vmatprep.subr.bf16.mxu1 %v12268_v57  ;;  %v12320_v57 = vld [vmem:[%s16928_s1 + $0x1a60] ss:$12 sps:$4 sm:$0xff]  }
 0x663   :  { %8477 = vmatpush2.bf16.xpose.msra.mxu0 %v12263_v19  ;;  %v12312_v19 = vld [vmem:[%s16928_s1 + $0x1a70] ss:$12 sps:$4 sm:$0xff]  }
 0x664   :  { %8478 = vmatprep.subr.bf16.mxu0 %v12271_v32  ;;  %v12319_v32 = vld [vmem:[%s16928_s1 + $0x1a5c] ss:$12 sps:$4 sm:$0xff]  }
 0x665   :  { %8547 = vmatpush1.bf16.xpose.msra.mxu1 %v12266_v21  ;;  %v12321_v21 = vld [vmem:[%s16928_s1 + $0x19a0] ss:$12 sps:$4 sm:$0xff]  }
 0x666   :  { %8548 = vmatprep.subr.bf16.mxu1 %v12274_v23  ;;  %v6936_v23 = vsel %vm6112_vm0, %v12321_v21, 0  ;;  %v12365_v21 = vld [vmem:[%s16928_s1 + $0x1bc8] ss:$12 sps:$4 sm:$0xff]  }
 0x66b   :  { %8479 = vmatpush2.bf16.xpose.msra.mxu0 %v12269_v25  ;;  %v12325_v25 = vld [vmem:[%s16928_s1 + $0x1a48] ss:$12 sps:$4 sm:$0xff]  }
 0x66c   :  { %8480 = vmatprep.subr.bf16.mxu0 %v12277_v26  ;;  %v12317_v26 = vld [vmem:[%s16928_s1 + $0x1a58] ss:$12 sps:$4 sm:$0xff]  }
 0x66d   :  { %8549 = vmatpush1.bf16.xpose.msra.mxu1 %v12272_v27  ;;  %v12324_v27 = vld [vmem:[%s16928_s1 + $0x1a44] ss:$12 sps:$4 sm:$0xff]  }
 0x66e   :  { %8550 = vmatprep.subr.bf16.mxu1 %v12280_v29  ;;  %v12326_v29 = vld [vmem:[%s16928_s1 + $0x1988] ss:$12 sps:$4 sm:$0xff]  }
 0x673   :  { %8481 = vmatpush2.bf16.xpose.msra.mxu0 %v12275_v33  ;;  %v6933_v33 = vsel %vm6112_vm0, %v12326_v29, 0  ;;  %v12372_v29 = vld [vmem:[%s16928_s1 + $0x1d2c] ss:$12 sps:$4 sm:$0xff]  }
 0x674   :  { %8482 = vmatprep.subr.bf16.mxu0 %v12283_v37  ;;  %v12329_v37 = vld [vmem:[%s16928_s1 + $0x1bac] ss:$12 sps:$4 sm:$0xff]  }
 0x675   :  { %8551 = vmatpush1.bf16.xpose.msra.mxu1 %v12278_v40  ;;  %v12322_v40 = vld [vmem:[%s16928_s1 + $0x1a40] ss:$12 sps:$4 sm:$0xff]  }
 0x676   :  { %8552 = vmatprep.subr.bf16.mxu1 %v12286_v49  ;;  %v12330_v49 = vld [vmem:[%s16928_s1 + $0x1c70] ss:$12 sps:$4 sm:$0xff]  }
 0x67b   :  { %8483 = vmatpush2.bf16.xpose.msra.mxu0 %v12281_v59  ;;  %v12331_v59 = vld [vmem:[%s16928_s1 + $0x1bb0] ss:$12 sps:$4 sm:$0xff]  }
 0x67c   :  { %11144 = vmatprep.subr.msk.bf16.mxu0 %vm6112_vm0, %v12290_v41  ;;  %v12327_v41 = vld [vmem:[%s16928_s1 + $0x1ba8] ss:$12 sps:$4 sm:$0xff]  }
 0x67d   :  { %8553 = vmatpush1.bf16.xpose.msra.mxu1 %v12284_v42  ;;  %v12334_v42 = vld [vmem:[%s16928_s1 + $0x1b94] ss:$12 sps:$4 sm:$0xff]  }
 0x67e   :  { %8554 = vmatprep.subr.bf16.mxu1 %v12289_v47  ;;  %v7002_v47 = vsel %vm6112_vm0, %v12331_v59, 0  ;;  %v12373_v59 = vld [vmem:[%s16928_s1 + $0x1c50] ss:$12 sps:$4 sm:$0xff]  }
 0x682   :  { %8485 = vmatmul.mubr.bf16.vlgmr.msra.gmra.mxu0 %v15334_v12 }
 0x683   :  { %10955 = vmatpush3.bf16.xpose.msra.mxu0 %v6954_v50  ;;  %10970 = vmatprep.mubr.msk.bf16.mxu0 %vm6112_vm0, %v15453_v7  ;;  %v12336_v50 = vld [vmem:[%s16928_s1 + $0x1b98] ss:$12 sps:$4 sm:$0xff]  }
 0x684   :  { %11145 = vmatprep.subr.msk.bf16.mxu0 %vm6112_vm0, %v12295_v46  ;;  %v12332_v46 = vld [vmem:[%s16928_s1 + $0x1b90] ss:$12 sps:$4 sm:$0xff]  }
 0x685   :  { %8555 = vmatpush2.bf16.xpose.msra.mxu1 %v12287_v51  ;;  %v12339_v51 = vld [vmem:[%s16928_s1 + $0x1b7c] ss:$12 sps:$4 sm:$0xff]  }
 0x686   :  { %8556 = vmatprep.subr.bf16.mxu1 %v12294_v52  ;;  %v6999_v52 = vsel %vm6112_vm0, %v12336_v50, 0  ;;  %v12382_v50 = vld [vmem:[%s16928_s1 + $0x1cf8] ss:$12 sps:$4 sm:$0xff]  }
 0x68b   :  { %10957 = vmatpush3.bf16.xpose.msra.mxu0 %v6951_v54  ;;  %v12341_v54 = vld [vmem:[%s16928_s1 + $0x1b80] ss:$12 sps:$4 sm:$0xff]  }
 0x68c   :  { %11146 = vmatprep.subr.msk.bf16.mxu0 %vm6112_vm0, %v12300_v55  ;;  %v12337_v55 = vld [vmem:[%s16928_s1 + $0x1b78] ss:$12 sps:$4 sm:$0xff]  }
 0x68d   :  { %8557 = vmatpush2.bf16.xpose.msra.mxu1 %v12292_v56  ;;  %v12344_v56 = vld [vmem:[%s16928_s1 + $0x1b64] ss:$12 sps:$4 sm:$0xff]  }
 0x68e   :  { %8558 = vmatprep.subr.bf16.mxu1 %v12299_v58  ;;  %v6996_v58 = vsel %vm6112_vm0, %v12341_v54, 0  ;;  %v12396_v54 = vld [vmem:[%s16928_s1 + $0x1ccc] ss:$12 sps:$4 sm:$0xff]  }
 0x693   :  { %10959 = vmatpush3.bf16.xpose.msra.mxu0 %v6948_v61  ;;  %v12346_v61 = vld [vmem:[%s16928_s1 + $0x1b68] ss:$12 sps:$4 sm:$0xff]  }
 0x694   :  { %11147 = vmatprep.subr.msk.bf16.mxu0 %vm6112_vm0, %v12305_v36  ;;  %v12342_v36 = vld [vmem:[%s16928_s1 + $0x1b60] ss:$12 sps:$4 sm:$0xff]  }
 0x695   :  { %8559 = vmatpush2.bf16.xpose.msra.mxu1 %v12297_v62  ;;  %v12349_v62 = vld [vmem:[%s16928_s1 + $0x1b4c] ss:$12 sps:$4 sm:$0xff]  }
 0x696   :  { %8560 = vmatprep.subr.bf16.mxu1 %v12304_v63  ;;  %v6993_v63 = vsel %vm6112_vm0, %v12346_v61, 0  ;;  %v12397_v61 = vld [vmem:[%s16928_s1 + $0x1bf0] ss:$12 sps:$4 sm:$0xff]  }
 0x69b   :  { %10961 = vmatpush3.bf16.xpose.msra.mxu0 %v6945_v35  ;;  %v12351_v35 = vld [vmem:[%s16928_s1 + $0x1b50] ss:$12 sps:$4 sm:$0xff]  }
 0x69c   :  { %11148 = vmatprep.subr.msk.bf16.mxu0 %vm6112_vm0, %v12310_v2  ;;  %v12347_v2 = vld [vmem:[%s16928_s1 + $0x1b48] ss:$12 sps:$4 sm:$0xff]  }
 0x69d   :  { %8561 = vmatpush2.bf16.xpose.msra.mxu1 %v12302_v3  ;;  %v12354_v3 = vld [vmem:[%s16928_s1 + $0x1b34] ss:$12 sps:$4 sm:$0xff]  }
 0x69e   :  { %8562 = vmatprep.subr.bf16.mxu1 %v12309_v5  ;;  %v6990_v5 = vsel %vm6112_vm0, %v12351_v35, 0  ;;  %v12411_v35 = vld [vmem:[%s16928_s1 + $0x1bc4] ss:$12 sps:$4 sm:$0xff]  }
 0x6a3   :  { %10963 = vmatpush3.bf16.xpose.msra.mxu0 %v6942_v10  ;;  %v12356_v10 = vld [vmem:[%s16928_s1 + $0x1b38] ss:$12 sps:$4 sm:$0xff]  }
 0x6a4   :  { %11149 = vmatprep.subr.msk.bf16.mxu0 %vm6112_vm0, %v12315_v28  ;;  %v12352_v28 = vld [vmem:[%s16928_s1 + $0x1b30] ss:$12 sps:$4 sm:$0xff]  }
 0x6a5   :  { %8563 = vmatpush2.bf16.xpose.msra.mxu1 %v12307_v11  ;;  %v12359_v11 = vld [vmem:[%s16928_s1 + $0x1b1c] ss:$12 sps:$4 sm:$0xff]  }
 0x6a6   :  { %8564 = vmatprep.subr.bf16.mxu1 %v12314_v14  ;;  %v6987_v14 = vsel %vm6112_vm0, %v12356_v10, 0  ;;  %v12412_v10 = vld [vmem:[%s16928_s1 + $0x1c80] ss:$12 sps:$4 sm:$0xff]  }
 0x6ab   :  { %10965 = vmatpush3.bf16.xpose.msra.mxu0 %v6939_v17  ;;  %v12361_v17 = vld [vmem:[%s16928_s1 + $0x1b20] ss:$12 sps:$4 sm:$0xff]  }
 0x6ac   :  { %11150 = vmatprep.subr.msk.bf16.mxu0 %vm6112_vm0, %v12320_v57  ;;  %v12357_v57 = vld [vmem:[%s16928_s1 + $0x1b18] ss:$12 sps:$4 sm:$0xff]  }
 0x6ad   :  { %8565 = vmatpush2.bf16.xpose.msra.mxu1 %v12312_v19  ;;  %v12364_v19 = vld [vmem:[%s16928_s1 + $0x1b04] ss:$12 sps:$4 sm:$0xff]  }
 0x6ae   :  { %8566 = vmatprep.subr.bf16.mxu1 %v12319_v32  ;;  %v6984_v32 = vsel %vm6112_vm0, %v12361_v17, 0  ;;  %v12415_v17 = vld [vmem:[%s16928_s1 + $0x1de8] ss:$12 sps:$4 sm:$0xff]  }
 0x6b3   :  { %10967 = vmatpush3.bf16.xpose.msra.mxu0 %v6936_v23  ;;  %v12366_v23 = vld [vmem:[%s16928_s1 + $0x1b08] ss:$12 sps:$4 sm:$0xff]  }
 0x6b4   :  { %11151 = vmatprep.subr.msk.bf16.mxu0 %vm6112_vm0, %v12325_v25  ;;  %v12362_v25 = vld [vmem:[%s16928_s1 + $0x1b00] ss:$12 sps:$4 sm:$0xff]  }
 0x6b5   :  { %8567 = vmatpush2.bf16.xpose.msra.mxu1 %v12317_v26  ;;  %v12369_v26 = vld [vmem:[%s16928_s1 + $0x1c6c] ss:$12 sps:$4 sm:$0xff]  }
 0x6b6   :  { %8568 = vmatprep.subr.bf16.mxu1 %v12324_v27  ;;  %v6981_v27 = vsel %vm6112_vm0, %v12366_v23, 0  ;;  %v12420_v23 = vld [vmem:[%s16928_s1 + $0x1dd0] ss:$12 sps:$4 sm:$0xff]  }
 0x6bb   :  { %10969 = vmatpush3.bf16.xpose.msra.mxu0 %v6933_v33  ;;  %v12367_v33 = vld [vmem:[%s16928_s1 + $0x1c68] ss:$12 sps:$4 sm:$0xff]  }
 0x6bc   :  { %8624 = vmatprep.subr.bf16.mxu0 %v12329_v37  ;;  %v12375_v37 = vld [vmem:[%s16928_s1 + $0x1c54] ss:$12 sps:$4 sm:$0xff]  }
 0x6bd   :  { %8569 = vmatpush2.bf16.xpose.msra.mxu1 %v12322_v40  ;;  %v12370_v40 = vld [vmem:[%s16928_s1 + $0x1d28] ss:$12 sps:$4 sm:$0xff]  }
 0x6be   :  { %11152 = vmatprep.subr.msk.bf16.mxu1 %vm6112_vm0, %v12330_v49  ;;  %v12378_v49 = vld [vmem:[%s16928_s1 + $0x1d14] ss:$12 sps:$4 sm:$0xff]  }
 0x6c2   :  { %10971 = vmatmul.mubr.msk.bf16.vlgmr.msra.gmra.mxu0 %vm6112_vm0, %v15453_v7 }
 0x6c3   :  { %8625 = vmatpush1.bf16.xpose.msra.mxu0 %v12327_v41  ;;  %8656 = vmatprep.mubr.bf16.mxu0 %v15117_v45  ;;  %v12381_v41 = vld [vmem:[%s16928_s1 + $0x1c3c] ss:$12 sps:$4 sm:$0xff]  }
 0x6c4   :  { %8571 = vmatmul.mubr.bf16.vlgmr.msra.gmra.mxu1 %v15334_v12  ;;  %8626 = vmatprep.subr.bf16.mxu0 %v12334_v42  ;;  %v12376_v42 = vld [vmem:[%s16928_s1 + $0x1d10] ss:$12 sps:$4 sm:$0xff]  }
 0x6c5   :  { %10973 = vmatpush3.bf16.xpose.msra.mxu1 %v7002_v47  ;;  %10988 = vmatprep.mubr.msk.bf16.mxu1 %vm6112_vm0, %v15453_v7  ;;  %v12384_v47 = vld [vmem:[%s16928_s1 + $0x1cfc] ss:$12 sps:$4 sm:$0xff]  }
 0x6c6   :  { %11153 = vmatprep.subr.msk.bf16.mxu1 %vm6112_vm0, %v12335_v22  ;;  %v12387_v22 = vld [vmem:[%s16928_s1 + $0x1c24] ss:$12 sps:$4 sm:$0xff]  }
 0x6cb   :  { %8627 = vmatpush1.bf16.xpose.msra.mxu0 %v12332_v46  ;;  %v12390_v46 = vld [vmem:[%s16928_s1 + $0x1ce4] ss:$12 sps:$4 sm:$0xff]  }
 0x6cc   :  { %8628 = vmatprep.subr.bf16.mxu0 %v12339_v51  ;;  %v12385_v51 = vld [vmem:[%s16928_s1 + $0x1c20] ss:$12 sps:$4 sm:$0xff]  }
 0x6cd   :  { %10975 = vmatpush3.bf16.xpose.msra.mxu1 %v6999_v52  ;;  %v12393_v52 = vld [vmem:[%s16928_s1 + $0x1c0c] ss:$12 sps:$4 sm:$0xff]  }
 0x6ce   :  { %11154 = vmatprep.subr.msk.bf16.mxu1 %vm6112_vm0, %v12340_v53  ;;  %v12388_v53 = vld [vmem:[%s16928_s1 + $0x1ce0] ss:$12 sps:$4 sm:$0xff]  }
 0x6d3   :  { %8629 = vmatpush1.bf16.xpose.msra.mxu0 %v12337_v55  ;;  %v12391_v55 = vld [vmem:[%s16928_s1 + $0x1c08] ss:$12 sps:$4 sm:$0xff]  }
 0x6d4   :  { %8630 = vmatprep.subr.bf16.mxu0 %v12344_v56  ;;  %v12399_v56 = vld [vmem:[%s16928_s1 + $0x1bf4] ss:$12 sps:$4 sm:$0xff]  }
 0x6d5   :  { %10977 = vmatpush3.bf16.xpose.msra.mxu1 %v6996_v58  ;;  %v12394_v58 = vld [vmem:[%s16928_s1 + $0x1cc8] ss:$12 sps:$4 sm:$0xff]  }
 0x6d6   :  { %11155 = vmatprep.subr.msk.bf16.mxu1 %vm6112_vm0, %v12345_v60  ;;  %v12402_v60 = vld [vmem:[%s16928_s1 + $0x1cb4] ss:$12 sps:$4 sm:$0xff]  }
 0x6db   :  { %8631 = vmatpush1.bf16.xpose.msra.mxu0 %v12342_v36  ;;  %v12405_v36 = vld [vmem:[%s16928_s1 + $0x1bdc] ss:$12 sps:$4 sm:$0xff]  }
 0x6dc   :  { %8632 = vmatprep.subr.bf16.mxu0 %v12349_v62  ;;  %v12400_v62 = vld [vmem:[%s16928_s1 + $0x1cb0] ss:$12 sps:$4 sm:$0xff]  }
 0x6dd   :  { %10979 = vmatpush3.bf16.xpose.msra.mxu1 %v6993_v63  ;;  %v12408_v63 = vld [vmem:[%s16928_s1 + $0x1c9c] ss:$12 sps:$4 sm:$0xff]  }
 0x6de   :  { %11156 = vmatprep.subr.msk.bf16.mxu1 %vm6112_vm0, %v12350_v1  ;;  %v12403_v1 = vld [vmem:[%s16928_s1 + $0x1bd8] ss:$12 sps:$4 sm:$0xff]  }
 0x6e3   :  { %8633 = vmatpush1.bf16.xpose.msra.mxu0 %v12347_v2  ;;  %v12406_v2 = vld [vmem:[%s16928_s1 + $0x1c98] ss:$12 sps:$4 sm:$0xff]  }
 0x6e4   :  { %8634 = vmatprep.subr.bf16.mxu0 %v12354_v3  ;;  %v12414_v3 = vld [vmem:[%s16928_s1 + $0x1c84] ss:$12 sps:$4 sm:$0xff]  }
 0x6e5   :  { %10981 = vmatpush3.bf16.xpose.msra.mxu1 %v6990_v5  ;;  %v12409_v5 = vld [vmem:[%s16928_s1 + $0x1bc0] ss:$12 sps:$4 sm:$0xff]  }
 0x6e6   :  { %11157 = vmatprep.subr.msk.bf16.mxu1 %vm6112_vm0, %v12355_v8  ;;  %v12418_v8 = vld [vmem:[%s16928_s1 + $0x1df0] ss:$12 sps:$4 sm:$0xff]  }
 0x6eb   :  { %8635 = vmatpush1.bf16.xpose.msra.mxu0 %v12352_v28  ;;  %v12417_v28 = vld [vmem:[%s16928_s1 + $0x1dec] ss:$12 sps:$4 sm:$0xff]  }
 0x6ec   :  { %8636 = vmatprep.subr.bf16.mxu0 %v12359_v11  ;;  %v12419_v11 = vld [vmem:[%s16928_s1 + $0x1d30] ss:$12 sps:$4 sm:$0xff]  }
 0x6ed   :  { %10983 = vmatpush3.bf16.xpose.msra.mxu1 %v6987_v14  ;;  %v7050_v14 = vsel %vm6112_vm0, %v12419_v11, 0 }
 0x6ee   :  { %11158 = vmatprep.subr.msk.bf16.mxu1 %vm6112_vm0, %v12360_v15  ;;  %v12423_v15 = vld [vmem:[%s16928_s1 + $0x1dd8] ss:$12 sps:$4 sm:$0xff]  }
 0x6f3   :  { %8637 = vmatpush1.bf16.xpose.msra.mxu0 %v12357_v57  ;;  %v12422_v57 = vld [vmem:[%s16928_s1 + $0x1dd4] ss:$12 sps:$4 sm:$0xff]  }
 0x6f4   :  { %8638 = vmatprep.subr.bf16.mxu0 %v12364_v19  ;;  %v12424_v19 = vld [vmem:[%s16928_s1 + $0x1d18] ss:$12 sps:$4 sm:$0xff]  }
 0x6f5   :  { %10985 = vmatpush3.bf16.xpose.msra.mxu1 %v6984_v32  ;;  %v7047_v32 = vsel %vm6112_vm0, %v12424_v19, 0 }
 0x6f6   :  { %11159 = vmatprep.subr.msk.bf16.mxu1 %vm6112_vm0, %v12365_v21  ;;  %v12428_v21 = vld [vmem:[%s16928_s1 + $0x1dc0] ss:$12 sps:$4 sm:$0xff]  }
 0x6fb   :  { %8639 = vmatpush1.bf16.xpose.msra.mxu0 %v12362_v25  ;;  %v12427_v25 = vld [vmem:[%s16928_s1 + $0x1dbc] ss:$12 sps:$4 sm:$0xff]  }
 0x6fc   :  { %8640 = vmatprep.subr.bf16.mxu0 %v12369_v26  ;;  %v12429_v26 = vld [vmem:[%s16928_s1 + $0x1d00] ss:$12 sps:$4 sm:$0xff]  }
 0x6fd   :  { %10987 = vmatpush3.bf16.xpose.msra.mxu1 %v6981_v27  ;;  %v7044_v27 = vsel %vm6112_vm0, %v12429_v26, 0 }
 0x6fe   :  { %8710 = vmatprep.subr.bf16.mxu1 %v12372_v29  ;;  %v12433_v29 = vld [vmem:[%s16928_s1 + $0x1da8] ss:$12 sps:$4 sm:$0xff]  }
 0x703   :  { %8641 = vmatpush2.bf16.xpose.msra.mxu0 %v12367_v33  ;;  %v12425_v33 = vld [vmem:[%s16928_s1 + $0x1db8] ss:$12 sps:$4 sm:$0xff]  }
 0x704   :  { %10989 = vmatmul.mubr.msk.bf16.vlgmr.msra.gmra.mxu1 %vm6112_vm0, %v15453_v7  ;;  %8642 = vmatprep.subr.bf16.mxu0 %v12375_v37  ;;  %v12432_v37 = vld [vmem:[%s16928_s1 + $0x1da4] ss:$12 sps:$4 sm:$0xff]  }
 0x705   :  { %8711 = vmatpush1.bf16.xpose.msra.mxu1 %v12370_v40  ;;  %8742 = vmatprep.mubr.bf16.mxu1 %v15117_v45  ;;  %v12379_v45 = vld [vmem:[%s16928_s1 + $0x1c38] ss:$12 sps:$4 sm:$0xff]   ;;  %v12434_v40 = vld [vmem:[%s16928_s1 + $0x1ce8] ss:$12 sps:$4 sm:$0xff]  }
 0x706   :  { %8712 = vmatprep.subr.bf16.mxu1 %v12378_v49  ;;  %v7041_v49 = vsel %vm6112_vm0, %v12434_v40, 0 }
 0x70b   :  { %8643 = vmatpush2.bf16.xpose.msra.mxu0 %v12373_v59  ;;  %v12438_v59 = vld [vmem:[%s16928_s1 + $0x1d90] ss:$12 sps:$4 sm:$0xff]  }
 0x70c   :  { %8644 = vmatprep.subr.bf16.mxu0 %v12381_v41  ;;  %v12430_v41 = vld [vmem:[%s16928_s1 + $0x1da0] ss:$12 sps:$4 sm:$0xff]  }
 0x70d   :  { %8713 = vmatpush1.bf16.xpose.msra.mxu1 %v12376_v42  ;;  %v12437_v42 = vld [vmem:[%s16928_s1 + $0x1d8c] ss:$12 sps:$4 sm:$0xff]  }
 0x70e   :  { %8714 = vmatprep.subr.bf16.mxu1 %v12384_v47  ;;  %v12439_v47 = vld [vmem:[%s16928_s1 + $0x1cd0] ss:$12 sps:$4 sm:$0xff]  }
 0x713   :  { %8645 = vmatpush2.bf16.xpose.msra.mxu0 %v12379_v45  ;;  %v7038_v45 = vsel %vm6112_vm0, %v12439_v47, 0 }
 0x714   :  { %8646 = vmatprep.subr.bf16.mxu0 %v12387_v22  ;;  %v12443_v22 = vld [vmem:[%s16928_s1 + $0x1d78] ss:$12 sps:$4 sm:$0xff]  }
 0x715   :  { %8715 = vmatpush1.bf16.xpose.msra.mxu1 %v12382_v50  ;;  %v12435_v50 = vld [vmem:[%s16928_s1 + $0x1d88] ss:$12 sps:$4 sm:$0xff]  }
 0x716   :  { %8716 = vmatprep.subr.bf16.mxu1 %v12390_v46  ;;  %v12442_v46 = vld [vmem:[%s16928_s1 + $0x1d74] ss:$12 sps:$4 sm:$0xff]  }
 0x71b   :  { %8647 = vmatpush2.bf16.xpose.msra.mxu0 %v12385_v51  ;;  %v12444_v51 = vld [vmem:[%s16928_s1 + $0x1cb8] ss:$12 sps:$4 sm:$0xff]  }
 0x71c   :  { %8648 = vmatprep.subr.bf16.mxu0 %v12393_v52  ;;  %v7035_v52 = vsel %vm6112_vm0, %v12444_v51, 0 }
 0x71d   :  { %8717 = vmatpush1.bf16.xpose.msra.mxu1 %v12388_v53  ;;  %v12448_v53 = vld [vmem:[%s16928_s1 + $0x1d60] ss:$12 sps:$4 sm:$0xff]  }
 0x71e   :  { %8718 = vmatprep.subr.bf16.mxu1 %v12396_v54  ;;  %v12440_v54 = vld [vmem:[%s16928_s1 + $0x1d70] ss:$12 sps:$4 sm:$0xff]  }
 0x723   :  { %8649 = vmatpush2.bf16.xpose.msra.mxu0 %v12391_v55  ;;  %v12447_v55 = vld [vmem:[%s16928_s1 + $0x1d5c] ss:$12 sps:$4 sm:$0xff]  }
 0x724   :  { %8650 = vmatprep.subr.bf16.mxu0 %v12399_v56  ;;  %v12449_v56 = vld [vmem:[%s16928_s1 + $0x1ca0] ss:$12 sps:$4 sm:$0xff]  }
 0x725   :  { %8719 = vmatpush1.bf16.xpose.msra.mxu1 %v12394_v58  ;;  %v16085_v58 = vpop.f32.mrf.mxu0 }
 0x726   :  { %8720 = vmatprep.subr.bf16.mxu1 %v12402_v60  ;;  %v7032_v60 = vsel %vm6112_vm0, %v12449_v56, 0 }
 0x72b   :  { %8651 = vmatpush2.bf16.xpose.msra.mxu0 %v12397_v61  ;;  %v12453_v61 = vld [vmem:[%s16928_s1 + $0x1d48] ss:$12 sps:$4 sm:$0xff]  }
 0x72c   :  { %8652 = vmatprep.subr.bf16.mxu0 %v12405_v36  ;;  %v12445_v36 = vld [vmem:[%s16928_s1 + $0x1d58] ss:$12 sps:$4 sm:$0xff]  }
 0x72d   :  { %8721 = vmatpush1.bf16.xpose.msra.mxu1 %v12400_v62  ;;  %v16094_v62 = vpop.f32.mrf.mxu1 }
 0x72e   :  { %8722 = vmatprep.subr.bf16.mxu1 %v12408_v63  ;;  %v12452_v63 = vld [vmem:[%s16928_s1 + $0x1d44] ss:$12 sps:$4 sm:$0xff]  }
 0x733   :  { %8653 = vmatpush2.bf16.xpose.msra.mxu0 %v12403_v1  ;;  %v16099_v1 = vpop.f32.mrf.mxu0 }
 0x734   :  { %8654 = vmatprep.subr.bf16.mxu0 %v12411_v35  ;;  %v12454_v35 = vld [vmem:[%s16928_s1 + $0x1c88] ss:$12 sps:$4 sm:$0xff]  }
 0x735   :  { %8723 = vmatpush1.bf16.xpose.msra.mxu1 %v12406_v2  ;;  %v16105_v2 = vpop.f32.mrf.mxu1 }
 0x736   :  { %8724 = vmatprep.subr.bf16.mxu1 %v12414_v3  ;;  %v16107_v3 = vpop.f32.mrf.mxu0 }
 0x73b   :  { %8655 = vmatpush2.bf16.xpose.msra.mxu0 %v12409_v5  ;;  %v7029_v5 = vsel %vm6112_vm0, %v12454_v35, 0 }
 0x73c   :  { %11160 = vmatprep.subr.msk.bf16.mxu0 %vm6112_vm0, %v12418_v8  ;;  %v12450_v8 = vld [vmem:[%s16928_s1 + $0x1d40] ss:$12 sps:$4 sm:$0xff]   ;;  %s12654_s1 = smov [#allocation4]  }
 0x73d   :  { %8725 = vmatpush1.bf16.xpose.msra.mxu1 %v12412_v10  ;;  %v16113_v10 = vpop.f32.mrf.mxu1  ;;  %s9654_s16 = sshll.u32 %s12654_s1, 4  ;;  %s9655_s16 = int_to_ptr.vmem [resolvable:$true] %s9654_s16 }
 0x73e   :  { %8726 = vmatprep.subr.bf16.mxu1 %v12417_v28  ;;  %v16115_v28 = vpop.f32.mrf.mxu0  ;;  %s12632_s17 = scalar_lea.vmem %s9655_s16, 10240  ;;  %p12637_p1 = scmp.lt.s32.totalorder %s9655_s16, %s9655_s16 }
 0x73f   :  { %v16117_v11 = vpop.f32.mrf.mxu1  ;;  %p12633_p0 = scmp.ne.s32.totalorder %s9655_s16, %s12632_s17  ;;  %p12638_p2 = scmp.lt.s32.totalorder %s12632_s17, %s12632_s17 }
 0x741   :  { %p12639_p3 = por %p12638_p2, %p12637_p1 }
 0x742   :  { %8657 = vmatmul.mubr.bf16.vlgmr.msra.gmra.mxu0 %v15334_v12 }
 0x743   :  { %10991 = vmatpush3.bf16.xpose.msra.mxu0 %v7050_v14  ;;  %11006 = vmatprep.mubr.msk.bf16.mxu0 %vm6112_vm0, %v15453_v7  ;;  %v16119_v14 = vpop.f32.mrf.mxu0  ;;  %p12640_p4 = pnand %p12639_p3, %p12633_p0 }
 0x744   :  { %11161 = vmatprep.subr.msk.bf16.mxu0 %vm6112_vm0, %v12423_v15  ;;  %v16121_v15 = vpop.f32.mrf.mxu1 }
 0x745   :  { %8727 = vmatpush2.bf16.xpose.msra.mxu1 %v12415_v17  ;;  %v16123_v17 = vpop.f32.mrf.mxu0 }
 0x746   :  { %8728 = vmatprep.subr.bf16.mxu1 %v12422_v57  ;;  %v16127_v57 = vpop.f32.mrf.mxu1 }
 0x747   :  { %v16130_v19 = vpop.f32.mrf.mxu0 }
 0x74b   :  { %10993 = vmatpush3.bf16.xpose.msra.mxu0 %v7047_v32  ;;  %v16132_v32 = vpop.f32.mrf.mxu1 }
 0x74c   :  { %11162 = vmatprep.subr.msk.bf16.mxu0 %vm6112_vm0, %v12428_v21  ;;  %v16134_v21 = vpop.f32.mrf.mxu0 }
 0x74d   :  { %8729 = vmatpush2.bf16.xpose.msra.mxu1 %v12420_v23  ;;  %v16136_v23 = vpop.f32.mrf.mxu1 }
 0x74e   :  { %8730 = vmatprep.subr.bf16.mxu1 %v12427_v25  ;;  %v16138_v25 = vpop.f32.mrf.mxu0 }
 0x74f   :  { %v16140_v26 = vpop.f32.mrf.mxu1 }
 0x753   :  { %10995 = vmatpush3.bf16.xpose.msra.mxu0 %v7044_v27  ;;  %v16142_v27 = vpop.f32.mrf.mxu0 }
 0x754   :  { %11163 = vmatprep.subr.msk.bf16.mxu0 %vm6112_vm0, %v12433_v29  ;;  %v16144_v29 = vpop.f32.mrf.mxu1 }
 0x755   :  { %8731 = vmatpush2.bf16.xpose.msra.mxu1 %v12425_v33 }
 0x756   :  { %8732 = vmatprep.subr.bf16.mxu1 %v12432_v37  ;;  %v16148_v33 = vpop.f32.mrf.mxu1 }
 0x758   :  { %v16152_v37 = vpop.f32.mrf.mxu1 }
 0x75b   :  { %10997 = vmatpush3.bf16.xpose.msra.mxu0 %v7041_v49  ;;  %v16156_v49 = vpop.f32.mrf.mxu1 }
 0x75c   :  { %11164 = vmatprep.subr.msk.bf16.mxu0 %vm6112_vm0, %v12438_v59 }
 0x75d   :  { %8733 = vmatpush2.bf16.xpose.msra.mxu1 %v12430_v41  ;;  %v16160_v41 = vpop.f32.mrf.mxu1 }
 0x75e   :  { %8734 = vmatprep.subr.bf16.mxu1 %v12437_v42 }
 0x75f   :  { %v16164_v47 = vpop.f32.mrf.mxu1 }
 0x763   :  { %10999 = vmatpush3.bf16.xpose.msra.mxu0 %v7038_v45 }
 0x764   :  { %11165 = vmatprep.subr.msk.bf16.mxu0 %vm6112_vm0, %v12443_v22  ;;  %v16168_v22 = vpop.f32.mrf.mxu1 }
 0x765   :  { %8735 = vmatpush2.bf16.xpose.msra.mxu1 %v12435_v50 }
 0x766   :  { %8736 = vmatprep.subr.bf16.mxu1 %v12442_v46  ;;  %v16172_v46 = vpop.f32.mrf.mxu1 }
 0x76b   :  { %11001 = vmatpush3.bf16.xpose.msra.mxu0 %v7035_v52  ;;  %v16176_v52 = vpop.f32.mrf.mxu1 }
 0x76c   :  { %11166 = vmatprep.subr.msk.bf16.mxu0 %vm6112_vm0, %v12448_v53 }
 0x76d   :  { %8737 = vmatpush2.bf16.xpose.msra.mxu1 %v12440_v54  ;;  %v16180_v54 = vpop.f32.mrf.mxu1 }
 0x76e   :  { %8738 = vmatprep.subr.bf16.mxu1 %v12447_v55  ;;  %17023 = vst [vmem:[#allocation21_spill] sm:$0xff] %v16180_v54 }
 0x76f   :  { %v16184_v56 = vpop.f32.mrf.mxu1 }
 0x770   :  { %17025 = vst [vmem:[#allocation23_spill] sm:$0xff] %v16184_v56 }
 0x773   :  { %11003 = vmatpush3.bf16.xpose.msra.mxu0 %v7032_v60 }
 0x774   :  { %11167 = vmatprep.subr.msk.bf16.mxu0 %vm6112_vm0, %v12453_v61  ;;  %v16188_v61 = vpop.f32.mrf.mxu1 }
 0x775   :  { %8739 = vmatpush2.bf16.xpose.msra.mxu1 %v12445_v36  ;;  %17027 = vst [vmem:[#allocation25_spill] sm:$0xff] %v16188_v61 }
 0x776   :  { %8740 = vmatprep.subr.bf16.mxu1 %v12452_v63  ;;  %v16192_v63 = vpop.f32.mrf.mxu1 }
 0x777   :  { %17029 = vst [vmem:[#allocation27_spill] sm:$0xff] %v16192_v63 }
 0x77b   :  { %11005 = vmatpush3.bf16.xpose.msra.mxu0 %v7029_v5  ;;  %v16196_v5 = vpop.f32.mrf.mxu1 }
 0x77c   :  { %17031 = vst [vmem:[#allocation29_spill] sm:$0xff] %v16196_v5 }
 0x77d   :  { %8741 = vmatpush2.bf16.xpose.msra.mxu1 %v12450_v8 }
 0x782   :  { %11007 = vmatmul.mubr.msk.bf16.vlgmr.msra.gmra.mxu0 %vm6112_vm0, %v15453_v7  ;;  %v16146_v7 = vpop.f32.mrf.mxu0 }
 0x784   :  { %8743 = vmatmul.mubr.bf16.vlgmr.msra.gmra.mxu1 %v15334_v12  ;;  %v16150_v12 = vpop.f32.mrf.mxu0 }
 0x786   :  { %v16154_v40 = vpop.f32.mrf.mxu0 }
 0x788   :  { %v16158_v59 = vpop.f32.mrf.mxu0 }
 0x78a   :  { %v16162_v42 = vpop.f32.mrf.mxu0 }
 0x78c   :  { %v16166_v45 = vpop.f32.mrf.mxu0 }
 0x78e   :  { %v16170_v50 = vpop.f32.mrf.mxu0 }
 0x790   :  { %v16174_v51 = vpop.f32.mrf.mxu0 }
 0x792   :  { %v16178_v53 = vpop.f32.mrf.mxu0 }
 0x793   :  { %17022 = vst [vmem:[#allocation20_spill] sm:$0xff] %v16178_v53  ;;  %v16200_v53 = vpop.f32.mrf.mxu1 }
 0x794   :  { %v16182_v55 = vpop.f32.mrf.mxu0  ;;  %17033 = vst [vmem:[#allocation31_spill] sm:$0xff] %v16200_v53 }
 0x795   :  { %17024 = vst [vmem:[#allocation22_spill] sm:$0xff] %v16182_v55  ;;  %v16204_v55 = vpop.f32.mrf.mxu1 }
 0x796   :  { %v16186_v60 = vpop.f32.mrf.mxu0 }
 0x797   :  { %17026 = vst [vmem:[#allocation24_spill] sm:$0xff] %v16186_v60  ;;  %v16208_v60 = vpop.f32.mrf.mxu1 }
 0x798   :  { %v16190_v36 = vpop.f32.mrf.mxu0  ;;  %17036 = vst [vmem:[#allocation34_spill] sm:$0xff] %v16208_v60 }
 0x799   :  { %17028 = vst [vmem:[#allocation26_spill] sm:$0xff] %v16190_v36  ;;  %v16212_v36 = vpop.f32.mrf.mxu1 }
 0x79a   :  { %v16194_v35 = vpop.f32.mrf.mxu0  ;;  %17038 = vst [vmem:[#allocation36_spill] sm:$0xff] %v16212_v36 }
 0x79b   :  { %17030 = vst [vmem:[#allocation28_spill] sm:$0xff] %v16194_v35  ;;  %v16216_v35 = vpop.f32.mrf.mxu1 }
 0x79c   :  { %v16198_v8 = vpop.f32.mrf.mxu0  ;;  %17040 = vst [vmem:[#allocation38_spill] sm:$0xff] %v16216_v35  ;;  %v9120_v35 = vmax.f32 %v13282_v16, %v13288_v20 }
 0x79d   :  { %17032 = vst [vmem:[#allocation30_spill] sm:$0xff] %v16198_v8  ;;  %v16220_v8 = vpop.f32.mrf.mxu1 }
 0x79e   :  { %v16202_v54 = vpop.f32.mrf.mxu0 }
 0x79f   :  { %17034 = vst [vmem:[#allocation32_spill] sm:$0xff] %v16202_v54  ;;  %v16224_v54 = vpop.f32.mrf.mxu1 }
 0x7a0   :  { %v16206_v56 = vpop.f32.mrf.mxu0  ;;  %17043 = vst [vmem:[#allocation41_spill] sm:$0xff] %v16224_v54  ;;  %v16241_v54 = vadd.f32 %v13622_v24, %v13610_v18 }
 0x7a1   :  { %17035 = vst [vmem:[#allocation33_spill] sm:$0xff] %v16206_v56  ;;  %v9079_v56 = vmax.f32 %v13269_v9, %v13277_v13  ;;  %v16231_v36 = vpop.f32.mrf.mxu1 }
 0x7a2   :  { %v16210_v61 = vpop.f32.mrf.mxu0  ;;  %17044 = vst [vmem:[#allocation42_spill] sm:$0xff] %v16241_v54 }
 0x7a3   :  { %17037 = vst [vmem:[#allocation35_spill] sm:$0xff] %v16210_v61  ;;  %v9080_v61 = vmax.f32 %v13403_v0, %v9079_v56  ;;  %v16243_v13 = vpop.f32.mrf.mxu1 }
 0x7a4   :  { %v16214_v63 = vpop.f32.mrf.mxu0 }
 0x7a5   :  { %17039 = vst [vmem:[#allocation37_spill] sm:$0xff] %v16214_v63  ;;  %v16248_v0 = vpop.f32.mrf.mxu1 }
 0x7a6   :  { %v16218_v5 = vpop.f32.mrf.mxu0 }
 0x7a7   :  { %17041 = vst [vmem:[#allocation39_spill] sm:$0xff] %v16218_v5  ;;  %v9081_v5 = vmax.f32 %v13414_v4, %v9080_v61 }
 0x7a8   :  { %v16222_v53 = vpop.f32.mrf.mxu0 }
 0x7a9   :  { %17042 = vst [vmem:[#allocation40_spill] sm:$0xff] %v16222_v53  ;;  %v9121_v53 = vmax.f32 %v13416_v6, %v9120_v35  ;;  %v9082_v56 = vmax.f32 %v13634_v30, %v9081_v5  ;;  %v16255_v6 = vpop.f32.mrf.mxu1  ;;  %v16263_v5 = vadd.f32 %v16094_v62, %v16085_v58 }
 0x7aa   :  { %v16228_v60 = vpop.f32.mrf.mxu0 }
 0x7ab   :  { %v9122_v20 = vmax.f32 %v16241_v54, %v9121_v53  ;;  %v9083_v61 = vmax.f32 %v13642_v34, %v9082_v56  ;;  %17045 = vst [vmem:[#allocation43_spill] sm:$0xff] %v16263_v5  ;;  %v16265_v30 = vpop.f32.mrf.mxu1 }
 0x7ac   :  { %v16235_v63 = vpop.f32.mrf.mxu0 }
 0x7ad   :  { %v9123_v35 = vmax.f32 %v13647_v39, %v9122_v20  ;;  %v9084_v18 = vmax.f32 %v13765_v31, %v9083_v61  ;;  %v16274_v61 = vadd.f32 %v16105_v2, %v16099_v1  ;;  %v16280_v58 = vpop.f32.mrf.mxu1  ;;  %v16295_v2 = vadd.f32 %v16117_v11, %v16115_v28  ;;  %v17083_v39 = vld [vmem:[#allocation34_spill] sm:$0xff] }
 0x7ae   :  { %v16245_v9 = vpop.f32.mrf.mxu0  ;;  %v16313_v28 = vadd.f32 %v16140_v26, %v16138_v25  ;;  %v16332_v25 = vadd.f32 %v16148_v33, %v16146_v7 }
 0x7af   :  { %v9124_v4 = vmax.f32 %v13653_v43, %v9123_v35  ;;  %v9085_v53 = vmax.f32 %v13773_v38, %v9084_v18  ;;  %17046 = vst [vmem:[#allocation44_spill] sm:$0xff] %v16274_v61  ;;  %v16278_v35 = vadd.f32 %v16113_v10, %v16107_v3  ;;  %17049 = vst [vmem:[#allocation47_spill] sm:$0xff] %v16295_v2 }
 0x7b0   :  { %v16251_v16 = vpop.f32.mrf.mxu0  ;;  %17052 = vst [vmem:[#allocation50_spill] sm:$0xff] %v16313_v28  ;;  %17055 = vst [vmem:[#allocation53_spill] sm:$0xff] %v16332_v25 }
 0x7b1   :  { %v9125_v56 = vmax.f32 %v13781_v44, %v9124_v4  ;;  %v9086_v20 = vmax.f32 %v16263_v5, %v9085_v53  ;;  %17047 = vst [vmem:[#allocation45_spill] sm:$0xff] %v16278_v35  ;;  %v16287_v4 = vadd.f32 %v16119_v14, %v16121_v15  ;;  %v16289_v44 = vpop.f32.mrf.mxu1  ;;  %v16306_v14 = vadd.f32 %v16130_v19, %v16132_v32 }
 0x7b2   :  { %v16258_v24 = vpop.f32.mrf.mxu0  ;;  %v16328_v32 = vadd.f32 %v16144_v29, %v16142_v27  ;;  %v16349_v29 = vadd.f32 %v16152_v37, %v16150_v12  ;;  %v16367_v12 = vadd.f32 %v16172_v46, %v16170_v50  ;;  %v17063_v50 = vld [vmem:[#allocation20_spill] sm:$0xff]  ;;  %v17064_v46 = vld [vmem:[#allocation21_spill] sm:$0xff] }
 0x7b3   :  { %v9126_v18 = vmax.f32 %v13787_v48, %v9125_v56  ;;  %17048 = vst [vmem:[#allocation46_spill] sm:$0xff] %v16287_v4  ;;  %v9087_v53 = vmax.f32 %v16274_v61, %v9086_v20  ;;  %v16302_v56 = vadd.f32 %v16123_v17, %v16127_v57  ;;  %17051 = vst [vmem:[#allocation49_spill] sm:$0xff] %v16306_v14  ;;  %v16308_v15 = vpop.f32.mrf.mxu1  ;;  %v17080_v48 = vld [vmem:[#allocation31_spill] sm:$0xff] }
 0x7b4   :  { %v16269_v54 = vpop.f32.mrf.mxu0  ;;  %v16321_v17 = vadd.f32 %v16134_v21, %v16136_v23  ;;  %17054 = vst [vmem:[#allocation52_spill] sm:$0xff] %v16328_v32  ;;  %v16339_v21 = vadd.f32 %v16154_v40, %v16156_v49  ;;  %17057 = vst [vmem:[#allocation55_spill] sm:$0xff] %v16349_v29  ;;  %v16356_v40 = vadd.f32 %v16158_v59, %v16160_v41 }
 0x7b5   :  { %v9127_v1 = vmax.f32 %v16278_v35, %v9126_v18  ;;  %v9088_v10 = vmax.f32 %v16287_v4, %v9087_v53  ;;  %17050 = vst [vmem:[#allocation48_spill] sm:$0xff] %v16302_v56  ;;  %v16323_v57 = vpop.f32.mrf.mxu1  ;;  %v16360_v49 = vadd.f32 %v16162_v42, %v16164_v47  ;;  %17060 = vst [vmem:[#allocation58_spill] sm:$0xff] %v16367_v12 }
 0x7b6   :  { %v16282_v62 = vpop.f32.mrf.mxu0  ;;  %17053 = vst [vmem:[#allocation51_spill] sm:$0xff] %v16321_v17  ;;  %17056 = vst [vmem:[#allocation54_spill] sm:$0xff] %v16339_v21  ;;  %v16375_v59 = vadd.f32 %v16166_v45, %v16168_v22  ;;  %v16382_v47 = vadd.f32 %v16176_v52, %v16174_v51  ;;  %v17069_v51 = vld [vmem:[#allocation22_spill] sm:$0xff]  ;;  %v17070_v52 = vld [vmem:[#allocation23_spill] sm:$0xff] }
 0x7b7   :  { %v9128_v20 = vmax.f32 %v16295_v2, %v9127_v1  ;;  %v9089_v18 = vmax.f32 %v16302_v56, %v9088_v10  ;;  %v16341_v23 = vpop.f32.mrf.mxu1  ;;  %17058 = vst [vmem:[#allocation56_spill] sm:$0xff] %v16356_v40  ;;  %17059 = vst [vmem:[#allocation57_spill] sm:$0xff] %v16360_v49 }
 0x7b8   :  { %v16297_v3 = vpop.f32.mrf.mxu0  ;;  %17061 = vst [vmem:[#allocation59_spill] sm:$0xff] %v16375_v59  ;;  %17062 = vst [vmem:[#allocation60_spill] sm:$0xff] %v16382_v47 }
 0x7b9   :  { %v9129_v53 = vmax.f32 %v16306_v14, %v9128_v20  ;;  %v9090_v19 = vmax.f32 %v16313_v28, %v9089_v18  ;;  %v16351_v7 = vpop.f32.mrf.mxu1  ;;  %v17076_v14 = vld [vmem:[#allocation28_spill] sm:$0xff] }
 0x7ba   :  { %v16315_v11 = vpop.f32.mrf.mxu0 }
 0x7bb   :  { %v9130_v1 = vmax.f32 %v16321_v17, %v9129_v53  ;;  %v9091_v20 = vmax.f32 %v16328_v32, %v9090_v19  ;;  %v16369_v37 = vpop.f32.mrf.mxu1  ;;  %v17073_v17 = vld [vmem:[#allocation26_spill] sm:$0xff] }
 0x7bc   :  { %v16334_v26 = vpop.f32.mrf.mxu0 }
 0x7bd   :  { %v9131_v27 = vmax.f32 %v16332_v25, %v9130_v1  ;;  %v9092_v33 = vmax.f32 %v16339_v21, %v9091_v20  ;;  %v16386_v20 = vadd.f32 %v17064_v46, %v17063_v50  ;;  %v16401_v25 = vadd.f32 %v17070_v52, %v17069_v51 }
 0x7be   :  { %v16343_v10 = vpop.f32.mrf.mxu0 }
 0x7bf   :  { %v9132_v53 = vmax.f32 %v16349_v29, %v9131_v27  ;;  %v9093_v19 = vmax.f32 %v16356_v40, %v9092_v33  ;;  %17065 = vst [vmem:[#allocation20_spill] sm:$0xff] %v16386_v20  ;;  %v16388_v27 = vpop.f32.mrf.mxu1 }
 0x7c0   :  { %v16362_v18 = vpop.f32.mrf.mxu0 }
 0x7c1   :  { %v9133_v1 = vmax.f32 %v16360_v49, %v9132_v53  ;;  %v9094_v42 = vmax.f32 %v16367_v12, %v9093_v19  ;;  %v17066_v53 = vld [vmem:[#allocation25_spill] sm:$0xff]  ;;  %v17067_v49 = vld [vmem:[#allocation24_spill] sm:$0xff]  ;;  %v16403_v50 = vpop.f32.mrf.mxu1 }
 0x7c2   :  { %v16377_v41 = vpop.f32.mrf.mxu0  ;;  %v16393_v45 = vadd.f32 %v17067_v49, %v17066_v53  ;;  %17071 = vst [vmem:[#allocation25_spill] sm:$0xff] %v16401_v25  ;;  %v17075_v53 = vld [vmem:[#allocation29_spill] sm:$0xff] }
 0x7c3   :  { %v9134_v33 = vmax.f32 %v16375_v59, %v9133_v1  ;;  %v9095_v19 = vmax.f32 %v16382_v47, %v9094_v42  ;;  %v17072_v59 = vld [vmem:[#allocation27_spill] sm:$0xff]  ;;  %v16414_v2 = vadd.f32 %v17076_v14, %v17075_v53  ;;  %v8400_v42 = vpop.f32.mrf.mxu1  ;;  %v17082_v53 = vld [vmem:[#allocation33_spill] sm:$0xff]  ;;  %v17091_v47 = vld [vmem:[#allocation40_spill] sm:$0xff] }
 0x7c4   :  { %17068 = vst [vmem:[#allocation21_spill] sm:$0xff] %v16393_v45  ;;  %v16395_v22 = vpop.f32.mrf.mxu0  ;;  %v16410_v49 = vadd.f32 %v17073_v17, %v17072_v59  ;;  %v17081_v17 = vld [vmem:[#allocation30_spill] sm:$0xff] }
 0x7c5   :  { %v9135_v29 = vmax.f32 %v16386_v20, %v9134_v33  ;;  %v9096_v1 = vmax.f32 %v16393_v45, %v9095_v19  ;;  %17077 = vst [vmem:[#allocation22_spill] sm:$0xff] %v16414_v2  ;;  %v17078_v20 = vld [vmem:[#allocation32_spill] sm:$0xff]  ;;  %v16427_v59 = vadd.f32 %v17081_v17, %v17080_v48  ;;  %v8402_v43 = vpop.f32.mrf.mxu1 }
 0x7c6   :  { %v16405_v46 = vpop.f32.mrf.mxu0  ;;  %17074 = vst [vmem:[#allocation24_spill] sm:$0xff] %v16410_v49  ;;  %v16419_v51 = vadd.f32 %v16204_v55, %v17078_v20  ;;  %v17086_v55 = vld [vmem:[#allocation36_spill] sm:$0xff] }
 0x7c7   :  { %v9136_v33 = vmax.f32 %v16401_v25, %v9135_v29  ;;  %v9097_v35 = vmax.f32 %v16410_v49, %v9096_v1  ;;  %v16432_v29 = vadd.f32 %v17083_v39, %v17082_v53  ;;  %v17085_v25 = vld [vmem:[#allocation35_spill] sm:$0xff]  ;;  %v8404_v48 = vpop.f32.mrf.mxu1  ;;  %v17089_v49 = vld [vmem:[#allocation38_spill] sm:$0xff] }
 0x7c8   :  { %17079 = vst [vmem:[#allocation23_spill] sm:$0xff] %v16419_v51  ;;  %v16421_v52 = vpop.f32.mrf.mxu0  ;;  %v16436_v20 = vadd.f32 %v17086_v55, %v17085_v25  ;;  %v17090_v55 = vld [vmem:[#allocation41_spill] sm:$0xff] }
 0x7c9   :  { %v9137_v19 = vmax.f32 %v16414_v2, %v9136_v33  ;;  %v9098_v14 = vmax.f32 %v16419_v51, %v9097_v35  ;;  %17084 = vst [vmem:[#allocation27_spill] sm:$0xff] %v16432_v29  ;;  %v17087_v33 = vld [vmem:[#allocation39_spill] sm:$0xff]  ;;  %v17088_v51 = vld [vmem:[#allocation37_spill] sm:$0xff]  ;;  %v16452_v12 = vadd.f32 %v17091_v47, %v17090_v55  ;;  %v16467_v47 = vadd.f32 %v16235_v63, %v16243_v13 }
 0x7ca   :  { %v8447_v45 = vpop.f32.mrf.mxu0  ;;  %v16441_v2 = vadd.f32 %v17087_v33, %v16220_v8  ;;  %v16447_v39 = vadd.f32 %v17089_v49, %v17088_v51  ;;  %v16456_v8 = vadd.f32 %v16228_v60, %v16231_v36  ;;  %v16472_v36 = vadd.f32 %v16255_v6, %v16251_v16 }
 0x7cb   :  { %v9138_v1 = vmax.f32 %v16427_v59, %v9137_v19  ;;  %v9099_v17 = vmax.f32 %v16432_v29, %v9098_v14  ;;  %17092 = vst [vmem:[#allocation26_spill] sm:$0xff] %v16452_v12  ;;  %v8406_v19 = vpop.f32.mrf.mxu1  ;;  %v16487_v16 = vadd.f32 %v16280_v58, %v16269_v54 }
 0x7cc   :  { %v8449_v53 = vpop.f32.mrf.mxu0 }
 0x7cd   :  { %v9139_v35 = vmax.f32 %v16436_v20, %v9138_v1  ;;  %v9100_v25 = vmax.f32 %v16441_v2, %v9099_v17  ;;  %v16461_v1 = vadd.f32 %v16248_v0, %v16245_v9  ;;  %v8529_v49 = vpop.f32.mrf.mxu1  ;;  %v16476_v9 = vadd.f32 %v16265_v30, %v16258_v24 }
 0x7ce   :  { %v8486_v33 = vpop.f32.mrf.mxu0  ;;  %v16492_v24 = vadd.f32 %v16297_v3, %v16308_v15  ;;  %v16507_v3 = vadd.f32 %v16334_v26, %v16341_v23 }
 0x7cf   :  { %v9140_v14 = vmax.f32 %v16447_v39, %v9139_v35  ;;  %v9101_v51 = vmax.f32 %v16452_v12, %v9100_v25  ;;  %v8531_v0 = vpop.f32.mrf.mxu1  ;;  %v16481_v25 = vadd.f32 %v16282_v62, %v16289_v44  ;;  %v16496_v44 = vadd.f32 %v16315_v11, %v16323_v57 }
 0x7d0   :  { %v8488_v55 = vpop.f32.mrf.mxu0  ;;  %v16512_v57 = vadd.f32 %v16369_v37, %v16362_v18 }
 0x7d1   :  { %v9141_v17 = vmax.f32 %v16456_v8, %v9140_v14  ;;  %v9102_v60 = vmax.f32 %v16461_v1, %v9101_v51  ;;  %v8533_v6 = vpop.f32.mrf.mxu1 }
 0x7d2   :  { %v8490_v13 = vpop.f32.mrf.mxu0  ;;  %17093 = vst [vmem:[#allocation29_spill] sm:$0xff] %v16512_v57 }
 0x7d3   :  { %v9142_v35 = vmax.f32 %v16467_v47, %v9141_v17  ;;  %v9103_v63 = vmax.f32 %v16472_v36, %v9102_v60  ;;  %v16501_v17 = vadd.f32 %v16351_v7, %v16343_v10  ;;  %v8535_v54 = vpop.f32.mrf.mxu1  ;;  %v16516_v10 = vadd.f32 %v16388_v27, %v16377_v41 }
 0x7d4   :  { %v8492_v62 = vpop.f32.mrf.mxu0  ;;  %v16530_v41 = vadd.f32 %v16421_v52, %v8402_v43  ;;  %v16532_v27 = vadd.f32 %v8447_v45, %v8404_v48  ;;  %v16542_v43 = vadd.f32 %v8531_v0, %v8488_v55  ;;  %v16544_v45 = vadd.f32 %v8533_v6, %v8490_v13 }
 0x7d5   :  { %v9143_v14 = vmax.f32 %v16476_v9, %v9142_v35  ;;  %v9104_v30 = vmax.f32 %v16481_v25, %v9103_v63  ;;  %v8572_v15 = vpop.f32.mrf.mxu1  ;;  %17094 = vst [vmem:[#allocation28_spill] sm:$0xff] %v16516_v10 }
 0x7d6   :  { %v8615_v58 = vpop.f32.mrf.mxu0  ;;  %17096 = vst [vmem:[#allocation31_spill] sm:$0xff] %v16530_v41 }
 0x7d7   :  { %v9144_v51 = vmax.f32 %v16487_v16, %v9143_v14  ;;  %v9105_v60 = vmax.f32 %v16492_v24, %v9104_v30  ;;  %v16520_v14 = vadd.f32 %v16405_v46, %v8400_v42  ;;  %v8574_v30 = vpop.f32.mrf.mxu1  ;;  %v16535_v42 = vadd.f32 %v8529_v49, %v8486_v33 }
 0x7d8   :  { %v8617_v7 = vpop.f32.mrf.mxu0  ;;  %v16547_v33 = vadd.f32 %v8615_v58, %v8572_v15 }
 0x7d9   :  { %v9145_v35 = vmax.f32 %v16496_v44, %v9144_v51  ;;  %v9106_v11 = vmax.f32 %v16501_v17, %v9105_v60  ;;  %17095 = vst [vmem:[#allocation32_spill] sm:$0xff] %v16520_v14  ;;  %v16526_v51 = vadd.f32 %v16403_v50, %v16395_v22  ;;  %v8576_v60 = vpop.f32.mrf.mxu1  ;;  %17097 = vst [vmem:[#allocation30_spill] sm:$0xff] %v16535_v42 }
 0x7da   :  { %v8619_v18 = vpop.f32.mrf.mxu0  ;;  %v16539_v22 = vadd.f32 %v8449_v53, %v8406_v19  ;;  %v16551_v53 = vadd.f32 %v8535_v54, %v8492_v62  ;;  %v16554_v55 = vadd.f32 %v8617_v7, %v8574_v30 }
 0x7db   :  { %v9146_v63 = vmax.f32 %v16507_v3, %v9145_v35  ;;  %v9107_v26 = vmax.f32 %v16512_v57, %v9106_v11  ;;  %v8578_v50 = vpop.f32.mrf.mxu1  ;;  %v16556_v0 = vadd.f32 %v8619_v18, %v8576_v60 }
 0x7dc   :  { %v8621_v35 = vpop.f32.mrf.mxu0 }
 0x7dd   :  { %v9147_v23 = vmax.f32 %v16516_v10, %v9146_v63  ;;  %v9108_v37 = vmax.f32 %v16520_v14, %v9107_v26  ;;  %v8701_v52 = vpop.f32.mrf.mxu1  ;;  %v16563_v54 = vadd.f32 %v8621_v35, %v8578_v50 }
 0x7df   :  { %v9148_v46 = vmax.f32 %v16526_v51, %v9147_v23  ;;  %v9109_v11 = vmax.f32 %v16530_v41, %v9108_v37  ;;  %v8703_v19 = vpop.f32.mrf.mxu1  ;;  %17098 = vst [vmem:[#allocation33_spill] sm:$0xff] %v16563_v54 }
 0x7e1   :  { %v9149_v63 = vmax.f32 %v16532_v27, %v9148_v46  ;;  %v9110_v26 = vmax.f32 %v16535_v42, %v9109_v11  ;;  %v8796_v46 = vlaneseq  ;;  %v8705_v15 = vpop.f32.mrf.mxu1 }
 0x7e3   :  { %v9150_v48 = vmax.f32 %v16539_v22, %v9149_v63  ;;  %v9111_v23 = vmax.f32 %v16542_v43, %v9110_v26  ;;  %v8797_v63 = vand.u32 127, %v8796_v46  ;;  %v8707_v18 = vpop.f32.mrf.mxu1 }
 0x7e5   :  { %v9151_v37 = vmax.f32 %v16544_v45, %v9150_v48  ;;  %v9112_v11 = vmax.f32 %v16547_v33, %v9111_v23 }
 0x7e7   :  { %v9152_v6 = vmax.f32 %v16551_v53, %v9151_v37  ;;  %v9113_v26 = vmax.f32 %v16554_v55, %v9112_v11  ;;  %v8836_v37 = vadd.s32 4992, %v8797_v63 }
 0x7e9   :  { %v9153_v62 = vmax.f32 %v16556_v0, %v9152_v6  ;;  %vm8918_vm1 = vcmp.lt.s32.totalorder %v8836_v37, 5000 }
 0x802   :  { %v8658_v10 = vpop.f32.mrf.mxu0 }
 0x803   :  { %v16559_v58 = vadd.f32 %v8701_v52, %v8658_v10  ;;  %v9154_v10 = vmax.f32 %v16563_v54, %v9153_v62 }
 0x804   :  { %v8660_v49 = vpop.f32.mrf.mxu0 }
 0x805   :  { %v9114_v23 = vmax.f32 %v16559_v58, %v9113_v26  ;;  %v16566_v7 = vadd.f32 %v8703_v19, %v8660_v49 }
 0x806   :  { %v8662_v13 = vpop.f32.mrf.mxu0 }
 0x807   :  { %v16568_v30 = vadd.f32 %v8705_v15, %v8662_v13  ;;  %v9115_v11 = vmax.f32 %v16566_v7, %v9114_v23 }
 0x808   :  { %v8664_v48 = vpop.f32.mrf.mxu0 }
 0x809   :  { %v9155_v6 = vmax.f32 %v16568_v30, %v9154_v10  ;;  %v16573_v35 = vadd.f32 %v8707_v18, %v8664_v48 }
 0x80b   :  { %v9156_v62 = vmax.f32 %v16573_v35, %v9155_v6 }
 0x842   :  { %v8787_v60 = vpop.f32.mrf.mxu0 }
 0x844   :  { %v8744_v52 = vpop.f32.mrf.mxu1  ;;  %v8789_v46 = vpop.f32.mrf.mxu0 }
 0x845   :  { %v16575_v50 = vadd.f32 %v8787_v60, %v8744_v52 }
 0x846   :  { %v8746_v26 = vpop.f32.mrf.mxu1  ;;  %v8791_v49 = vpop.f32.mrf.mxu0 }
 0x847   :  { %v9116_v19 = vmax.f32 %v16575_v50, %v9115_v11  ;;  %v16578_v13 = vadd.f32 %v8789_v46, %v8746_v26  ;;  %v17101_v11 = vld [vmem:[#allocation7_spill] sm:$0xff]  ;;  %v17102_v26 = vld [vmem:[#allocation8_spill] sm:$0xff] }
 0x848   :  { %v8748_v15 = vpop.f32.mrf.mxu1  ;;  %v8793_v63 = vpop.f32.mrf.mxu0 }
 0x849   :  { %17099 = vst [vmem:[#allocation34_spill] sm:$0xff] %v16578_v13  ;;  %v16582_v54 = vsel %vm8918_vm1, %v16578_v13, -1e+30  ;;  %v16584_v23 = vadd.f32 %v8791_v49, %v8748_v15 }
 0x84a   :  { %v9117_v48 = vmax.f32 %v16582_v54, %v9116_v19  ;;  %v8750_v18 = vpop.f32.mrf.mxu1  ;;  %v17103_v19 = vld [vmem:[#allocation11_spill] sm:$0xff] }
 0x84b   :  { %v9157_v60 = vmax.f32 %v16584_v23, %v9156_v62  ;;  %v16588_v37 = vadd.f32 %v8793_v63, %v8750_v18  ;;  %v17104_v63 = vld [vmem:[#allocation12_spill] sm:$0xff] }
 0x84c   :  { %9118 = vmax.xlane.f32.xlu0 %v9117_v48 }
 0x84d   :  { %17100 = vst [vmem:[#allocation35_spill] sm:$0xff] %v16588_v37  ;;  %v16591_v10 = vsel %vm8918_vm1, %v16588_v37, -1e+30  ;;  %v17105_v37 = vld [vmem:[#allocation14_spill] sm:$0xff] }
 0x84e   :  { %v9158_v52 = vmax.f32 %v16591_v10, %v9157_v60 }
 0x850   :  { %9159 = vmax.xlane.f32.xlu0 %v9158_v52 }
 0x8d5   :  { %v16594_v46 = vpop.xlane.xlu0 %9118 }
 0x8d6   :  { %v9161_v6 = vsub.f32 %v17101_v11, %v16594_v46  ;;  %v9162_v49 = vsub.f32 %v17102_v26, %v16594_v46  ;;  %v9163_v15 = vsub.f32 %v17103_v19, %v16594_v46  ;;  %v9164_v62 = vsub.f32 %v17104_v63, %v16594_v46 }
 0x8d7   :  { %v9165_v60 = vsub.f32 %v17105_v37, %v16594_v46  ;;  %v9166_v13 = vsub.f32 %v13642_v34, %v16594_v46  ;;  %v9167_v26 = vsub.f32 %v13765_v31, %v16594_v46  ;;  %v9168_v63 = vsub.f32 %v13773_v38, %v16594_v46 }
 0x8d8   :  { %v9241_v48 = vmul.f32 1.442695, %v9161_v6  ;;  %v9243_v18 = vmul.f32 1.442695, %v9162_v49  ;;  %v9245_v52 = vmul.f32 1.442695, %v9163_v15  ;;  %v9169_v49 = vsub.f32 %v16263_v5, %v16594_v46 }
 0x8d9   :  { %v9247_v11 = vmul.f32 1.442695, %v9164_v62  ;;  %v9249_v19 = vmul.f32 1.442695, %v9165_v60  ;;  %v9251_v6 = vmul.f32 1.442695, %v9166_v13 }
 0x8da   :  { %12455 = vpow2.f32 %v9241_v48  ;;  %v9253_v15 = vmul.f32 1.442695, %v9167_v26  ;;  %v9170_v48 = vsub.f32 %v16274_v61, %v16594_v46  ;;  %v9255_v62 = vmul.f32 1.442695, %v9168_v63 }
 0x8db   :  { %12457 = vpow2.f32 %v9243_v18  ;;  %v9171_v18 = vsub.f32 %v16287_v4, %v16594_v46  ;;  %v9257_v60 = vmul.f32 1.442695, %v9169_v49  ;;  %v9173_v26 = vsub.f32 %v16313_v28, %v16594_v46  ;;  %v16634_v28 = vpop.xlane.xlu0 %9159 }
 0x8dc   :  { %12459 = vpow2.f32 %v9245_v52  ;;  %v9259_v13 = vmul.f32 1.442695, %v9170_v48  ;;  %v9174_v63 = vsub.f32 %v16328_v32, %v16594_v46  ;;  %v17106_v32 = vld [vmem:[#allocation58_spill] sm:$0xff] }
 0x8dd   :  { %12461 = vpow2.f32 %v9247_v11  ;;  %v9172_v11 = vsub.f32 %v16302_v56, %v16594_v46  ;;  %v9175_v56 = vsub.f32 %v16339_v21, %v16594_v46  ;;  %v9265_v48 = vmul.f32 1.442695, %v9173_v26  ;;  %v17107_v21 = vld [vmem:[#allocation60_spill] sm:$0xff] }
 0x8de   :  { %12463 = vpow2.f32 %v9249_v19  ;;  %v9261_v19 = vmul.f32 1.442695, %v9171_v18 }
 0x8df   :  { %12465 = vpow2.f32 %v9251_v6 }
 0x8e0   :  { %12467 = vpow2.f32 %v9253_v15  ;;  %v9263_v15 = vmul.f32 1.442695, %v9172_v11 }
 0x8e1   :  { %12469 = vpow2.f32 %v9255_v62 }
 0x8e2   :  { %12471 = vpow2.f32 %v9257_v60  ;;  %v9176_v60 = vsub.f32 %v16356_v40, %v16594_v46  ;;  %v17108_v40 = vld [vmem:[#allocation21_spill] sm:$0xff] }
 0x8e3   :  { %12473 = vpow2.f32 %v9259_v13  ;;  %v9177_v13 = vsub.f32 %v17106_v32, %v16594_v46 }
 0x8e4   :  { %12475 = vpow2.f32 %v9261_v19  ;;  %v9178_v19 = vsub.f32 %v17107_v21, %v16594_v46 }
 0x8e5   :  { %12477 = vpow2.f32 %v9263_v15  ;;  %v9179_v15 = vsub.f32 %v17108_v40, %v16594_v46 }
 0x8e6   :  { %12479 = vpow2.f32 %v9265_v48 }
 0x8e7   :  { %v12456_v52 = vpop.eup %12455 }
 0x8e8   :  { %v12458_v38 = vpop.eup %12457 }
 0x8e9   :  { %v9401_v61 = vadd.f32 %v12458_v38, %v12456_v52  ;;  %v12460_v6 = vpop.eup %12459  ;;  %v9267_v38 = vmul.f32 1.442695, %v9174_v63 }
 0x8ea   :  { %v12462_v4 = vpop.eup %12461 }
 0x8eb   :  { %v9402_v49 = vadd.f32 %v12460_v6, %v9401_v61  ;;  %v12464_v5 = vpop.eup %12463  ;;  %v9269_v61 = vmul.f32 1.442695, %v9175_v56  ;;  %12481 = vpow2.f32 %v9267_v38  ;;  %v17109_v56 = vld [vmem:[#allocation24_spill] sm:$0xff] }
 0x8ec   :  { %v12466_v52 = vpop.eup %12465  ;;  %v9180_v48 = vsub.f32 %v17109_v56, %v16594_v46 }
 0x8ed   :  { %v9403_v62 = vadd.f32 %v12462_v4, %v9402_v49  ;;  %v12468_v6 = vpop.eup %12467  ;;  %v9271_v4 = vmul.f32 1.442695, %v9176_v60  ;;  %12483 = vpow2.f32 %v9269_v61  ;;  %v17110_v60 = vld [vmem:[#allocation23_spill] sm:$0xff]  ;;  %v9277_v61 = vmul.f32 1.442695, %v9179_v15 }
 0x8ee   :  { %v12470_v49 = vpop.eup %12469  ;;  %v9181_v38 = vsub.f32 %v17110_v60, %v16594_v46  ;;  %v9279_v40 = vmul.f32 1.442695, %v9180_v48 }
 0x8ef   :  { %v9404_v18 = vadd.f32 %v12464_v5, %v9403_v62  ;;  %v9273_v5 = vmul.f32 1.442695, %v9177_v13  ;;  %v12472_v62 = vpop.eup %12471  ;;  %12485 = vpow2.f32 %v9271_v4 }
 0x8f0   :  { %v12474_v21 = vpop.eup %12473  ;;  %v9281_v60 = vmul.f32 1.442695, %v9181_v38  ;;  %v9185_v38 = vsub.f32 %v16461_v1, %v16594_v46 }
 0x8f1   :  { %v9405_v11 = vadd.f32 %v12466_v52, %v9404_v18  ;;  %v9275_v18 = vmul.f32 1.442695, %v9178_v19  ;;  %12487 = vpow2.f32 %v9273_v5  ;;  %v17112_v19 = vld [vmem:[#allocation10_spill] sm:$0xff] }
 0x8f2   :  { %v9202_v4 = vsub.f32 %v17112_v19, %v16634_v28 }
 0x8f3   :  { %v9406_v26 = vadd.f32 %v12468_v6, %v9405_v11  ;;  %v9182_v11 = vsub.f32 %v16432_v29, %v16594_v46  ;;  %v12476_v6 = vpop.eup %12475  ;;  %12489 = vpow2.f32 %v9275_v18  ;;  %v9184_v18 = vsub.f32 %v16452_v12, %v16594_v46 }
 0x8f4   :  { %12491 = vpow2.f32 %v9277_v61  ;;  %v17115_v61 = vld [vmem:[#allocation15_spill] sm:$0xff] }
 0x8f5   :  { %v9407_v63 = vadd.f32 %v12470_v49, %v9406_v26  ;;  %v17111_v26 = vld [vmem:[#allocation9_spill] sm:$0xff]  ;;  %v9283_v29 = vmul.f32 1.442695, %v9182_v11  ;;  %12493 = vpow2.f32 %v9279_v40  ;;  %v9186_v40 = vsub.f32 %v16472_v36, %v16594_v46 }
 0x8f6   :  { %v9201_v49 = vsub.f32 %v17111_v26, %v16634_v28  ;;  %v9323_v26 = vmul.f32 1.442695, %v9202_v4  ;;  %12495 = vpow2.f32 %v9281_v60  ;;  %v17116_v4 = vld [vmem:[#allocation16_spill] sm:$0xff] }
 0x8f7   :  { %v9408_v52 = vadd.f32 %v12472_v62, %v9407_v63  ;;  %v12478_v63 = vpop.eup %12477  ;;  %v9183_v62 = vsub.f32 %v16441_v2, %v16594_v46  ;;  %12497 = vpow2.f32 %v9283_v29  ;;  %v9289_v29 = vmul.f32 1.442695, %v9185_v38 }
 0x8f8   :  { %v9321_v48 = vmul.f32 1.442695, %v9201_v49  ;;  %v9287_v49 = vmul.f32 1.442695, %v9184_v18  ;;  %v9189_v38 = vsub.f32 %v16501_v17, %v16594_v46 }
 0x8f9   :  { %v9409_v13 = vadd.f32 %v12474_v21, %v9408_v52  ;;  %v17113_v21 = vld [vmem:[#allocation13_spill] sm:$0xff]  ;;  %v12480_v52 = vpop.eup %12479 }
 0x8fa   :  { %v9203_v15 = vsub.f32 %v17113_v21, %v16634_v28  ;;  %v12482_v32 = vpop.eup %12481  ;;  %12499 = vpow2.f32 %v9321_v48  ;;  %v9291_v48 = vmul.f32 1.442695, %v9186_v40  ;;  %v9190_v40 = vsub.f32 %v16512_v57, %v16594_v46 }
 0x8fb   :  { %v9410_v56 = vadd.f32 %v12476_v6, %v9409_v13  ;;  %v17114_v6 = vld [vmem:[#allocation42_spill] sm:$0xff]  ;;  %v12484_v12 = vpop.eup %12483  ;;  %12501 = vpow2.f32 %v9323_v26 }
 0x8fc   :  { %v9204_v19 = vsub.f32 %v17114_v6, %v16634_v28  ;;  %v9325_v21 = vmul.f32 1.442695, %v9203_v15  ;;  %v12486_v60 = vpop.eup %12485  ;;  %v17117_v15 = vld [vmem:[#allocation18_spill] sm:$0xff] }
 0x8fd   :  { %v9411_v5 = vadd.f32 %v12478_v63, %v9410_v56  ;;  %v9285_v56 = vmul.f32 1.442695, %v9183_v62  ;;  %v9205_v63 = vsub.f32 %v17115_v61, %v16634_v28 }
 0x8fe   :  { %v9327_v6 = vmul.f32 1.442695, %v9204_v19  ;;  %v12488_v18 = vpop.eup %12487  ;;  %v17118_v19 = vld [vmem:[#allocation19_spill] sm:$0xff] }
 0x8ff   :  { %v9412_v13 = vadd.f32 %v12480_v52, %v9411_v5  ;;  %v9206_v52 = vsub.f32 %v17116_v4, %v16634_v28  ;;  %12503 = vpow2.f32 %v9285_v56  ;;  %v9329_v61 = vmul.f32 1.442695, %v9205_v63  ;;  %v17119_v63 = vld [vmem:[#allocation45_spill] sm:$0xff] }
 0x900   :  { %12505 = vpow2.f32 %v9325_v21  ;;  %v12490_v56 = vpop.eup %12489 }
 0x901   :  { %v9413_v11 = vadd.f32 %v12482_v32, %v9412_v13  ;;  %v9187_v32 = vsub.f32 %v16481_v25, %v16594_v46  ;;  %v9207_v13 = vsub.f32 %v17117_v15, %v16634_v28  ;;  %12507 = vpow2.f32 %v9287_v49  ;;  %v12492_v49 = vpop.eup %12491 }
 0x902   :  { %12509 = vpow2.f32 %v9327_v6  ;;  %v9331_v4 = vmul.f32 1.442695, %v9206_v52  ;;  %v17120_v52 = vld [vmem:[#allocation47_spill] sm:$0xff] }
 0x903   :  { %v9414_v5 = vadd.f32 %v12484_v12, %v9413_v11  ;;  %v9188_v12 = vsub.f32 %v16492_v24, %v16594_v46  ;;  %v9208_v11 = vsub.f32 %v17118_v19, %v16634_v28  ;;  %12511 = vpow2.f32 %v9289_v29  ;;  %v12494_v29 = vpop.eup %12493 }
 0x904   :  { %12513 = vpow2.f32 %v9329_v61  ;;  %v9333_v15 = vmul.f32 1.442695, %v9207_v13  ;;  %v12496_v61 = vpop.eup %12495 }
 0x905   :  { %v9415_v62 = vadd.f32 %v12486_v60, %v9414_v5  ;;  %v9293_v5 = vmul.f32 1.442695, %v9187_v32  ;;  %v9209_v60 = vsub.f32 %v17119_v63, %v16634_v28  ;;  %12515 = vpow2.f32 %v9291_v48 }
 0x906   :  { %12517 = vpow2.f32 %v9331_v4  ;;  %v9335_v19 = vmul.f32 1.442695, %v9208_v11  ;;  %v9191_v32 = vsub.f32 %v16520_v14, %v16594_v46  ;;  %v9299_v4 = vmul.f32 1.442695, %v9190_v40 }
 0x907   :  { %v9416_v26 = vadd.f32 %v12488_v18, %v9415_v62  ;;  %v9295_v62 = vmul.f32 1.442695, %v9188_v12  ;;  %v9210_v18 = vsub.f32 %v17120_v52, %v16634_v28  ;;  %12519 = vpow2.f32 %v9293_v5  ;;  %v12498_v12 = vpop.eup %12497  ;;  %v17122_v52 = vld [vmem:[#allocation51_spill] sm:$0xff] }
 0x908   :  { %12521 = vpow2.f32 %v9333_v15  ;;  %v9337_v48 = vmul.f32 1.442695, %v9209_v60  ;;  %v12500_v11 = vpop.eup %12499  ;;  %v9212_v14 = vsub.f32 %v17122_v52, %v16634_v28  ;;  %v9301_v15 = vmul.f32 1.442695, %v9191_v32  ;;  %v17123_v60 = vld [vmem:[#allocation53_spill] sm:$0xff] }
 0x909   :  { %v9417_v21 = vadd.f32 %v12490_v56, %v9416_v26  ;;  %v9297_v26 = vmul.f32 1.442695, %v9189_v38  ;;  %v17121_v56 = vld [vmem:[#allocation49_spill] sm:$0xff]  ;;  %12523 = vpow2.f32 %v9295_v62  ;;  %v9339_v38 = vmul.f32 1.442695, %v9210_v18  ;;  %v12502_v5 = vpop.eup %12501  ;;  %v17124_v18 = vld [vmem:[#allocation55_spill] sm:$0xff] }
 0x90a   :  { %v9211_v63 = vsub.f32 %v17121_v56, %v16634_v28  ;;  %12525 = vpow2.f32 %v9335_v19  ;;  %v9442_v62 = vadd.f32 %v12502_v5, %v12500_v11  ;;  %v9214_v52 = vsub.f32 %v17124_v18, %v16634_v28 }
 0x90b   :  { %v9418_v6 = vadd.f32 %v12492_v49, %v9417_v21  ;;  %v9192_v21 = vsub.f32 %v16530_v41, %v16594_v46  ;;  %12527 = vpow2.f32 %v9297_v26  ;;  %v9343_v32 = vmul.f32 1.442695, %v9212_v14 }
 0x90c   :  { %v12504_v56 = vpop.eup %12503  ;;  %12529 = vpow2.f32 %v9337_v48  ;;  %v9341_v40 = vmul.f32 1.442695, %v9211_v63  ;;  %v9195_v48 = vsub.f32 %v16547_v33, %v16594_v46 }
 0x90d   :  { %v9419_v13 = vadd.f32 %v12494_v29, %v9418_v6  ;;  %v9193_v6 = vsub.f32 %v16535_v42, %v16594_v46  ;;  %v9213_v29 = vsub.f32 %v17123_v60, %v16634_v28  ;;  %12531 = vpow2.f32 %v9299_v4 }
 0x90e   :  { %v9303_v19 = vmul.f32 1.442695, %v9192_v21  ;;  %12533 = vpow2.f32 %v9339_v38 }
 0x90f   :  { %v9420_v49 = vadd.f32 %v12496_v61, %v9419_v13  ;;  %v12506_v61 = vpop.eup %12505  ;;  %v9194_v13 = vsub.f32 %v16542_v43, %v16594_v46  ;;  %12535 = vpow2.f32 %v9301_v15  ;;  %v9305_v63 = vmul.f32 1.442695, %v9193_v6 }
 0x910   :  { %v12508_v42 = vpop.eup %12507  ;;  %v9443_v57 = vadd.f32 %v12506_v61, %v9442_v62  ;;  %12537 = vpow2.f32 %v9341_v40  ;;  %v9345_v21 = vmul.f32 1.442695, %v9213_v29  ;;  %v9347_v6 = vmul.f32 1.442695, %v9214_v52 }
 0x911   :  { %v9421_v41 = vadd.f32 %v12498_v12, %v9420_v49  ;;  %v12510_v60 = vpop.eup %12509  ;;  %v17125_v12 = vld [vmem:[#allocation57_spill] sm:$0xff]  ;;  %12539 = vpow2.f32 %v9303_v19  ;;  %v9307_v14 = vmul.f32 1.442695, %v9194_v13 }
 0x912   :  { %v9215_v11 = vsub.f32 %v17125_v12, %v16634_v28  ;;  %v12512_v49 = vpop.eup %12511  ;;  %v9444_v5 = vadd.f32 %v12510_v60, %v9443_v57  ;;  %12541 = vpow2.f32 %v9343_v32  ;;  %v9309_v57 = vmul.f32 1.442695, %v9195_v48  ;;  %v17127_v60 = vld [vmem:[#allocation20_spill] sm:$0xff] }
 0x913   :  { %v9422_v26 = vadd.f32 %v12504_v56, %v9421_v41  ;;  %v12514_v18 = vpop.eup %12513  ;;  %v9196_v41 = vsub.f32 %v16554_v55, %v16594_v46  ;;  %v17126_v56 = vld [vmem:[#allocation59_spill] sm:$0xff]  ;;  %12543 = vpow2.f32 %v9305_v63  ;;  %v9217_v29 = vsub.f32 %v17127_v60, %v16634_v28 }
 0x914   :  { %v9216_v38 = vsub.f32 %v17126_v56, %v16634_v28  ;;  %v12516_v62 = vpop.eup %12515  ;;  %v9445_v61 = vadd.f32 %v12514_v18, %v9444_v5  ;;  %12545 = vpow2.f32 %v9345_v21  ;;  %v9349_v13 = vmul.f32 1.442695, %v9215_v11  ;;  %v17128_v18 = vld [vmem:[#allocation25_spill] sm:$0xff]  ;;  %v17129_v11 = vld [vmem:[#allocation22_spill] sm:$0xff] }
 0x915   :  { %v9423_v4 = vadd.f32 %v12508_v42, %v9422_v26  ;;  %v12518_v12 = vpop.eup %12517  ;;  %v9197_v42 = vsub.f32 %v16559_v58, %v16594_v46  ;;  %v9198_v32 = vsub.f32 %v16566_v7, %v16594_v46  ;;  %12547 = vpow2.f32 %v9307_v14 }
 0x916   :  { %v12520_v40 = vpop.eup %12519  ;;  %v9446_v26 = vadd.f32 %v12518_v12, %v9445_v61  ;;  %v9311_v52 = vmul.f32 1.442695, %v9196_v41  ;;  %12549 = vpow2.f32 %v9347_v6  ;;  %v9351_v48 = vmul.f32 1.442695, %v9216_v38 }
 0x917   :  { %v9424_v15 = vadd.f32 %v12512_v49, %v9423_v4  ;;  %v12522_v56 = vpop.eup %12521  ;;  %v9218_v49 = vsub.f32 %v17128_v18, %v16634_v28  ;;  %v9199_v21 = vsub.f32 %v16575_v50, %v16594_v46  ;;  %12551 = vpow2.f32 %v9309_v57 }
 0x918   :  { %v12524_v4 = vpop.eup %12523  ;;  %v9447_v5 = vadd.f32 %v12522_v56, %v9446_v26  ;;  %v9313_v12 = vmul.f32 1.442695, %v9197_v42  ;;  %12553 = vpow2.f32 %v9349_v13  ;;  %v9353_v41 = vmul.f32 1.442695, %v9217_v29 }
 0x919   :  { %v9425_v19 = vadd.f32 %v12516_v62, %v9424_v15  ;;  %v12526_v60 = vpop.eup %12525  ;;  %v9219_v62 = vsub.f32 %v17129_v11, %v16634_v28  ;;  %v9200_v6 = vsub.f32 %v16582_v54, %v16594_v46  ;;  %12555 = vpow2.f32 %v9311_v52 }
 0x91a   :  { %v12528_v15 = vpop.eup %12527  ;;  %v9448_v61 = vadd.f32 %v12526_v60, %v9447_v5  ;;  %v9315_v56 = vmul.f32 1.442695, %v9198_v32  ;;  %v9220_v38 = vsub.f32 %v16427_v59, %v16634_v28  ;;  %12557 = vpow2.f32 %v9351_v48 }
 0x91b   :  { %v9426_v63 = vadd.f32 %v12520_v40, %v9425_v19  ;;  %v12530_v18 = vpop.eup %12529  ;;  %v9355_v42 = vmul.f32 1.442695, %v9218_v49  ;;  %12559 = vpow2.f32 %v9313_v12  ;;  %v9221_v60 = vsub.f32 %v16436_v20, %v16634_v28 }
 0x91c   :  { %v12532_v40 = vpop.eup %12531  ;;  %v9449_v19 = vadd.f32 %v12530_v18, %v9448_v61  ;;  %12561 = vpow2.f32 %v9353_v41  ;;  %v9357_v54 = vmul.f32 1.442695, %v9219_v62  ;;  %v9222_v5 = vsub.f32 %v16447_v39, %v16634_v28 }
 0x91d   :  { %v9427_v14 = vadd.f32 %v12524_v4, %v9426_v63  ;;  %v12534_v26 = vpop.eup %12533  ;;  %v9317_v4 = vmul.f32 1.442695, %v9199_v21  ;;  %12563 = vpow2.f32 %v9315_v56  ;;  %v9319_v63 = vmul.f32 1.442695, %v9200_v6 }
 0x91e   :  { %v12536_v29 = vpop.eup %12535  ;;  %v9450_v52 = vadd.f32 %v12534_v26, %v9449_v19  ;;  %12565 = vpow2.f32 %v9355_v42  ;;  %v9359_v18 = vmul.f32 1.442695, %v9220_v38  ;;  %v9361_v62 = vmul.f32 1.442695, %v9221_v60 }
 0x91f   :  { %v9428_v57 = vadd.f32 %v12528_v15, %v9427_v14  ;;  %v12538_v32 = vpop.eup %12537  ;;  %12567 = vpow2.f32 %v9317_v4  ;;  %v9223_v15 = vsub.f32 %v16456_v8, %v16634_v28  ;;  %v9224_v6 = vsub.f32 %v16467_v47, %v16634_v28 }
 0x920   :  { %v12540_v48 = vpop.eup %12539  ;;  %v9451_v12 = vadd.f32 %v12538_v32, %v9450_v52  ;;  %12569 = vpow2.f32 %v9357_v54  ;;  %v9363_v38 = vmul.f32 1.442695, %v9222_v5  ;;  %v9225_v26 = vsub.f32 %v16476_v9, %v16634_v28 }
 0x921   :  { %v9429_v13 = vadd.f32 %v12532_v40, %v9428_v57  ;;  %v12542_v21 = vpop.eup %12541  ;;  %12571 = vpow2.f32 %v9319_v63  ;;  %v9226_v52 = vsub.f32 %v16487_v16, %v16634_v28 }
 0x922   :  { %v12544_v14 = vpop.eup %12543  ;;  %v9452_v61 = vadd.f32 %v12542_v21, %v9451_v12  ;;  %12573 = vpow2.f32 %v9359_v18  ;;  %v9227_v18 = vsub.f32 %v16496_v44, %v16634_v28 }
 0x923   :  { %v9430_v49 = vadd.f32 %v12536_v29, %v9429_v13  ;;  %v12546_v56 = vpop.eup %12545  ;;  %12575 = vpow2.f32 %v9361_v62  ;;  %v9365_v13 = vmul.f32 1.442695, %v9223_v15  ;;  %v9228_v62 = vsub.f32 %v16507_v3, %v16634_v28 }
 0x924   :  { %v12548_v40 = vpop.eup %12547  ;;  %v9453_v42 = vadd.f32 %v12546_v56, %v9452_v61  ;;  %12577 = vpow2.f32 %v9363_v38  ;;  %v17130_v38 = vld [vmem:[#allocation28_spill] sm:$0xff] }
 0x925   :  { %v9431_v41 = vadd.f32 %v12540_v48, %v9430_v49  ;;  %v12550_v19 = vpop.eup %12549  ;;  %v9367_v48 = vmul.f32 1.442695, %v9224_v6  ;;  %12579 = vpow2.f32 %v9365_v13 }
 0x926   :  { %v12552_v4 = vpop.eup %12551  ;;  %v9454_v60 = vadd.f32 %v12550_v19, %v9453_v42  ;;  %v9229_v42 = vsub.f32 %v17130_v38, %v16634_v28 }
 0x927   :  { %v9432_v57 = vadd.f32 %v12544_v14, %v9431_v41  ;;  %v12554_v54 = vpop.eup %12553  ;;  %v9369_v14 = vmul.f32 1.442695, %v9225_v26  ;;  %12581 = vpow2.f32 %v9367_v48 }
 0x928   :  { %v12556_v32 = vpop.eup %12555  ;;  %v9455_v49 = vadd.f32 %v12554_v54, %v9454_v60  ;;  %v9230_v60 = vsub.f32 %v16526_v51, %v16634_v28 }
 0x929   :  { %v9433_v29 = vadd.f32 %v12548_v40, %v9432_v57  ;;  %v12558_v5 = vpop.eup %12557  ;;  %v9371_v40 = vmul.f32 1.442695, %v9226_v52  ;;  %12583 = vpow2.f32 %v9369_v14 }
 0x92a   :  { %v12560_v12 = vpop.eup %12559  ;;  %v9456_v41 = vadd.f32 %v12558_v5, %v9455_v49  ;;  %v9231_v49 = vsub.f32 %v16532_v27, %v16634_v28 }
 0x92b   :  { %v9434_v63 = vadd.f32 %v12552_v4, %v9433_v29  ;;  %v12562_v15 = vpop.eup %12561  ;;  %v9373_v29 = vmul.f32 1.442695, %v9227_v18  ;;  %12585 = vpow2.f32 %v9371_v40  ;;  %v9232_v18 = vsub.f32 %v16539_v22, %v16634_v28 }
 0x92c   :  { %v12564_v61 = vpop.eup %12563  ;;  %v9457_v57 = vadd.f32 %v12562_v15, %v9456_v41  ;;  %v9379_v41 = vmul.f32 1.442695, %v9230_v60 }
 0x92d   :  { %v9435_v21 = vadd.f32 %v12556_v32, %v9434_v63  ;;  %v12566_v6 = vpop.eup %12565  ;;  %v9375_v63 = vmul.f32 1.442695, %v9228_v62  ;;  %12587 = vpow2.f32 %v9373_v29  ;;  %v9233_v62 = vsub.f32 %v16544_v45, %v16634_v28 }
 0x92e   :  { %v12568_v19 = vpop.eup %12567  ;;  %v9458_v13 = vadd.f32 %v12566_v6, %v9457_v57  ;;  %v9234_v6 = vsub.f32 %v16551_v53, %v16634_v28  ;;  %v9235_v29 = vsub.f32 %v16556_v0, %v16634_v28 }
 0x92f   :  { %v9436_v56 = vadd.f32 %v12560_v12, %v9435_v21  ;;  %v12570_v26 = vpop.eup %12569  ;;  %v9377_v12 = vmul.f32 1.442695, %v9229_v42  ;;  %12589 = vpow2.f32 %v9375_v63  ;;  %v9383_v42 = vmul.f32 1.442695, %v9232_v18 }
 0x930   :  { %v12572_v54 = vpop.eup %12571  ;;  %v9459_v48 = vadd.f32 %v12570_v26, %v9458_v13  ;;  %v9385_v13 = vmul.f32 1.442695, %v9233_v62  ;;  %v9387_v63 = vmul.f32 1.442695, %v9234_v6 }
 0x931   :  { %v9437_v4 = vadd.f32 %v12564_v61, %v9436_v56  ;;  %v12574_v52 = vpop.eup %12573  ;;  %12591 = vpow2.f32 %v9377_v12  ;;  %v9381_v56 = vmul.f32 1.442695, %v9231_v49  ;;  %v9237_v49 = vsub.f32 %v16568_v30, %v16634_v28 }
 0x932   :  { %v9460_v21 = vadd.f32 %v12574_v52, %v9459_v48  ;;  %v12576_v14 = vpop.eup %12575  ;;  %12593 = vpow2.f32 %v9379_v41 }
 0x933   :  { %v9438_v32 = vadd.f32 %v12568_v19, %v9437_v4  ;;  %v12578_v61 = vpop.eup %12577  ;;  %12595 = vpow2.f32 %v9381_v56  ;;  %v9393_v62 = vmul.f32 1.442695, %v9237_v49 }
 0x934   :  { %v9461_v15 = vadd.f32 %v12576_v14, %v9460_v21  ;;  %v12580_v57 = vpop.eup %12579  ;;  %12597 = vpow2.f32 %v9383_v42  ;;  %v9238_v14 = vsub.f32 %v16573_v35, %v16634_v28 }
 0x935   :  { %v9439_v5 = vadd.f32 %v12572_v54, %v9438_v32  ;;  %v12582_v4 = vpop.eup %12581  ;;  %v17131_v54 = vld [vmem:[#allocation33_spill] sm:$0xff]  ;;  %12599 = vpow2.f32 %v9385_v13 }
 0x936   :  { %v9462_v40 = vadd.f32 %v12578_v61, %v9461_v15  ;;  %v12584_v60 = vpop.eup %12583  ;;  %v9236_v32 = vsub.f32 %v17131_v54, %v16634_v28  ;;  %12601 = vpow2.f32 %v9387_v63  ;;  %v9239_v61 = vsub.f32 %v16584_v23, %v16634_v28 }
 0x937   :  { %9440 = vadd.xlane.f32.xlu1 %v9439_v5  ;;  %v9389_v5 = vmul.f32 1.442695, %v9235_v29  ;;  %v9395_v6 = vmul.f32 1.442695, %v9238_v14 }
 0x938   :  { %v9463_v19 = vadd.f32 %v12580_v57, %v9462_v40  ;;  %v12586_v52 = vpop.eup %12585  ;;  %v9391_v18 = vmul.f32 1.442695, %v9236_v32  ;;  %v9240_v57 = vsub.f32 %v16591_v10, %v16634_v28 }
 0x939   :  { %12603 = vpow2.f32 %v9389_v5 }
 0x93a   :  { %v9464_v26 = vadd.f32 %v12582_v4, %v9463_v19  ;;  %v12588_v21 = vpop.eup %12587  ;;  %12605 = vpow2.f32 %v9391_v18  ;;  %v9397_v4 = vmul.f32 1.442695, %v9239_v61 }
 0x93b   :  { %12607 = vpow2.f32 %v9393_v62 }
 0x93c   :  { %v9465_v48 = vadd.f32 %v12584_v60, %v9464_v26  ;;  %v12590_v15 = vpop.eup %12589  ;;  %12609 = vpow2.f32 %v9395_v6  ;;  %v9399_v26 = vmul.f32 1.442695, %v9240_v57 }
 0x93d   :  { %12611 = vpow2.f32 %v9397_v4 }
 0x93e   :  { %v9466_v12 = vadd.f32 %v12586_v52, %v9465_v48  ;;  %v12592_v40 = vpop.eup %12591  ;;  %12613 = vpow2.f32 %v9399_v26  ;;  %v17133_v26 = vld [vmem:[#allocation8_spill] sm:$0xff] }
 0x93f   :  { %v12594_v19 = vpop.eup %12593 }
 0x940   :  { %v9467_v41 = vadd.f32 %v12588_v21, %v9466_v12  ;;  %v12596_v13 = vpop.eup %12595 }
 0x941   :  { %v12598_v32 = vpop.eup %12597 }
 0x942   :  { %v9468_v56 = vadd.f32 %v12590_v15, %v9467_v41  ;;  %v12600_v48 = vpop.eup %12599 }
 0x943   :  { %v12602_v49 = vpop.eup %12601 }
 0x944   :  { %v9469_v42 = vadd.f32 %v12592_v40, %v9468_v56 }
 0x946   :  { %v9470_v29 = vadd.f32 %v12594_v19, %v9469_v42  ;;  %v12604_v10 = vpop.eup %12603 }
 0x947   :  { %v12606_v21 = vpop.eup %12605 }
 0x948   :  { %v9471_v60 = vadd.f32 %v12596_v13, %v9470_v29  ;;  %v12608_v18 = vpop.eup %12607  ;;  %v17132_v29 = vld [vmem:[#allocation7_spill] sm:$0xff] }
 0x949   :  { %v12610_v15 = vpop.eup %12609 }
 0x94a   :  { %v9472_v63 = vadd.f32 %v12598_v32, %v9471_v60  ;;  %v12612_v62 = vpop.eup %12611  ;;  %v17134_v32 = vld [vmem:[#allocation11_spill] sm:$0xff] }
 0x94b   :  { %v12614_v40 = vpop.eup %12613 }
 0x94c   :  { %v9473_v52 = vadd.f32 %v12600_v48, %v9472_v63  ;;  %v17135_v48 = vld [vmem:[#allocation12_spill] sm:$0xff] }
 0x94e   :  { %v9474_v5 = vadd.f32 %v12602_v49, %v9473_v52 }
 0x950   :  { %v9475_v12 = vadd.f32 %v12604_v10, %v9474_v5  ;;  %v17136_v10 = vld [vmem:[#allocation17_spill] sm:$0xff] }
 0x952   :  { %v9476_v14 = vadd.f32 %v12606_v21, %v9475_v12  ;;  %v17137_v21 = vld [vmem:[#allocation43_spill] sm:$0xff] }
 0x954   :  { %v9477_v41 = vadd.f32 %v12608_v18, %v9476_v14  ;;  %v17138_v18 = vld [vmem:[#allocation44_spill] sm:$0xff] }
 0x956   :  { %v9478_v61 = vadd.f32 %v12610_v15, %v9477_v41  ;;  %v17139_v15 = vld [vmem:[#allocation46_spill] sm:$0xff] }
 0x958   :  { %v9479_v56 = vadd.f32 %v12612_v62, %v9478_v61 }
 0x95a   :  { %v9480_v57 = vadd.f32 %v12614_v40, %v9479_v56  ;;  %v17142_v56 = vld [vmem:[#allocation52_spill] sm:$0xff] }
 0x95c   :  { %9481 = vadd.xlane.f32.xlu1 %v9480_v57  ;;  %v17143_v57 = vld [vmem:[#allocation54_spill] sm:$0xff] }
 0x9c0   :  { %v9441_v6 = vpop.xlane.xlu1 %9440 }
 0x9c1   :  { %12615 = vlog2.f32 %v9441_v6 }
 0x9ce   :  { %v12616_v42 = vpop.eup %12615 }
 0x9cf   :  { %v9484_v19 = vmul.f32 0.6931472, %v12616_v42  ;;  %v17144_v42 = vld [vmem:[#allocation56_spill] sm:$0xff] }
 0x9d1   :  { %v16759_v4 = vadd.f32 %v9484_v19, %v16594_v46 }
 0x9d3   :  { %v9489_v13 = vsub.f32 %v17132_v29, %v16759_v4  ;;  %v9490_v60 = vsub.f32 %v17133_v26, %v16759_v4  ;;  %v9491_v63 = vsub.f32 %v17134_v32, %v16759_v4  ;;  %v9492_v52 = vsub.f32 %v17135_v48, %v16759_v4  ;;  %v17145_v29 = vld [vmem:[#allocation58_spill] sm:$0xff]  ;;  %v17146_v26 = vld [vmem:[#allocation60_spill] sm:$0xff]  ;;  %v17147_v32 = vld [vmem:[#allocation21_spill] sm:$0xff] }
 0x9d4   :  { %v9493_v49 = vsub.f32 %v17105_v37, %v16759_v4  ;;  %v9494_v5 = vsub.f32 %v13642_v34, %v16759_v4  ;;  %v9495_v46 = vsub.f32 %v13765_v31, %v16759_v4  ;;  %v9496_v12 = vsub.f32 %v17136_v10, %v16759_v4  ;;  %v17140_v37 = vld [vmem:[#allocation48_spill] sm:$0xff]  ;;  %v17141_v34 = vld [vmem:[#allocation50_spill] sm:$0xff] }
 0x9d5   :  { %v9497_v14 = vsub.f32 %v17137_v21, %v16759_v4  ;;  %v9498_v41 = vsub.f32 %v17138_v18, %v16759_v4  ;;  %v9499_v61 = vsub.f32 %v17139_v15, %v16759_v4  ;;  %v9500_v62 = vsub.f32 %v17140_v37, %v16759_v4  ;;  %9569 = vst [vmem:[#allocation4] sm:$0xff] %v9489_v13  ;;  %v17148_v48 = vld [vmem:[#allocation24_spill] sm:$0xff]  ;;  %v17151_v21 = vld [vmem:[#allocation26_spill] sm:$0xff]  ;;  %v17152_v37 = vld [vmem:[#allocation29_spill] sm:$0xff] }
 0x9d6   :  { %9570 = vst [vmem:[#allocation4 + $0x8] sm:$0xff] %v9490_v60  ;;  %9571 = vst [vmem:[#allocation4 + $0x10] sm:$0xff] %v9491_v63  ;;  %v9501_v31 = vsub.f32 %v17141_v34, %v16759_v4  ;;  %v9502_v40 = vsub.f32 %v17142_v56, %v16759_v4  ;;  %v9503_v6 = vsub.f32 %v17143_v57, %v16759_v4 }
 0x9d7   :  { %9572 = vst [vmem:[#allocation4 + $0x18] sm:$0xff] %v9492_v52  ;;  %v9504_v19 = vsub.f32 %v17144_v42, %v16759_v4  ;;  %9573 = vst [vmem:[#allocation4 + $0x20] sm:$0xff] %v9493_v49  ;;  %v9505_v13 = vsub.f32 %v17145_v29, %v16759_v4  ;;  %v9506_v60 = vsub.f32 %v17146_v26, %v16759_v4  ;;  %v17149_v49 = vld [vmem:[#allocation23_spill] sm:$0xff]  ;;  %v17158_v29 = vld [vmem:[#allocation10_spill] sm:$0xff] }
 0x9d8   :  { %9574 = vst [vmem:[#allocation4 + $0x28] sm:$0xff] %v9494_v5  ;;  %9575 = vst [vmem:[#allocation4 + $0x30] sm:$0xff] %v9495_v46  ;;  %v9507_v63 = vsub.f32 %v17147_v32, %v16759_v4  ;;  %v9508_v52 = vsub.f32 %v17148_v48, %v16759_v4  ;;  %v9509_v5 = vsub.f32 %v17149_v49, %v16759_v4  ;;  %v17150_v46 = vld [vmem:[#allocation27_spill] sm:$0xff]  ;;  %v17159_v26 = vld [vmem:[#allocation13_spill] sm:$0xff] }
 0x9d9   :  { %9576 = vst [vmem:[#allocation4 + $0x38] sm:$0xff] %v9496_v12  ;;  %9577 = vst [vmem:[#allocation4 + $0x40] sm:$0xff] %v9497_v14  ;;  %v9510_v10 = vsub.f32 %v17150_v46, %v16759_v4  ;;  %v9511_v12 = vsub.f32 %v16441_v2, %v16759_v4  ;;  %v9512_v18 = vsub.f32 %v17151_v21, %v16759_v4  ;;  %v17160_v32 = vld [vmem:[#allocation42_spill] sm:$0xff]  ;;  %v17161_v48 = vld [vmem:[#allocation15_spill] sm:$0xff] }
 0x9da   :  { %9578 = vst [vmem:[#allocation4 + $0x48] sm:$0xff] %v9498_v41  ;;  %9579 = vst [vmem:[#allocation4 + $0x50] sm:$0xff] %v9499_v61  ;;  %v9513_v14 = vsub.f32 %v16461_v1, %v16759_v4  ;;  %v9514_v41 = vsub.f32 %v16472_v36, %v16759_v4  ;;  %v9515_v15 = vsub.f32 %v16481_v25, %v16759_v4  ;;  %v17153_v1 = vld [vmem:[#allocation32_spill] sm:$0xff]  ;;  %v17154_v36 = vld [vmem:[#allocation31_spill] sm:$0xff] }
 0x9db   :  { %9580 = vst [vmem:[#allocation4 + $0x58] sm:$0xff] %v9500_v62  ;;  %9581 = vst [vmem:[#allocation4 + $0x60] sm:$0xff] %v9501_v31  ;;  %v9516_v61 = vsub.f32 %v16492_v24, %v16759_v4  ;;  %v9517_v2 = vsub.f32 %v16501_v17, %v16759_v4  ;;  %v9518_v62 = vsub.f32 %v17152_v37, %v16759_v4  ;;  %v17155_v25 = vld [vmem:[#allocation30_spill] sm:$0xff]  ;;  %v17162_v49 = vld [vmem:[#allocation16_spill] sm:$0xff] }
 0x9dc   :  { %9582 = vst [vmem:[#allocation4 + $0x68] sm:$0xff] %v9502_v40  ;;  %9583 = vst [vmem:[#allocation4 + $0x70] sm:$0xff] %v9503_v6  ;;  %v9519_v34 = vsub.f32 %v17153_v1, %v16759_v4  ;;  %v9520_v31 = vsub.f32 %v17154_v36, %v16759_v4  ;;  %v9521_v24 = vsub.f32 %v17155_v25, %v16759_v4  ;;  %v17165_v21 = vld [vmem:[#allocation45_spill] sm:$0xff] }
 0x9dd   :  { %9584 = vst [vmem:[#allocation4 + $0x78] sm:$0xff] %v9504_v19  ;;  %9585 = vst [vmem:[#allocation4 + $0x80] sm:$0xff] %v9505_v13  ;;  %v9522_v56 = vsub.f32 %v16542_v43, %v16759_v4  ;;  %v9523_v17 = vsub.f32 %v16547_v33, %v16759_v4  ;;  %v9524_v40 = vsub.f32 %v16554_v55, %v16759_v4  ;;  %v17156_v43 = vld [vmem:[#allocation34_spill] sm:$0xff] }
 0x9de   :  { %9586 = vst [vmem:[#allocation4 + $0x88] sm:$0xff] %v9506_v60  ;;  %9587 = vst [vmem:[#allocation4 + $0x90] sm:$0xff] %v9507_v63  ;;  %v9525_v57 = vsub.f32 %v16559_v58, %v16759_v4  ;;  %v9526_v6 = vsub.f32 %v16566_v7, %v16759_v4  ;;  %v9527_v42 = vsub.f32 %v16575_v50, %v16759_v4  ;;  %v17157_v50 = vld [vmem:[#allocation9_spill] sm:$0xff] }
 0x9df   :  { %9588 = vst [vmem:[#allocation4 + $0x98] sm:$0xff] %v9508_v52  ;;  %9589 = vst [vmem:[#allocation4 + $0xa0] sm:$0xff] %v9509_v5  ;;  %v9528_v19 = vsub.f32 %v17156_v43, %v16759_v4 }
 0x9e0   :  { %9590 = vst [vmem:[#allocation4 + $0xa8] sm:$0xff] %v9510_v10  ;;  %9591 = vst [vmem:[#allocation4 + $0xb0] sm:$0xff] %v9511_v12  ;;  %v17164_v10 = vld [vmem:[#allocation19_spill] sm:$0xff] }
 0x9e1   :  { %9592 = vst [vmem:[#allocation4 + $0xb8] sm:$0xff] %v9512_v18  ;;  %9593 = vst [vmem:[#allocation4 + $0xc0] sm:$0xff] %v9513_v14  ;;  %v17166_v14 = vld [vmem:[#allocation47_spill] sm:$0xff] }
 0x9e2   :  { %9594 = vst [vmem:[#allocation4 + $0xc8] sm:$0xff] %v9514_v41  ;;  %9595 = vst [vmem:[#allocation4 + $0xd0] sm:$0xff] %v9515_v15  ;;  %v17167_v15 = vld [vmem:[#allocation49_spill] sm:$0xff] }
 0x9e3   :  { %9596 = vst [vmem:[#allocation4 + $0xd8] sm:$0xff] %v9516_v61  ;;  %9597 = vst [vmem:[#allocation4 + $0xe0] sm:$0xff] %v9517_v2  ;;  %v17168_v2 = vld [vmem:[#allocation51_spill] sm:$0xff] }
 0x9e4   :  { %9598 = vst [vmem:[#allocation4 + $0xe8] sm:$0xff] %v9518_v62  ;;  %9599 = vst [vmem:[#allocation4 + $0xf0] sm:$0xff] %v9519_v34  ;;  %v17169_v62 = vld [vmem:[#allocation53_spill] sm:$0xff]  ;;  %v17170_v34 = vld [vmem:[#allocation55_spill] sm:$0xff] }
 0x9e5   :  { %9600 = vst [vmem:[#allocation4 + $0xf8] sm:$0xff] %v9520_v31  ;;  %9601 = vst [vmem:[#allocation4 + $0x100] sm:$0xff] %v9521_v24  ;;  %v9482_v33 = vpop.xlane.xlu1 %9481  ;;  %v17171_v31 = vld [vmem:[#allocation57_spill] sm:$0xff]  ;;  %v17172_v24 = vld [vmem:[#allocation59_spill] sm:$0xff] }
 0x9e6   :  { %9602 = vst [vmem:[#allocation4 + $0x108] sm:$0xff] %v9522_v56  ;;  %9603 = vst [vmem:[#allocation4 + $0x110] sm:$0xff] %v9523_v17  ;;  %12617 = vlog2.f32 %v9482_v33  ;;  %v17173_v17 = vld [vmem:[#allocation20_spill] sm:$0xff] }
 0x9e7   :  { %9604 = vst [vmem:[#allocation4 + $0x118] sm:$0xff] %v9524_v40  ;;  %9605 = vst [vmem:[#allocation4 + $0x120] sm:$0xff] %v9525_v57  ;;  %v17174_v57 = vld [vmem:[#allocation25_spill] sm:$0xff] }
 0x9e8   :  { %9606 = vst [vmem:[#allocation4 + $0x128] sm:$0xff] %v9526_v6  ;;  %9607 = vst [vmem:[#allocation4 + $0x130] sm:$0xff] %v9527_v42 }
 0x9e9   :  { %9608 = vst [vmem:[#allocation4 + $0x138] sm:$0xff] %v9528_v19 }
 0x9f3   :  { %v12618_v55 = vpop.eup %12617 }
 0x9f4   :  { %v9486_v58 = vmul.f32 0.6931472, %v12618_v55 }
 0x9f6   :  { %v16842_v7 = vadd.f32 %v9486_v58, %v16634_v28  ;;  %v17163_v28 = vld [vmem:[#allocation18_spill] sm:$0xff] }
 0x9f8   :  { %v9529_v4 = vsub.f32 %v17157_v50, %v16842_v7  ;;  %v9530_v13 = vsub.f32 %v17158_v29, %v16842_v7  ;;  %v9531_v60 = vsub.f32 %v17159_v26, %v16842_v7  ;;  %v9532_v63 = vsub.f32 %v17160_v32, %v16842_v7 }
 0x9f9   :  { %v9533_v52 = vsub.f32 %v17161_v48, %v16842_v7  ;;  %v9534_v5 = vsub.f32 %v17162_v49, %v16842_v7  ;;  %v9535_v46 = vsub.f32 %v17163_v28, %v16842_v7  ;;  %v9536_v12 = vsub.f32 %v17164_v10, %v16842_v7 }
 0x9fa   :  { %v9537_v18 = vsub.f32 %v17165_v21, %v16842_v7  ;;  %v9538_v41 = vsub.f32 %v17166_v14, %v16842_v7  ;;  %v9539_v61 = vsub.f32 %v17167_v15, %v16842_v7  ;;  %v9540_v37 = vsub.f32 %v17168_v2, %v16842_v7  ;;  %9609 = vst [vmem:[#allocation4 + $0x140] sm:$0xff] %v9529_v4 }
 0x9fb   :  { %9610 = vst [vmem:[#allocation4 + $0x148] sm:$0xff] %v9530_v13  ;;  %9611 = vst [vmem:[#allocation4 + $0x150] sm:$0xff] %v9531_v60  ;;  %v9541_v1 = vsub.f32 %v17169_v62, %v16842_v7  ;;  %v9542_v36 = vsub.f32 %v17170_v34, %v16842_v7  ;;  %v9543_v25 = vsub.f32 %v17171_v31, %v16842_v7 }
 0x9fc   :  { %9612 = vst [vmem:[#allocation4 + $0x158] sm:$0xff] %v9532_v63  ;;  %v9544_v56 = vsub.f32 %v17172_v24, %v16842_v7  ;;  %9613 = vst [vmem:[#allocation4 + $0x160] sm:$0xff] %v9533_v52  ;;  %v9545_v40 = vsub.f32 %v17173_v17, %v16842_v7  ;;  %v9546_v6 = vsub.f32 %v17174_v57, %v16842_v7 }
 0x9fd   :  { %9614 = vst [vmem:[#allocation4 + $0x168] sm:$0xff] %v9534_v5  ;;  %9615 = vst [vmem:[#allocation4 + $0x170] sm:$0xff] %v9535_v46  ;;  %v9547_v42 = vsub.f32 %v17129_v11, %v16842_v7  ;;  %v9548_v43 = vsub.f32 %v16427_v59, %v16842_v7  ;;  %v9549_v19 = vsub.f32 %v16436_v20, %v16842_v7 }
 0x9fe   :  { %9616 = vst [vmem:[#allocation4 + $0x178] sm:$0xff] %v9536_v12  ;;  %9617 = vst [vmem:[#allocation4 + $0x180] sm:$0xff] %v9537_v18  ;;  %v9550_v33 = vsub.f32 %v16447_v39, %v16842_v7  ;;  %v9551_v55 = vsub.f32 %v16456_v8, %v16842_v7  ;;  %v9552_v58 = vsub.f32 %v16467_v47, %v16842_v7 }
 0x9ff   :  { %9618 = vst [vmem:[#allocation4 + $0x188] sm:$0xff] %v9538_v41  ;;  %9619 = vst [vmem:[#allocation4 + $0x190] sm:$0xff] %v9539_v61  ;;  %v9553_v59 = vsub.f32 %v16476_v9, %v16842_v7  ;;  %v9554_v11 = vsub.f32 %v16487_v16, %v16842_v7  ;;  %v9555_v20 = vsub.f32 %v16496_v44, %v16842_v7 }
 0xa00   :  { %9620 = vst [vmem:[#allocation4 + $0x198] sm:$0xff] %v9540_v37  ;;  %9621 = vst [vmem:[#allocation4 + $0x1a0] sm:$0xff] %v9541_v1  ;;  %v9556_v39 = vsub.f32 %v16507_v3, %v16842_v7  ;;  %v9557_v8 = vsub.f32 %v17130_v38, %v16842_v7  ;;  %v9558_v47 = vsub.f32 %v16526_v51, %v16842_v7 }
 0xa01   :  { %9622 = vst [vmem:[#allocation4 + $0x1a8] sm:$0xff] %v9542_v36  ;;  %9623 = vst [vmem:[#allocation4 + $0x1b0] sm:$0xff] %v9543_v25  ;;  %v9559_v9 = vsub.f32 %v16532_v27, %v16842_v7  ;;  %v9560_v16 = vsub.f32 %v16539_v22, %v16842_v7  ;;  %v9561_v44 = vsub.f32 %v16544_v45, %v16842_v7 }
 0xa02   :  { %9624 = vst [vmem:[#allocation4 + $0x1b8] sm:$0xff] %v9544_v56  ;;  %9625 = vst [vmem:[#allocation4 + $0x1c0] sm:$0xff] %v9545_v40  ;;  %v9562_v3 = vsub.f32 %v16551_v53, %v16842_v7  ;;  %v9563_v38 = vsub.f32 %v16556_v0, %v16842_v7  ;;  %v9564_v51 = vsub.f32 %v17131_v54, %v16842_v7  ;;  %v17175_v53 = vld [vmem:[#allocation35_spill] sm:$0xff] }
 0xa03   :  { %9626 = vst [vmem:[#allocation4 + $0x1c8] sm:$0xff] %v9546_v6  ;;  %9627 = vst [vmem:[#allocation4 + $0x1d0] sm:$0xff] %v9547_v42  ;;  %v9565_v27 = vsub.f32 %v16568_v30, %v16842_v7  ;;  %v9566_v22 = vsub.f32 %v16573_v35, %v16842_v7  ;;  %v9567_v45 = vsub.f32 %v16584_v23, %v16842_v7 }
 0xa04   :  { %9628 = vst [vmem:[#allocation4 + $0x1d8] sm:$0xff] %v9548_v43  ;;  %9629 = vst [vmem:[#allocation4 + $0x1e0] sm:$0xff] %v9549_v19  ;;  %v9568_v50 = vsub.f32 %v17175_v53, %v16842_v7 }
 0xa05   :  { %9630 = vst [vmem:[#allocation4 + $0x1e8] sm:$0xff] %v9550_v33  ;;  %9631 = vst [vmem:[#allocation4 + $0x1f0] sm:$0xff] %v9551_v55 }
 0xa06   :  { %9632 = vst [vmem:[#allocation4 + $0x1f8] sm:$0xff] %v9552_v58  ;;  %9633 = vst [vmem:[#allocation4 + $0x200] sm:$0xff] %v9553_v59 }
 0xa07   :  { %9634 = vst [vmem:[#allocation4 + $0x208] sm:$0xff] %v9554_v11  ;;  %9635 = vst [vmem:[#allocation4 + $0x210] sm:$0xff] %v9555_v20 }
 0xa08   :  { %9636 = vst [vmem:[#allocation4 + $0x218] sm:$0xff] %v9556_v39  ;;  %9637 = vst [vmem:[#allocation4 + $0x220] sm:$0xff] %v9557_v8 }
 0xa09   :  { %9638 = vst [vmem:[#allocation4 + $0x228] sm:$0xff] %v9558_v47  ;;  %9639 = vst [vmem:[#allocation4 + $0x230] sm:$0xff] %v9559_v9 }
 0xa0a   :  { %9640 = vst [vmem:[#allocation4 + $0x238] sm:$0xff] %v9560_v16  ;;  %9641 = vst [vmem:[#allocation4 + $0x240] sm:$0xff] %v9561_v44 }
 0xa0b   :  { %9642 = vst [vmem:[#allocation4 + $0x248] sm:$0xff] %v9562_v3  ;;  %9643 = vst [vmem:[#allocation4 + $0x250] sm:$0xff] %v9563_v38 }
 0xa0c   :  { %9644 = vst [vmem:[#allocation4 + $0x258] sm:$0xff] %v9564_v51  ;;  %9645 = vst [vmem:[#allocation4 + $0x260] sm:$0xff] %v9565_v27 }
 0xa0d   :  { %9646 = vst [vmem:[#allocation4 + $0x268] sm:$0xff] %v9566_v22  ;;  %9647 = vst [vmem:[#allocation4 + $0x270] sm:$0xff] %v9567_v45 }
 0xa0e   :  { %9648 = vst [vmem:[#allocation4 + $0x278] sm:$0xff] %v9568_v50 }
 0xa0f   :  { %12643 = shalt.err (!%p12640_p4)
}
 0xa10   :  { %s12655_s18 = smov 5120   ;;  %s12656_s19 = smov 320  }
 0xa11   :  { %9660 = dma.vmem_to_hbm [thread:$0]  %s9655_s16, 10240, %s16929_s2, [#allocation5], %s12655_s18, %s12655_s18, %s12656_s19  }
 0xa12   :  { %12652 = dma.done.wait [#allocation5], 10240  }
 0xa13   :  { %12653 = vsyncadd [#allocation5], 4294957056 }
 0xa14   :  { %9664 = vsyncpa [#allocation5], 1 }

</bundles_post_ra>
